<compile_context>
chip_gen: v7x
topology: tpu7x:2x2x1
jax: 0.10.0
libtpu: 0.0.40
codegen_flags: <defaults>
</compile_context>

<pallas_src>
import functools

import numpy as np

import jax
import jax.numpy as jnp
from jax.experimental import pallas as pl
from jax.experimental.pallas import tpu as pltpu


# ----------------------------------------------------------------------------
# Fused kernel
# ----------------------------------------------------------------------------
def _make_kernel(conv_ks, num_layers, h3, hb):
    """Builds the fused forward kernel.

    conv_ks    : tuple of conv kernel sizes per stage, e.g. (5, 3, 3)
    num_layers : number of stacked LSTM layers (>= 1)
    h3         : height of the final CNN feature map (rows folded into LSTM layer 0)
    hb         : per-gate lane block (hidden padded up to a multiple of 128)
    """

    def lstm_gates(pre):
        # pre: (1, 3*hb); each gate occupies a 128-aligned block of hb lanes.
        # Lanes >= hidden inside each block are exactly 0 (zero weight cols / bias),
        # so the resulting hidden vector is exactly 0 there as well.
        i = jax.nn.sigmoid(pre[:, 0:hb])
        g = jnp.tanh(pre[:, hb:2 * hb])
        o = jax.nn.sigmoid(pre[:, 2 * hb:3 * hb])
        return o * jnp.tanh(i * g)                      # c = i*g since c0 == 0

    def conv_stage(x, r_ref, g_ref, b_ref, k):
        # x: (Hin, Win*Cin); r_ref: (k+1, Hout, Hin); g_ref: (2k, Win*Cin, Wout*Cout)
        # b_ref: (1, Wout*Cout)
        v = [jnp.dot(r_ref[t], x, preferred_element_type=jnp.float32)
             for t in range(k + 1)]                     # row-selected inputs, one per (sy+dy)
        pooled = None
        for sy in (0, 1):
            for sx in (0, 1):
                a = None
                for dy in range(k):
                    term = jnp.dot(v[sy + dy], g_ref[sx * k + dy],
                                   preferred_element_type=jnp.float32)
                    a = term if a is None else a + term
                pooled = a if pooled is None else jnp.maximum(pooled, a)
        # bias + ReLU hoisted out of the 2x2 max
        return jnp.maximum(pooled + b_ref[...], 0.0)

    def kernel(*refs):
        out_ref = refs[-1]
        x = refs[0][0]                                  # (H, W*Cin) for this batch element

        idx = 1
        for k in conv_ks:                               # 3 fused conv+ReLU+pool stages
            x = conv_stage(x, refs[idx], refs[idx + 1], refs[idx + 2], k)
            idx += 3
        # x is now the final CNN feature map: (h3, w3) with Cout == 1.

        rpick_ref = refs[idx]                           # (h3, 1, h3) row pickers
        w0_ref = refs[idx + 1]                          # (h3, w3, 3*hb) layer-0 gate weight
        b0_ref = refs[idx + 2]                          # (1, 3*hb)
        idx += 3

        # LSTM layer 0: CNN flatten folded into the fused gate pre-activation.
        pre = b0_ref[...]
        for h in range(h3):
            row = jnp.dot(rpick_ref[h], x, preferred_element_type=jnp.float32)   # (1, w3)
            pre = pre + jnp.dot(row, w0_ref[h], preferred_element_type=jnp.float32)
        hvec = lstm_gates(pre)                          # (1, hb)

        # Remaining stacked LSTM layers (single time step, zero initial state).
        for _ in range(num_layers - 1):
            w_ref, b_ref = refs[idx], refs[idx + 1]
            idx += 2
            pre = jnp.dot(hvec, w_ref[...], preferred_element_type=jnp.float32) + b_ref[...]
            hvec = lstm_gates(pre)

        # Final Linear -> lane-dense (1, H*W) row.
        wl_ref, bl_ref = refs[idx], refs[idx + 1]
        out_ref[0] = jnp.dot(hvec, wl_ref[...], preferred_element_type=jnp.float32) + bl_ref[...]

    return kernel


# ----------------------------------------------------------------------------
# pallas_call wrapper
# ----------------------------------------------------------------------------
def _const_index_map(nd):
    def index_map(b):
        return (0,) * nd
    return index_map


def build_forward(prep, B, H, W, Cin):
    HW = H * W
    kernel = _make_kernel(prep["conv_ks"], prep["num_layers"], prep["h3"], prep["hb"])

    in_specs = [pl.BlockSpec((1, H, W * Cin), lambda b: (b, 0, 0))]
    for a in prep["operands"]:
        in_specs.append(pl.BlockSpec(a.shape, _const_index_map(a.ndim)))

    call = pl.pallas_call(
        kernel,
        out_shape=jax.ShapeDtypeStruct((B, 1, HW), jnp.float32),
        grid=(B,),
        in_specs=in_specs,
        out_specs=pl.BlockSpec((1, 1, HW), lambda b: (b, 0, 0)),
        compiler_params=pltpu.CompilerParams(dimension_semantics=("parallel",)),
    )

    @jax.jit
    def forward(x_nchw, operands):
        # NCHW -> NHWC -> (B, H, W*Cin): channels innermost on the lane axis.
        xr = jnp.transpose(x_nchw, (0, 2, 3, 1)).reshape(B, H, W * Cin)
        return call(xr, *operands)                      # (B, 1, H*W), like PyTorch

    return forward


# ----------------------------------------------------------------------------
# Parameter init (PyTorch-style layouts) + host-side folding into kernel operands
# ----------------------------------------------------------------------------
def init_params(key, input_channels, c1, c2, lstm_input_size, hidden, num_layers, H, W):
    keys = iter(jax.random.split(key, 128))

    def u(shape, fan):
        bound = float(fan) ** -0.5
        return jax.random.uniform(next(keys), shape, jnp.float32, -bound, bound)

    p = {"conv": [], "lstm": []}
    for cout, cin, k in ((c1, input_channels, 5), (c2, c1, 3), (1, c2, 3)):
        fan = cin * k * k
        p["conv"].append({"w": u((cout, cin, k, k), fan), "b": u((cout,), fan)})

    for layer in range(num_layers):
        in_dim = lstm_input_size if layer == 0 else hidden
        lp = {}
        for gate in ("i", "g", "o"):                    # forget gate omitted: c0 == 0 exactly
            lp["w_ih_" + gate] = u((hidden, in_dim), hidden)
            lp["b_" + gate] = u((hidden,), hidden) + u((hidden,), hidden)   # b_ih + b_hh
        p["lstm"].append(lp)

    p["linear_w"] = u((H * W, hidden), hidden)
    p["linear_b"] = u((H * W,), hidden)
    return p


def prepare_params(params, *, input_channels, c1, c2, hidden, num_layers, H, W):
    """One-time (weight-only) folding of the PyTorch-layout parameters into the
    matrices consumed by the fused kernel.  Pure host-side numpy."""
    f32 = np.float32
    operands = []

    conv_specs = [(5, 2, H, W, input_channels, c1),
                  (3, 1, H // 2, W // 2, c1, c2),
                  (3, 1, H // 4, W // 4, c2, 1)]
    conv_ks = tuple(s[0] for s in conv_specs)

    for (k, pad, hin, win, cin, cout), cp in zip(conv_specs, params["conv"]):
        wc = np.asarray(cp["w"], f32)                   # (cout, cin, k, k) — torch layout
        bc = np.asarray(cp["b"], f32)                   # (cout,)
        hout, wout = hin // 2, win // 2

        R = np.zeros((k + 1, hout, hin), f32)           # row selectors (dy+sy combined)
        for t in range(k + 1):
            for ho in range(hout):
                h = 2 * ho + t - pad
                if 0 <= h < hin:
                    R[t, ho, h] = 1.0

        G = np.zeros((2 * k, win * cin, wout * cout), f32)   # banded conv-weight matrices
        for sx in range(2):
            for dy in range(k):
                gi = sx * k + dy
                for wo in range(wout):
                    for dx in range(k):
                        w_in = 2 * wo + sx + dx - pad
                        if 0 <= w_in < win:
                            G[gi,
                              w_in * cin:(w_in + 1) * cin,
                              wo * cout:(wo + 1) * cout] = wc[:, :, dy, dx].T

        bias = np.tile(bc, wout).reshape(1, wout * cout)
        operands += [jnp.asarray(R), jnp.asarray(G), jnp.asarray(bias)]

    h3, w3 = H // 8, W // 8
    hb = 128 * ((hidden + 127) // 128)                  # per-gate lane block (128-aligned)
    assert params["lstm"][0]["w_ih_i"].shape[1] == h3 * w3, "lstm_input_size mismatch"

    rpick = np.zeros((h3, 1, h3), f32)                  # picks row h of the final feature map
    for h in range(h3):
        rpick[h, 0, h] = 1.0
    operands.append(jnp.asarray(rpick))

    def fused_gate_weight(lp, in_valid, in_pad):
        Wf = np.zeros((in_pad, 3 * hb), f32)
        bf = np.zeros((1, 3 * hb), f32)
        for gi, gate in enumerate(("i", "g", "o")):
            Wf[:in_valid, gi * hb:gi * hb + hidden] = np.asarray(lp["w_ih_" + gate], f32).T
            bf[0, gi * hb:gi * hb + hidden] = np.asarray(lp["b_" + gate], f32)
        return Wf, bf

    W0, b0 = fused_gate_weight(params["lstm"][0], h3 * w3, h3 * w3)
    operands += [jnp.asarray(W0.reshape(h3, w3, 3 * hb)), jnp.asarray(b0)]
    for layer in range(1, num_layers):
        Wl, bl = fused_gate_weight(params["lstm"][layer], hidden, hb)
        operands += [jnp.asarray(Wl), jnp.asarray(bl)]

    Wlin = np.zeros((hb, H * W), f32)
    Wlin[:hidden, :] = np.asarray(params["linear_w"], f32).T
    blin = np.asarray(params["linear_b"], f32).reshape(1, H * W)
    operands += [jnp.asarray(Wlin), jnp.asarray(blin)]

    return {"operands": operands, "conv_ks": conv_ks, "num_layers": num_layers,
            "h3": h3, "hb": hb}


# ----------------------------------------------------------------------------
if __name__ == "__main__":
    # Small, self-consistent config (matches the PyTorch module's constraints):
    B, Cin, H, W = 2, 4, 16, 16
    c1, c2 = 8, 8
    lstm_input_size = (H // 8) * (W // 8)               # must equal the CNN output size
    hidden, num_layers = 32, 2

    key = jax.random.PRNGKey(0)
    k_x, k_p = jax.random.split(key)
    x = jax.random.normal(k_x, (B, Cin, H, W), jnp.float32)   # NCHW, like PyTorch

    params = init_params(k_p, Cin, c1, c2, lstm_input_size, hidden, num_layers, H, W)
    prep = prepare_params(params, input_channels=Cin, c1=c1, c2=c2,
                          hidden=hidden, num_layers=num_layers, H=H, W=W)
    forward = build_forward(prep, B=B, H=H, W=W, Cin=Cin)

    out = forward(x, prep["operands"])
    out = jax.block_until_ready(out)
    assert out.shape == (B, 1, H * W), out.shape
    assert bool(jnp.all(jnp.isfinite(out)))
    print("KERNEL_OK")
</pallas_src>

<mosaic_0001>
module attributes {stable_mosaic.version = 11 : i64} {
  func.func @kernel(%arg0: i32, %arg1: memref<1x16x64xf32, #tpu.memory_space<vmem>>, %arg2: memref<6x8x16xf32, #tpu.memory_space<vmem>>, %arg3: memref<10x64x64xf32, #tpu.memory_space<vmem>>, %arg4: memref<1x64xf32, #tpu.memory_space<vmem>>, %arg5: memref<4x4x8xf32, #tpu.memory_space<vmem>>, %arg6: memref<6x64x32xf32, #tpu.memory_space<vmem>>, %arg7: memref<1x32xf32, #tpu.memory_space<vmem>>, %arg8: memref<4x2x4xf32, #tpu.memory_space<vmem>>, %arg9: memref<6x32x2xf32, #tpu.memory_space<vmem>>, %arg10: memref<1x2xf32, #tpu.memory_space<vmem>>, %arg11: memref<2x1x2xf32, #tpu.memory_space<vmem>>, %arg12: memref<2x2x384xf32, #tpu.memory_space<vmem>>, %arg13: memref<1x384xf32, #tpu.memory_space<vmem>>, %arg14: memref<128x384xf32, #tpu.memory_space<vmem>>, %arg15: memref<1x384xf32, #tpu.memory_space<vmem>>, %arg16: memref<128x256xf32, #tpu.memory_space<vmem>>, %arg17: memref<1x256xf32, #tpu.memory_space<vmem>>, %arg18: memref<1x1x256xf32, #tpu.memory_space<vmem>>) attributes {dimension_semantics = [#tpu.dimension_semantics<parallel>], iteration_bounds = array<i64: 2>, scalar_prefetch = 0 : i64, scratch_operands = 0 : i64, tpu.core_type = #tpu.core_type<tc>, window_params = [{transform_indices = @transform_0, window_bounds = array<i64: 1, 16, 64>}, {pipeline_mode = #tpu.pipeline_mode<synchronous>, transform_indices = @transform_1, window_bounds = array<i64: 6, 8, 16>}, {pipeline_mode = #tpu.pipeline_mode<synchronous>, transform_indices = @transform_2, window_bounds = array<i64: 10, 64, 64>}, {pipeline_mode = #tpu.pipeline_mode<synchronous>, transform_indices = @transform_3, window_bounds = array<i64: 1, 64>}, {pipeline_mode = #tpu.pipeline_mode<synchronous>, transform_indices = @transform_4, window_bounds = array<i64: 4, 4, 8>}, {pipeline_mode = #tpu.pipeline_mode<synchronous>, transform_indices = @transform_5, window_bounds = array<i64: 6, 64, 32>}, {pipeline_mode = #tpu.pipeline_mode<synchronous>, transform_indices = @transform_6, window_bounds = array<i64: 1, 32>}, {pipeline_mode = #tpu.pipeline_mode<synchronous>, transform_indices = @transform_7, window_bounds = array<i64: 4, 2, 4>}, {pipeline_mode = #tpu.pipeline_mode<synchronous>, transform_indices = @transform_8, window_bounds = array<i64: 6, 32, 2>}, {pipeline_mode = #tpu.pipeline_mode<synchronous>, transform_indices = @transform_9, window_bounds = array<i64: 1, 2>}, {pipeline_mode = #tpu.pipeline_mode<synchronous>, transform_indices = @transform_10, window_bounds = array<i64: 2, 1, 2>}, {pipeline_mode = #tpu.pipeline_mode<synchronous>, transform_indices = @transform_11, window_bounds = array<i64: 2, 2, 384>}, {pipeline_mode = #tpu.pipeline_mode<synchronous>, transform_indices = @transform_12, window_bounds = array<i64: 1, 384>}, {pipeline_mode = #tpu.pipeline_mode<synchronous>, transform_indices = @transform_13, window_bounds = array<i64: 128, 384>}, {pipeline_mode = #tpu.pipeline_mode<synchronous>, transform_indices = @transform_14, window_bounds = array<i64: 1, 384>}, {pipeline_mode = #tpu.pipeline_mode<synchronous>, transform_indices = @transform_15, window_bounds = array<i64: 128, 256>}, {pipeline_mode = #tpu.pipeline_mode<synchronous>, transform_indices = @transform_16, window_bounds = array<i64: 1, 256>}, {transform_indices = @transform_17, window_bounds = array<i64: 1, 1, 256>}]} {
    %c0 = arith.constant 0 : index
    %c0_0 = arith.constant 0 : index
    %c0_1 = arith.constant 0 : index
    %0 = vector.load %arg1[%c0, %c0_0, %c0_1] : memref<1x16x64xf32, #tpu.memory_space<vmem>>, vector<1x16x64xf32>
    %1 = vector.shape_cast %0 : vector<1x16x64xf32> to vector<16x64xf32>
    %c0_2 = arith.constant 0 : index
    %c0_3 = arith.constant 0 : index
    %c0_4 = arith.constant 0 : index
    %2 = vector.load %arg2[%c0_2, %c0_3, %c0_4] : memref<6x8x16xf32, #tpu.memory_space<vmem>>, vector<1x8x16xf32>
    %3 = vector.shape_cast %2 : vector<1x8x16xf32> to vector<8x16xf32>
    %cst = arith.constant dense<0.000000e+00> : vector<8x64xf32>
    %4 = tpu.matmul %3, %1, %cst {dimension_numbers = #tpu.dot_dimension_numbers<[1], [0], [0], [1], [0, 0, 1, 1], [], []>} : vector<8x16xf32>, vector<16x64xf32>, vector<8x64xf32> -> vector<8x64xf32>
    %c1 = arith.constant 1 : index
    %c0_5 = arith.constant 0 : index
    %c0_6 = arith.constant 0 : index
    %5 = vector.load %arg2[%c1, %c0_5, %c0_6] : memref<6x8x16xf32, #tpu.memory_space<vmem>>, vector<1x8x16xf32>
    %6 = vector.shape_cast %5 : vector<1x8x16xf32> to vector<8x16xf32>
    %cst_7 = arith.constant dense<0.000000e+00> : vector<8x64xf32>
    %7 = tpu.matmul %6, %1, %cst_7 {dimension_numbers = #tpu.dot_dimension_numbers<[1], [0], [0], [1], [0, 0, 1, 1], [], []>} : vector<8x16xf32>, vector<16x64xf32>, vector<8x64xf32> -> vector<8x64xf32>
    %c2 = arith.constant 2 : index
    %c0_8 = arith.constant 0 : index
    %c0_9 = arith.constant 0 : index
    %8 = vector.load %arg2[%c2, %c0_8, %c0_9] : memref<6x8x16xf32, #tpu.memory_space<vmem>>, vector<1x8x16xf32>
    %9 = vector.shape_cast %8 : vector<1x8x16xf32> to vector<8x16xf32>
    %cst_10 = arith.constant dense<0.000000e+00> : vector<8x64xf32>
    %10 = tpu.matmul %9, %1, %cst_10 {dimension_numbers = #tpu.dot_dimension_numbers<[1], [0], [0], [1], [0, 0, 1, 1], [], []>} : vector<8x16xf32>, vector<16x64xf32>, vector<8x64xf32> -> vector<8x64xf32>
    %c3 = arith.constant 3 : index
    %c0_11 = arith.constant 0 : index
    %c0_12 = arith.constant 0 : index
    %11 = vector.load %arg2[%c3, %c0_11, %c0_12] : memref<6x8x16xf32, #tpu.memory_space<vmem>>, vector<1x8x16xf32>
    %12 = vector.shape_cast %11 : vector<1x8x16xf32> to vector<8x16xf32>
    %cst_13 = arith.constant dense<0.000000e+00> : vector<8x64xf32>
    %13 = tpu.matmul %12, %1, %cst_13 {dimension_numbers = #tpu.dot_dimension_numbers<[1], [0], [0], [1], [0, 0, 1, 1], [], []>} : vector<8x16xf32>, vector<16x64xf32>, vector<8x64xf32> -> vector<8x64xf32>
    %c4 = arith.constant 4 : index
    %c0_14 = arith.constant 0 : index
    %c0_15 = arith.constant 0 : index
    %14 = vector.load %arg2[%c4, %c0_14, %c0_15] : memref<6x8x16xf32, #tpu.memory_space<vmem>>, vector<1x8x16xf32>
    %15 = vector.shape_cast %14 : vector<1x8x16xf32> to vector<8x16xf32>
    %cst_16 = arith.constant dense<0.000000e+00> : vector<8x64xf32>
    %16 = tpu.matmul %15, %1, %cst_16 {dimension_numbers = #tpu.dot_dimension_numbers<[1], [0], [0], [1], [0, 0, 1, 1], [], []>} : vector<8x16xf32>, vector<16x64xf32>, vector<8x64xf32> -> vector<8x64xf32>
    %c5 = arith.constant 5 : index
    %c0_17 = arith.constant 0 : index
    %c0_18 = arith.constant 0 : index
    %17 = vector.load %arg2[%c5, %c0_17, %c0_18] : memref<6x8x16xf32, #tpu.memory_space<vmem>>, vector<1x8x16xf32>
    %18 = vector.shape_cast %17 : vector<1x8x16xf32> to vector<8x16xf32>
    %cst_19 = arith.constant dense<0.000000e+00> : vector<8x64xf32>
    %19 = tpu.matmul %18, %1, %cst_19 {dimension_numbers = #tpu.dot_dimension_numbers<[1], [0], [0], [1], [0, 0, 1, 1], [], []>} : vector<8x16xf32>, vector<16x64xf32>, vector<8x64xf32> -> vector<8x64xf32>
    %c0_20 = arith.constant 0 : index
    %c0_21 = arith.constant 0 : index
    %c0_22 = arith.constant 0 : index
    %20 = vector.load %arg3[%c0_20, %c0_21, %c0_22] : memref<10x64x64xf32, #tpu.memory_space<vmem>>, vector<1x64x64xf32>
    %21 = vector.shape_cast %20 : vector<1x64x64xf32> to vector<64x64xf32>
    %cst_23 = arith.constant dense<0.000000e+00> : vector<8x64xf32>
    %22 = tpu.matmul %4, %21, %cst_23 {dimension_numbers = #tpu.dot_dimension_numbers<[1], [0], [0], [1], [0, 0, 1, 1], [], []>} : vector<8x64xf32>, vector<64x64xf32>, vector<8x64xf32> -> vector<8x64xf32>
    %c1_24 = arith.constant 1 : index
    %c0_25 = arith.constant 0 : index
    %c0_26 = arith.constant 0 : index
    %23 = vector.load %arg3[%c1_24, %c0_25, %c0_26] : memref<10x64x64xf32, #tpu.memory_space<vmem>>, vector<1x64x64xf32>
    %24 = vector.shape_cast %23 : vector<1x64x64xf32> to vector<64x64xf32>
    %cst_27 = arith.constant dense<0.000000e+00> : vector<8x64xf32>
    %25 = tpu.matmul %7, %24, %cst_27 {dimension_numbers = #tpu.dot_dimension_numbers<[1], [0], [0], [1], [0, 0, 1, 1], [], []>} : vector<8x64xf32>, vector<64x64xf32>, vector<8x64xf32> -> vector<8x64xf32>
    %26 = arith.addf %22, %25 : vector<8x64xf32>
    %c2_28 = arith.constant 2 : index
    %c0_29 = arith.constant 0 : index
    %c0_30 = arith.constant 0 : index
    %27 = vector.load %arg3[%c2_28, %c0_29, %c0_30] : memref<10x64x64xf32, #tpu.memory_space<vmem>>, vector<1x64x64xf32>
    %28 = vector.shape_cast %27 : vector<1x64x64xf32> to vector<64x64xf32>
    %cst_31 = arith.constant dense<0.000000e+00> : vector<8x64xf32>
    %29 = tpu.matmul %10, %28, %cst_31 {dimension_numbers = #tpu.dot_dimension_numbers<[1], [0], [0], [1], [0, 0, 1, 1], [], []>} : vector<8x64xf32>, vector<64x64xf32>, vector<8x64xf32> -> vector<8x64xf32>
    %30 = arith.addf %26, %29 : vector<8x64xf32>
    %c3_32 = arith.constant 3 : index
    %c0_33 = arith.constant 0 : index
    %c0_34 = arith.constant 0 : index
    %31 = vector.load %arg3[%c3_32, %c0_33, %c0_34] : memref<10x64x64xf32, #tpu.memory_space<vmem>>, vector<1x64x64xf32>
    %32 = vector.shape_cast %31 : vector<1x64x64xf32> to vector<64x64xf32>
    %cst_35 = arith.constant dense<0.000000e+00> : vector<8x64xf32>
    %33 = tpu.matmul %13, %32, %cst_35 {dimension_numbers = #tpu.dot_dimension_numbers<[1], [0], [0], [1], [0, 0, 1, 1], [], []>} : vector<8x64xf32>, vector<64x64xf32>, vector<8x64xf32> -> vector<8x64xf32>
    %34 = arith.addf %30, %33 : vector<8x64xf32>
    %c4_36 = arith.constant 4 : index
    %c0_37 = arith.constant 0 : index
    %c0_38 = arith.constant 0 : index
    %35 = vector.load %arg3[%c4_36, %c0_37, %c0_38] : memref<10x64x64xf32, #tpu.memory_space<vmem>>, vector<1x64x64xf32>
    %36 = vector.shape_cast %35 : vector<1x64x64xf32> to vector<64x64xf32>
    %cst_39 = arith.constant dense<0.000000e+00> : vector<8x64xf32>
    %37 = tpu.matmul %16, %36, %cst_39 {dimension_numbers = #tpu.dot_dimension_numbers<[1], [0], [0], [1], [0, 0, 1, 1], [], []>} : vector<8x64xf32>, vector<64x64xf32>, vector<8x64xf32> -> vector<8x64xf32>
    %38 = arith.addf %34, %37 : vector<8x64xf32>
    %c5_40 = arith.constant 5 : index
    %c0_41 = arith.constant 0 : index
    %c0_42 = arith.constant 0 : index
    %39 = vector.load %arg3[%c5_40, %c0_41, %c0_42] : memref<10x64x64xf32, #tpu.memory_space<vmem>>, vector<1x64x64xf32>
    %40 = vector.shape_cast %39 : vector<1x64x64xf32> to vector<64x64xf32>
    %cst_43 = arith.constant dense<0.000000e+00> : vector<8x64xf32>
    %41 = tpu.matmul %4, %40, %cst_43 {dimension_numbers = #tpu.dot_dimension_numbers<[1], [0], [0], [1], [0, 0, 1, 1], [], []>} : vector<8x64xf32>, vector<64x64xf32>, vector<8x64xf32> -> vector<8x64xf32>
    %c6 = arith.constant 6 : index
    %c0_44 = arith.constant 0 : index
    %c0_45 = arith.constant 0 : index
    %42 = vector.load %arg3[%c6, %c0_44, %c0_45] : memref<10x64x64xf32, #tpu.memory_space<vmem>>, vector<1x64x64xf32>
    %43 = vector.shape_cast %42 : vector<1x64x64xf32> to vector<64x64xf32>
    %cst_46 = arith.constant dense<0.000000e+00> : vector<8x64xf32>
    %44 = tpu.matmul %7, %43, %cst_46 {dimension_numbers = #tpu.dot_dimension_numbers<[1], [0], [0], [1], [0, 0, 1, 1], [], []>} : vector<8x64xf32>, vector<64x64xf32>, vector<8x64xf32> -> vector<8x64xf32>
    %45 = arith.addf %41, %44 : vector<8x64xf32>
    %c7 = arith.constant 7 : index
    %c0_47 = arith.constant 0 : index
    %c0_48 = arith.constant 0 : index
    %46 = vector.load %arg3[%c7, %c0_47, %c0_48] : memref<10x64x64xf32, #tpu.memory_space<vmem>>, vector<1x64x64xf32>
    %47 = vector.shape_cast %46 : vector<1x64x64xf32> to vector<64x64xf32>
    %cst_49 = arith.constant dense<0.000000e+00> : vector<8x64xf32>
    %48 = tpu.matmul %10, %47, %cst_49 {dimension_numbers = #tpu.dot_dimension_numbers<[1], [0], [0], [1], [0, 0, 1, 1], [], []>} : vector<8x64xf32>, vector<64x64xf32>, vector<8x64xf32> -> vector<8x64xf32>
    %49 = arith.addf %45, %48 : vector<8x64xf32>
    %c8 = arith.constant 8 : index
    %c0_50 = arith.constant 0 : index
    %c0_51 = arith.constant 0 : index
    %50 = vector.load %arg3[%c8, %c0_50, %c0_51] : memref<10x64x64xf32, #tpu.memory_space<vmem>>, vector<1x64x64xf32>
    %51 = vector.shape_cast %50 : vector<1x64x64xf32> to vector<64x64xf32>
    %cst_52 = arith.constant dense<0.000000e+00> : vector<8x64xf32>
    %52 = tpu.matmul %13, %51, %cst_52 {dimension_numbers = #tpu.dot_dimension_numbers<[1], [0], [0], [1], [0, 0, 1, 1], [], []>} : vector<8x64xf32>, vector<64x64xf32>, vector<8x64xf32> -> vector<8x64xf32>
    %53 = arith.addf %49, %52 : vector<8x64xf32>
    %c9 = arith.constant 9 : index
    %c0_53 = arith.constant 0 : index
    %c0_54 = arith.constant 0 : index
    %54 = vector.load %arg3[%c9, %c0_53, %c0_54] : memref<10x64x64xf32, #tpu.memory_space<vmem>>, vector<1x64x64xf32>
    %55 = vector.shape_cast %54 : vector<1x64x64xf32> to vector<64x64xf32>
    %cst_55 = arith.constant dense<0.000000e+00> : vector<8x64xf32>
    %56 = tpu.matmul %16, %55, %cst_55 {dimension_numbers = #tpu.dot_dimension_numbers<[1], [0], [0], [1], [0, 0, 1, 1], [], []>} : vector<8x64xf32>, vector<64x64xf32>, vector<8x64xf32> -> vector<8x64xf32>
    %57 = arith.addf %53, %56 : vector<8x64xf32>
    %58 = arith.maximumf %38, %57 : vector<8x64xf32>
    %c0_56 = arith.constant 0 : index
    %c0_57 = arith.constant 0 : index
    %c0_58 = arith.constant 0 : index
    %59 = vector.load %arg3[%c0_56, %c0_57, %c0_58] : memref<10x64x64xf32, #tpu.memory_space<vmem>>, vector<1x64x64xf32>
    %60 = vector.shape_cast %59 : vector<1x64x64xf32> to vector<64x64xf32>
    %cst_59 = arith.constant dense<0.000000e+00> : vector<8x64xf32>
    %61 = tpu.matmul %7, %60, %cst_59 {dimension_numbers = #tpu.dot_dimension_numbers<[1], [0], [0], [1], [0, 0, 1, 1], [], []>} : vector<8x64xf32>, vector<64x64xf32>, vector<8x64xf32> -> vector<8x64xf32>
    %c1_60 = arith.constant 1 : index
    %c0_61 = arith.constant 0 : index
    %c0_62 = arith.constant 0 : index
    %62 = vector.load %arg3[%c1_60, %c0_61, %c0_62] : memref<10x64x64xf32, #tpu.memory_space<vmem>>, vector<1x64x64xf32>
    %63 = vector.shape_cast %62 : vector<1x64x64xf32> to vector<64x64xf32>
    %cst_63 = arith.constant dense<0.000000e+00> : vector<8x64xf32>
    %64 = tpu.matmul %10, %63, %cst_63 {dimension_numbers = #tpu.dot_dimension_numbers<[1], [0], [0], [1], [0, 0, 1, 1], [], []>} : vector<8x64xf32>, vector<64x64xf32>, vector<8x64xf32> -> vector<8x64xf32>
    %65 = arith.addf %61, %64 : vector<8x64xf32>
    %c2_64 = arith.constant 2 : index
    %c0_65 = arith.constant 0 : index
    %c0_66 = arith.constant 0 : index
    %66 = vector.load %arg3[%c2_64, %c0_65, %c0_66] : memref<10x64x64xf32, #tpu.memory_space<vmem>>, vector<1x64x64xf32>
    %67 = vector.shape_cast %66 : vector<1x64x64xf32> to vector<64x64xf32>
    %cst_67 = arith.constant dense<0.000000e+00> : vector<8x64xf32>
    %68 = tpu.matmul %13, %67, %cst_67 {dimension_numbers = #tpu.dot_dimension_numbers<[1], [0], [0], [1], [0, 0, 1, 1], [], []>} : vector<8x64xf32>, vector<64x64xf32>, vector<8x64xf32> -> vector<8x64xf32>
    %69 = arith.addf %65, %68 : vector<8x64xf32>
    %c3_68 = arith.constant 3 : index
    %c0_69 = arith.constant 0 : index
    %c0_70 = arith.constant 0 : index
    %70 = vector.load %arg3[%c3_68, %c0_69, %c0_70] : memref<10x64x64xf32, #tpu.memory_space<vmem>>, vector<1x64x64xf32>
    %71 = vector.shape_cast %70 : vector<1x64x64xf32> to vector<64x64xf32>
    %cst_71 = arith.constant dense<0.000000e+00> : vector<8x64xf32>
    %72 = tpu.matmul %16, %71, %cst_71 {dimension_numbers = #tpu.dot_dimension_numbers<[1], [0], [0], [1], [0, 0, 1, 1], [], []>} : vector<8x64xf32>, vector<64x64xf32>, vector<8x64xf32> -> vector<8x64xf32>
    %73 = arith.addf %69, %72 : vector<8x64xf32>
    %c4_72 = arith.constant 4 : index
    %c0_73 = arith.constant 0 : index
    %c0_74 = arith.constant 0 : index
    %74 = vector.load %arg3[%c4_72, %c0_73, %c0_74] : memref<10x64x64xf32, #tpu.memory_space<vmem>>, vector<1x64x64xf32>
    %75 = vector.shape_cast %74 : vector<1x64x64xf32> to vector<64x64xf32>
    %cst_75 = arith.constant dense<0.000000e+00> : vector<8x64xf32>
    %76 = tpu.matmul %19, %75, %cst_75 {dimension_numbers = #tpu.dot_dimension_numbers<[1], [0], [0], [1], [0, 0, 1, 1], [], []>} : vector<8x64xf32>, vector<64x64xf32>, vector<8x64xf32> -> vector<8x64xf32>
    %77 = arith.addf %73, %76 : vector<8x64xf32>
    %78 = arith.maximumf %58, %77 : vector<8x64xf32>
    %c5_76 = arith.constant 5 : index
    %c0_77 = arith.constant 0 : index
    %c0_78 = arith.constant 0 : index
    %79 = vector.load %arg3[%c5_76, %c0_77, %c0_78] : memref<10x64x64xf32, #tpu.memory_space<vmem>>, vector<1x64x64xf32>
    %80 = vector.shape_cast %79 : vector<1x64x64xf32> to vector<64x64xf32>
    %cst_79 = arith.constant dense<0.000000e+00> : vector<8x64xf32>
    %81 = tpu.matmul %7, %80, %cst_79 {dimension_numbers = #tpu.dot_dimension_numbers<[1], [0], [0], [1], [0, 0, 1, 1], [], []>} : vector<8x64xf32>, vector<64x64xf32>, vector<8x64xf32> -> vector<8x64xf32>
    %c6_80 = arith.constant 6 : index
    %c0_81 = arith.constant 0 : index
    %c0_82 = arith.constant 0 : index
    %82 = vector.load %arg3[%c6_80, %c0_81, %c0_82] : memref<10x64x64xf32, #tpu.memory_space<vmem>>, vector<1x64x64xf32>
    %83 = vector.shape_cast %82 : vector<1x64x64xf32> to vector<64x64xf32>
    %cst_83 = arith.constant dense<0.000000e+00> : vector<8x64xf32>
    %84 = tpu.matmul %10, %83, %cst_83 {dimension_numbers = #tpu.dot_dimension_numbers<[1], [0], [0], [1], [0, 0, 1, 1], [], []>} : vector<8x64xf32>, vector<64x64xf32>, vector<8x64xf32> -> vector<8x64xf32>
    %85 = arith.addf %81, %84 : vector<8x64xf32>
    %c7_84 = arith.constant 7 : index
    %c0_85 = arith.constant 0 : index
    %c0_86 = arith.constant 0 : index
    %86 = vector.load %arg3[%c7_84, %c0_85, %c0_86] : memref<10x64x64xf32, #tpu.memory_space<vmem>>, vector<1x64x64xf32>
    %87 = vector.shape_cast %86 : vector<1x64x64xf32> to vector<64x64xf32>
    %cst_87 = arith.constant dense<0.000000e+00> : vector<8x64xf32>
    %88 = tpu.matmul %13, %87, %cst_87 {dimension_numbers = #tpu.dot_dimension_numbers<[1], [0], [0], [1], [0, 0, 1, 1], [], []>} : vector<8x64xf32>, vector<64x64xf32>, vector<8x64xf32> -> vector<8x64xf32>
    %89 = arith.addf %85, %88 : vector<8x64xf32>
    %c8_88 = arith.constant 8 : index
    %c0_89 = arith.constant 0 : index
    %c0_90 = arith.constant 0 : index
    %90 = vector.load %arg3[%c8_88, %c0_89, %c0_90] : memref<10x64x64xf32, #tpu.memory_space<vmem>>, vector<1x64x64xf32>
    %91 = vector.shape_cast %90 : vector<1x64x64xf32> to vector<64x64xf32>
    %cst_91 = arith.constant dense<0.000000e+00> : vector<8x64xf32>
    %92 = tpu.matmul %16, %91, %cst_91 {dimension_numbers = #tpu.dot_dimension_numbers<[1], [0], [0], [1], [0, 0, 1, 1], [], []>} : vector<8x64xf32>, vector<64x64xf32>, vector<8x64xf32> -> vector<8x64xf32>
    %93 = arith.addf %89, %92 : vector<8x64xf32>
    %c9_92 = arith.constant 9 : index
    %c0_93 = arith.constant 0 : index
    %c0_94 = arith.constant 0 : index
    %94 = vector.load %arg3[%c9_92, %c0_93, %c0_94] : memref<10x64x64xf32, #tpu.memory_space<vmem>>, vector<1x64x64xf32>
    %95 = vector.shape_cast %94 : vector<1x64x64xf32> to vector<64x64xf32>
    %cst_95 = arith.constant dense<0.000000e+00> : vector<8x64xf32>
    %96 = tpu.matmul %19, %95, %cst_95 {dimension_numbers = #tpu.dot_dimension_numbers<[1], [0], [0], [1], [0, 0, 1, 1], [], []>} : vector<8x64xf32>, vector<64x64xf32>, vector<8x64xf32> -> vector<8x64xf32>
    %97 = arith.addf %93, %96 : vector<8x64xf32>
    %98 = arith.maximumf %78, %97 : vector<8x64xf32>
    %c0_96 = arith.constant 0 : index
    %c0_97 = arith.constant 0 : index
    %99 = vector.load %arg4[%c0_96, %c0_97] : memref<1x64xf32, #tpu.memory_space<vmem>>, vector<1x64xf32>
    %100 = vector.broadcast %99 : vector<1x64xf32> to vector<8x64xf32>
    %101 = arith.addf %98, %100 : vector<8x64xf32>
    %cst_98 = arith.constant 0.000000e+00 : f32
    %102 = vector.broadcast %cst_98 : f32 to vector<8x64xf32>
    %103 = arith.maximumf %101, %102 : vector<8x64xf32>
    %c0_99 = arith.constant 0 : index
    %c0_100 = arith.constant 0 : index
    %c0_101 = arith.constant 0 : index
    %104 = vector.load %arg5[%c0_99, %c0_100, %c0_101] : memref<4x4x8xf32, #tpu.memory_space<vmem>>, vector<1x4x8xf32>
    %105 = vector.shape_cast %104 : vector<1x4x8xf32> to vector<4x8xf32>
    %cst_102 = arith.constant dense<0.000000e+00> : vector<4x64xf32>
    %106 = tpu.matmul %105, %103, %cst_102 {dimension_numbers = #tpu.dot_dimension_numbers<[1], [0], [0], [1], [0, 0, 1, 1], [], []>} : vector<4x8xf32>, vector<8x64xf32>, vector<4x64xf32> -> vector<4x64xf32>
    %c1_103 = arith.constant 1 : index
    %c0_104 = arith.constant 0 : index
    %c0_105 = arith.constant 0 : index
    %107 = vector.load %arg5[%c1_103, %c0_104, %c0_105] : memref<4x4x8xf32, #tpu.memory_space<vmem>>, vector<1x4x8xf32>
    %108 = vector.shape_cast %107 : vector<1x4x8xf32> to vector<4x8xf32>
    %cst_106 = arith.constant dense<0.000000e+00> : vector<4x64xf32>
    %109 = tpu.matmul %108, %103, %cst_106 {dimension_numbers = #tpu.dot_dimension_numbers<[1], [0], [0], [1], [0, 0, 1, 1], [], []>} : vector<4x8xf32>, vector<8x64xf32>, vector<4x64xf32> -> vector<4x64xf32>
    %c2_107 = arith.constant 2 : index
    %c0_108 = arith.constant 0 : index
    %c0_109 = arith.constant 0 : index
    %110 = vector.load %arg5[%c2_107, %c0_108, %c0_109] : memref<4x4x8xf32, #tpu.memory_space<vmem>>, vector<1x4x8xf32>
    %111 = vector.shape_cast %110 : vector<1x4x8xf32> to vector<4x8xf32>
    %cst_110 = arith.constant dense<0.000000e+00> : vector<4x64xf32>
    %112 = tpu.matmul %111, %103, %cst_110 {dimension_numbers = #tpu.dot_dimension_numbers<[1], [0], [0], [1], [0, 0, 1, 1], [], []>} : vector<4x8xf32>, vector<8x64xf32>, vector<4x64xf32> -> vector<4x64xf32>
    %c3_111 = arith.constant 3 : index
    %c0_112 = arith.constant 0 : index
    %c0_113 = arith.constant 0 : index
    %113 = vector.load %arg5[%c3_111, %c0_112, %c0_113] : memref<4x4x8xf32, #tpu.memory_space<vmem>>, vector<1x4x8xf32>
    %114 = vector.shape_cast %113 : vector<1x4x8xf32> to vector<4x8xf32>
    %cst_114 = arith.constant dense<0.000000e+00> : vector<4x64xf32>
    %115 = tpu.matmul %114, %103, %cst_114 {dimension_numbers = #tpu.dot_dimension_numbers<[1], [0], [0], [1], [0, 0, 1, 1], [], []>} : vector<4x8xf32>, vector<8x64xf32>, vector<4x64xf32> -> vector<4x64xf32>
    %c0_115 = arith.constant 0 : index
    %c0_116 = arith.constant 0 : index
    %c0_117 = arith.constant 0 : index
    %116 = vector.load %arg6[%c0_115, %c0_116, %c0_117] : memref<6x64x32xf32, #tpu.memory_space<vmem>>, vector<1x64x32xf32>
    %117 = vector.shape_cast %116 : vector<1x64x32xf32> to vector<64x32xf32>
    %cst_118 = arith.constant dense<0.000000e+00> : vector<4x32xf32>
    %118 = tpu.matmul %106, %117, %cst_118 {dimension_numbers = #tpu.dot_dimension_numbers<[1], [0], [0], [1], [0, 0, 1, 1], [], []>} : vector<4x64xf32>, vector<64x32xf32>, vector<4x32xf32> -> vector<4x32xf32>
    %c1_119 = arith.constant 1 : index
    %c0_120 = arith.constant 0 : index
    %c0_121 = arith.constant 0 : index
    %119 = vector.load %arg6[%c1_119, %c0_120, %c0_121] : memref<6x64x32xf32, #tpu.memory_space<vmem>>, vector<1x64x32xf32>
    %120 = vector.shape_cast %119 : vector<1x64x32xf32> to vector<64x32xf32>
    %cst_122 = arith.constant dense<0.000000e+00> : vector<4x32xf32>
    %121 = tpu.matmul %109, %120, %cst_122 {dimension_numbers = #tpu.dot_dimension_numbers<[1], [0], [0], [1], [0, 0, 1, 1], [], []>} : vector<4x64xf32>, vector<64x32xf32>, vector<4x32xf32> -> vector<4x32xf32>
    %122 = arith.addf %118, %121 : vector<4x32xf32>
    %c2_123 = arith.constant 2 : index
    %c0_124 = arith.constant 0 : index
    %c0_125 = arith.constant 0 : index
    %123 = vector.load %arg6[%c2_123, %c0_124, %c0_125] : memref<6x64x32xf32, #tpu.memory_space<vmem>>, vector<1x64x32xf32>
    %124 = vector.shape_cast %123 : vector<1x64x32xf32> to vector<64x32xf32>
    %cst_126 = arith.constant dense<0.000000e+00> : vector<4x32xf32>
    %125 = tpu.matmul %112, %124, %cst_126 {dimension_numbers = #tpu.dot_dimension_numbers<[1], [0], [0], [1], [0, 0, 1, 1], [], []>} : vector<4x64xf32>, vector<64x32xf32>, vector<4x32xf32> -> vector<4x32xf32>
    %126 = arith.addf %122, %125 : vector<4x32xf32>
    %c3_127 = arith.constant 3 : index
    %c0_128 = arith.constant 0 : index
    %c0_129 = arith.constant 0 : index
    %127 = vector.load %arg6[%c3_127, %c0_128, %c0_129] : memref<6x64x32xf32, #tpu.memory_space<vmem>>, vector<1x64x32xf32>
    %128 = vector.shape_cast %127 : vector<1x64x32xf32> to vector<64x32xf32>
    %cst_130 = arith.constant dense<0.000000e+00> : vector<4x32xf32>
    %129 = tpu.matmul %106, %128, %cst_130 {dimension_numbers = #tpu.dot_dimension_numbers<[1], [0], [0], [1], [0, 0, 1, 1], [], []>} : vector<4x64xf32>, vector<64x32xf32>, vector<4x32xf32> -> vector<4x32xf32>
    %c4_131 = arith.constant 4 : index
    %c0_132 = arith.constant 0 : index
    %c0_133 = arith.constant 0 : index
    %130 = vector.load %arg6[%c4_131, %c0_132, %c0_133] : memref<6x64x32xf32, #tpu.memory_space<vmem>>, vector<1x64x32xf32>
    %131 = vector.shape_cast %130 : vector<1x64x32xf32> to vector<64x32xf32>
    %cst_134 = arith.constant dense<0.000000e+00> : vector<4x32xf32>
    %132 = tpu.matmul %109, %131, %cst_134 {dimension_numbers = #tpu.dot_dimension_numbers<[1], [0], [0], [1], [0, 0, 1, 1], [], []>} : vector<4x64xf32>, vector<64x32xf32>, vector<4x32xf32> -> vector<4x32xf32>
    %133 = arith.addf %129, %132 : vector<4x32xf32>
    %c5_135 = arith.constant 5 : index
    %c0_136 = arith.constant 0 : index
    %c0_137 = arith.constant 0 : index
    %134 = vector.load %arg6[%c5_135, %c0_136, %c0_137] : memref<6x64x32xf32, #tpu.memory_space<vmem>>, vector<1x64x32xf32>
    %135 = vector.shape_cast %134 : vector<1x64x32xf32> to vector<64x32xf32>
    %cst_138 = arith.constant dense<0.000000e+00> : vector<4x32xf32>
    %136 = tpu.matmul %112, %135, %cst_138 {dimension_numbers = #tpu.dot_dimension_numbers<[1], [0], [0], [1], [0, 0, 1, 1], [], []>} : vector<4x64xf32>, vector<64x32xf32>, vector<4x32xf32> -> vector<4x32xf32>
    %137 = arith.addf %133, %136 : vector<4x32xf32>
    %138 = arith.maximumf %126, %137 : vector<4x32xf32>
    %c0_139 = arith.constant 0 : index
    %c0_140 = arith.constant 0 : index
    %c0_141 = arith.constant 0 : index
    %139 = vector.load %arg6[%c0_139, %c0_140, %c0_141] : memref<6x64x32xf32, #tpu.memory_space<vmem>>, vector<1x64x32xf32>
    %140 = vector.shape_cast %139 : vector<1x64x32xf32> to vector<64x32xf32>
    %cst_142 = arith.constant dense<0.000000e+00> : vector<4x32xf32>
    %141 = tpu.matmul %109, %140, %cst_142 {dimension_numbers = #tpu.dot_dimension_numbers<[1], [0], [0], [1], [0, 0, 1, 1], [], []>} : vector<4x64xf32>, vector<64x32xf32>, vector<4x32xf32> -> vector<4x32xf32>
    %c1_143 = arith.constant 1 : index
    %c0_144 = arith.constant 0 : index
    %c0_145 = arith.constant 0 : index
    %142 = vector.load %arg6[%c1_143, %c0_144, %c0_145] : memref<6x64x32xf32, #tpu.memory_space<vmem>>, vector<1x64x32xf32>
    %143 = vector.shape_cast %142 : vector<1x64x32xf32> to vector<64x32xf32>
    %cst_146 = arith.constant dense<0.000000e+00> : vector<4x32xf32>
    %144 = tpu.matmul %112, %143, %cst_146 {dimension_numbers = #tpu.dot_dimension_numbers<[1], [0], [0], [1], [0, 0, 1, 1], [], []>} : vector<4x64xf32>, vector<64x32xf32>, vector<4x32xf32> -> vector<4x32xf32>
    %145 = arith.addf %141, %144 : vector<4x32xf32>
    %c2_147 = arith.constant 2 : index
    %c0_148 = arith.constant 0 : index
    %c0_149 = arith.constant 0 : index
    %146 = vector.load %arg6[%c2_147, %c0_148, %c0_149] : memref<6x64x32xf32, #tpu.memory_space<vmem>>, vector<1x64x32xf32>
    %147 = vector.shape_cast %146 : vector<1x64x32xf32> to vector<64x32xf32>
    %cst_150 = arith.constant dense<0.000000e+00> : vector<4x32xf32>
    %148 = tpu.matmul %115, %147, %cst_150 {dimension_numbers = #tpu.dot_dimension_numbers<[1], [0], [0], [1], [0, 0, 1, 1], [], []>} : vector<4x64xf32>, vector<64x32xf32>, vector<4x32xf32> -> vector<4x32xf32>
    %149 = arith.addf %145, %148 : vector<4x32xf32>
    %150 = arith.maximumf %138, %149 : vector<4x32xf32>
    %c3_151 = arith.constant 3 : index
    %c0_152 = arith.constant 0 : index
    %c0_153 = arith.constant 0 : index
    %151 = vector.load %arg6[%c3_151, %c0_152, %c0_153] : memref<6x64x32xf32, #tpu.memory_space<vmem>>, vector<1x64x32xf32>
    %152 = vector.shape_cast %151 : vector<1x64x32xf32> to vector<64x32xf32>
    %cst_154 = arith.constant dense<0.000000e+00> : vector<4x32xf32>
    %153 = tpu.matmul %109, %152, %cst_154 {dimension_numbers = #tpu.dot_dimension_numbers<[1], [0], [0], [1], [0, 0, 1, 1], [], []>} : vector<4x64xf32>, vector<64x32xf32>, vector<4x32xf32> -> vector<4x32xf32>
    %c4_155 = arith.constant 4 : index
    %c0_156 = arith.constant 0 : index
    %c0_157 = arith.constant 0 : index
    %154 = vector.load %arg6[%c4_155, %c0_156, %c0_157] : memref<6x64x32xf32, #tpu.memory_space<vmem>>, vector<1x64x32xf32>
    %155 = vector.shape_cast %154 : vector<1x64x32xf32> to vector<64x32xf32>
    %cst_158 = arith.constant dense<0.000000e+00> : vector<4x32xf32>
    %156 = tpu.matmul %112, %155, %cst_158 {dimension_numbers = #tpu.dot_dimension_numbers<[1], [0], [0], [1], [0, 0, 1, 1], [], []>} : vector<4x64xf32>, vector<64x32xf32>, vector<4x32xf32> -> vector<4x32xf32>
    %157 = arith.addf %153, %156 : vector<4x32xf32>
    %c5_159 = arith.constant 5 : index
    %c0_160 = arith.constant 0 : index
    %c0_161 = arith.constant 0 : index
    %158 = vector.load %arg6[%c5_159, %c0_160, %c0_161] : memref<6x64x32xf32, #tpu.memory_space<vmem>>, vector<1x64x32xf32>
    %159 = vector.shape_cast %158 : vector<1x64x32xf32> to vector<64x32xf32>
    %cst_162 = arith.constant dense<0.000000e+00> : vector<4x32xf32>
    %160 = tpu.matmul %115, %159, %cst_162 {dimension_numbers = #tpu.dot_dimension_numbers<[1], [0], [0], [1], [0, 0, 1, 1], [], []>} : vector<4x64xf32>, vector<64x32xf32>, vector<4x32xf32> -> vector<4x32xf32>
    %161 = arith.addf %157, %160 : vector<4x32xf32>
    %162 = arith.maximumf %150, %161 : vector<4x32xf32>
    %c0_163 = arith.constant 0 : index
    %c0_164 = arith.constant 0 : index
    %163 = vector.load %arg7[%c0_163, %c0_164] : memref<1x32xf32, #tpu.memory_space<vmem>>, vector<1x32xf32>
    %164 = vector.broadcast %163 : vector<1x32xf32> to vector<4x32xf32>
    %165 = arith.addf %162, %164 : vector<4x32xf32>
    %cst_165 = arith.constant 0.000000e+00 : f32
    %166 = vector.broadcast %cst_165 : f32 to vector<4x32xf32>
    %167 = arith.maximumf %165, %166 : vector<4x32xf32>
    %c0_166 = arith.constant 0 : index
    %c0_167 = arith.constant 0 : index
    %c0_168 = arith.constant 0 : index
    %168 = vector.load %arg8[%c0_166, %c0_167, %c0_168] : memref<4x2x4xf32, #tpu.memory_space<vmem>>, vector<1x2x4xf32>
    %169 = vector.shape_cast %168 : vector<1x2x4xf32> to vector<2x4xf32>
    %cst_169 = arith.constant dense<0.000000e+00> : vector<2x32xf32>
    %170 = tpu.matmul %169, %167, %cst_169 {dimension_numbers = #tpu.dot_dimension_numbers<[1], [0], [0], [1], [0, 0, 1, 1], [], []>} : vector<2x4xf32>, vector<4x32xf32>, vector<2x32xf32> -> vector<2x32xf32>
    %c1_170 = arith.constant 1 : index
    %c0_171 = arith.constant 0 : index
    %c0_172 = arith.constant 0 : index
    %171 = vector.load %arg8[%c1_170, %c0_171, %c0_172] : memref<4x2x4xf32, #tpu.memory_space<vmem>>, vector<1x2x4xf32>
    %172 = vector.shape_cast %171 : vector<1x2x4xf32> to vector<2x4xf32>
    %cst_173 = arith.constant dense<0.000000e+00> : vector<2x32xf32>
    %173 = tpu.matmul %172, %167, %cst_173 {dimension_numbers = #tpu.dot_dimension_numbers<[1], [0], [0], [1], [0, 0, 1, 1], [], []>} : vector<2x4xf32>, vector<4x32xf32>, vector<2x32xf32> -> vector<2x32xf32>
    %c2_174 = arith.constant 2 : index
    %c0_175 = arith.constant 0 : index
    %c0_176 = arith.constant 0 : index
    %174 = vector.load %arg8[%c2_174, %c0_175, %c0_176] : memref<4x2x4xf32, #tpu.memory_space<vmem>>, vector<1x2x4xf32>
    %175 = vector.shape_cast %174 : vector<1x2x4xf32> to vector<2x4xf32>
    %cst_177 = arith.constant dense<0.000000e+00> : vector<2x32xf32>
    %176 = tpu.matmul %175, %167, %cst_177 {dimension_numbers = #tpu.dot_dimension_numbers<[1], [0], [0], [1], [0, 0, 1, 1], [], []>} : vector<2x4xf32>, vector<4x32xf32>, vector<2x32xf32> -> vector<2x32xf32>
    %c3_178 = arith.constant 3 : index
    %c0_179 = arith.constant 0 : index
    %c0_180 = arith.constant 0 : index
    %177 = vector.load %arg8[%c3_178, %c0_179, %c0_180] : memref<4x2x4xf32, #tpu.memory_space<vmem>>, vector<1x2x4xf32>
    %178 = vector.shape_cast %177 : vector<1x2x4xf32> to vector<2x4xf32>
    %cst_181 = arith.constant dense<0.000000e+00> : vector<2x32xf32>
    %179 = tpu.matmul %178, %167, %cst_181 {dimension_numbers = #tpu.dot_dimension_numbers<[1], [0], [0], [1], [0, 0, 1, 1], [], []>} : vector<2x4xf32>, vector<4x32xf32>, vector<2x32xf32> -> vector<2x32xf32>
    %c0_182 = arith.constant 0 : index
    %c0_183 = arith.constant 0 : index
    %c0_184 = arith.constant 0 : index
    %180 = vector.load %arg9[%c0_182, %c0_183, %c0_184] : memref<6x32x2xf32, #tpu.memory_space<vmem>>, vector<1x32x2xf32>
    %181 = vector.shape_cast %180 : vector<1x32x2xf32> to vector<32x2xf32>
    %cst_185 = arith.constant dense<0.000000e+00> : vector<2x2xf32>
    %182 = tpu.matmul %170, %181, %cst_185 {dimension_numbers = #tpu.dot_dimension_numbers<[1], [0], [0], [1], [0, 0, 1, 1], [], []>} : vector<2x32xf32>, vector<32x2xf32>, vector<2x2xf32> -> vector<2x2xf32>
    %c1_186 = arith.constant 1 : index
    %c0_187 = arith.constant 0 : index
    %c0_188 = arith.constant 0 : index
    %183 = vector.load %arg9[%c1_186, %c0_187, %c0_188] : memref<6x32x2xf32, #tpu.memory_space<vmem>>, vector<1x32x2xf32>
    %184 = vector.shape_cast %183 : vector<1x32x2xf32> to vector<32x2xf32>
    %cst_189 = arith.constant dense<0.000000e+00> : vector<2x2xf32>
    %185 = tpu.matmul %173, %184, %cst_189 {dimension_numbers = #tpu.dot_dimension_numbers<[1], [0], [0], [1], [0, 0, 1, 1], [], []>} : vector<2x32xf32>, vector<32x2xf32>, vector<2x2xf32> -> vector<2x2xf32>
    %186 = arith.addf %182, %185 : vector<2x2xf32>
    %c2_190 = arith.constant 2 : index
    %c0_191 = arith.constant 0 : index
    %c0_192 = arith.constant 0 : index
    %187 = vector.load %arg9[%c2_190, %c0_191, %c0_192] : memref<6x32x2xf32, #tpu.memory_space<vmem>>, vector<1x32x2xf32>
    %188 = vector.shape_cast %187 : vector<1x32x2xf32> to vector<32x2xf32>
    %cst_193 = arith.constant dense<0.000000e+00> : vector<2x2xf32>
    %189 = tpu.matmul %176, %188, %cst_193 {dimension_numbers = #tpu.dot_dimension_numbers<[1], [0], [0], [1], [0, 0, 1, 1], [], []>} : vector<2x32xf32>, vector<32x2xf32>, vector<2x2xf32> -> vector<2x2xf32>
    %190 = arith.addf %186, %189 : vector<2x2xf32>
    %c3_194 = arith.constant 3 : index
    %c0_195 = arith.constant 0 : index
    %c0_196 = arith.constant 0 : index
    %191 = vector.load %arg9[%c3_194, %c0_195, %c0_196] : memref<6x32x2xf32, #tpu.memory_space<vmem>>, vector<1x32x2xf32>
    %192 = vector.shape_cast %191 : vector<1x32x2xf32> to vector<32x2xf32>
    %cst_197 = arith.constant dense<0.000000e+00> : vector<2x2xf32>
    %193 = tpu.matmul %170, %192, %cst_197 {dimension_numbers = #tpu.dot_dimension_numbers<[1], [0], [0], [1], [0, 0, 1, 1], [], []>} : vector<2x32xf32>, vector<32x2xf32>, vector<2x2xf32> -> vector<2x2xf32>
    %c4_198 = arith.constant 4 : index
    %c0_199 = arith.constant 0 : index
    %c0_200 = arith.constant 0 : index
    %194 = vector.load %arg9[%c4_198, %c0_199, %c0_200] : memref<6x32x2xf32, #tpu.memory_space<vmem>>, vector<1x32x2xf32>
    %195 = vector.shape_cast %194 : vector<1x32x2xf32> to vector<32x2xf32>
    %cst_201 = arith.constant dense<0.000000e+00> : vector<2x2xf32>
    %196 = tpu.matmul %173, %195, %cst_201 {dimension_numbers = #tpu.dot_dimension_numbers<[1], [0], [0], [1], [0, 0, 1, 1], [], []>} : vector<2x32xf32>, vector<32x2xf32>, vector<2x2xf32> -> vector<2x2xf32>
    %197 = arith.addf %193, %196 : vector<2x2xf32>
    %c5_202 = arith.constant 5 : index
    %c0_203 = arith.constant 0 : index
    %c0_204 = arith.constant 0 : index
    %198 = vector.load %arg9[%c5_202, %c0_203, %c0_204] : memref<6x32x2xf32, #tpu.memory_space<vmem>>, vector<1x32x2xf32>
    %199 = vector.shape_cast %198 : vector<1x32x2xf32> to vector<32x2xf32>
    %cst_205 = arith.constant dense<0.000000e+00> : vector<2x2xf32>
    %200 = tpu.matmul %176, %199, %cst_205 {dimension_numbers = #tpu.dot_dimension_numbers<[1], [0], [0], [1], [0, 0, 1, 1], [], []>} : vector<2x32xf32>, vector<32x2xf32>, vector<2x2xf32> -> vector<2x2xf32>
    %201 = arith.addf %197, %200 : vector<2x2xf32>
    %202 = arith.maximumf %190, %201 : vector<2x2xf32>
    %c0_206 = arith.constant 0 : index
    %c0_207 = arith.constant 0 : index
    %c0_208 = arith.constant 0 : index
    %203 = vector.load %arg9[%c0_206, %c0_207, %c0_208] : memref<6x32x2xf32, #tpu.memory_space<vmem>>, vector<1x32x2xf32>
    %204 = vector.shape_cast %203 : vector<1x32x2xf32> to vector<32x2xf32>
    %cst_209 = arith.constant dense<0.000000e+00> : vector<2x2xf32>
    %205 = tpu.matmul %173, %204, %cst_209 {dimension_numbers = #tpu.dot_dimension_numbers<[1], [0], [0], [1], [0, 0, 1, 1], [], []>} : vector<2x32xf32>, vector<32x2xf32>, vector<2x2xf32> -> vector<2x2xf32>
    %c1_210 = arith.constant 1 : index
    %c0_211 = arith.constant 0 : index
    %c0_212 = arith.constant 0 : index
    %206 = vector.load %arg9[%c1_210, %c0_211, %c0_212] : memref<6x32x2xf32, #tpu.memory_space<vmem>>, vector<1x32x2xf32>
    %207 = vector.shape_cast %206 : vector<1x32x2xf32> to vector<32x2xf32>
    %cst_213 = arith.constant dense<0.000000e+00> : vector<2x2xf32>
    %208 = tpu.matmul %176, %207, %cst_213 {dimension_numbers = #tpu.dot_dimension_numbers<[1], [0], [0], [1], [0, 0, 1, 1], [], []>} : vector<2x32xf32>, vector<32x2xf32>, vector<2x2xf32> -> vector<2x2xf32>
    %209 = arith.addf %205, %208 : vector<2x2xf32>
    %c2_214 = arith.constant 2 : index
    %c0_215 = arith.constant 0 : index
    %c0_216 = arith.constant 0 : index
    %210 = vector.load %arg9[%c2_214, %c0_215, %c0_216] : memref<6x32x2xf32, #tpu.memory_space<vmem>>, vector<1x32x2xf32>
    %211 = vector.shape_cast %210 : vector<1x32x2xf32> to vector<32x2xf32>
    %cst_217 = arith.constant dense<0.000000e+00> : vector<2x2xf32>
    %212 = tpu.matmul %179, %211, %cst_217 {dimension_numbers = #tpu.dot_dimension_numbers<[1], [0], [0], [1], [0, 0, 1, 1], [], []>} : vector<2x32xf32>, vector<32x2xf32>, vector<2x2xf32> -> vector<2x2xf32>
    %213 = arith.addf %209, %212 : vector<2x2xf32>
    %214 = arith.maximumf %202, %213 : vector<2x2xf32>
    %c3_218 = arith.constant 3 : index
    %c0_219 = arith.constant 0 : index
    %c0_220 = arith.constant 0 : index
    %215 = vector.load %arg9[%c3_218, %c0_219, %c0_220] : memref<6x32x2xf32, #tpu.memory_space<vmem>>, vector<1x32x2xf32>
    %216 = vector.shape_cast %215 : vector<1x32x2xf32> to vector<32x2xf32>
    %cst_221 = arith.constant dense<0.000000e+00> : vector<2x2xf32>
    %217 = tpu.matmul %173, %216, %cst_221 {dimension_numbers = #tpu.dot_dimension_numbers<[1], [0], [0], [1], [0, 0, 1, 1], [], []>} : vector<2x32xf32>, vector<32x2xf32>, vector<2x2xf32> -> vector<2x2xf32>
    %c4_222 = arith.constant 4 : index
    %c0_223 = arith.constant 0 : index
    %c0_224 = arith.constant 0 : index
    %218 = vector.load %arg9[%c4_222, %c0_223, %c0_224] : memref<6x32x2xf32, #tpu.memory_space<vmem>>, vector<1x32x2xf32>
    %219 = vector.shape_cast %218 : vector<1x32x2xf32> to vector<32x2xf32>
    %cst_225 = arith.constant dense<0.000000e+00> : vector<2x2xf32>
    %220 = tpu.matmul %176, %219, %cst_225 {dimension_numbers = #tpu.dot_dimension_numbers<[1], [0], [0], [1], [0, 0, 1, 1], [], []>} : vector<2x32xf32>, vector<32x2xf32>, vector<2x2xf32> -> vector<2x2xf32>
    %221 = arith.addf %217, %220 : vector<2x2xf32>
    %c5_226 = arith.constant 5 : index
    %c0_227 = arith.constant 0 : index
    %c0_228 = arith.constant 0 : index
    %222 = vector.load %arg9[%c5_226, %c0_227, %c0_228] : memref<6x32x2xf32, #tpu.memory_space<vmem>>, vector<1x32x2xf32>
    %223 = vector.shape_cast %222 : vector<1x32x2xf32> to vector<32x2xf32>
    %cst_229 = arith.constant dense<0.000000e+00> : vector<2x2xf32>
    %224 = tpu.matmul %179, %223, %cst_229 {dimension_numbers = #tpu.dot_dimension_numbers<[1], [0], [0], [1], [0, 0, 1, 1], [], []>} : vector<2x32xf32>, vector<32x2xf32>, vector<2x2xf32> -> vector<2x2xf32>
    %225 = arith.addf %221, %224 : vector<2x2xf32>
    %226 = arith.maximumf %214, %225 : vector<2x2xf32>
    %c0_230 = arith.constant 0 : index
    %c0_231 = arith.constant 0 : index
    %227 = vector.load %arg10[%c0_230, %c0_231] : memref<1x2xf32, #tpu.memory_space<vmem>>, vector<1x2xf32>
    %228 = vector.broadcast %227 : vector<1x2xf32> to vector<2x2xf32>
    %229 = arith.addf %226, %228 : vector<2x2xf32>
    %cst_232 = arith.constant 0.000000e+00 : f32
    %230 = vector.broadcast %cst_232 : f32 to vector<2x2xf32>
    %231 = arith.maximumf %229, %230 : vector<2x2xf32>
    %c0_233 = arith.constant 0 : index
    %c0_234 = arith.constant 0 : index
    %232 = vector.load %arg13[%c0_233, %c0_234] : memref<1x384xf32, #tpu.memory_space<vmem>>, vector<1x384xf32>
    %c0_235 = arith.constant 0 : index
    %c0_236 = arith.constant 0 : index
    %c0_237 = arith.constant 0 : index
    %233 = vector.load %arg11[%c0_235, %c0_236, %c0_237] : memref<2x1x2xf32, #tpu.memory_space<vmem>>, vector<1x1x2xf32>
    %234 = vector.shape_cast %233 : vector<1x1x2xf32> to vector<1x2xf32>
    %cst_238 = arith.constant dense<0.000000e+00> : vector<1x2xf32>
    %235 = tpu.matmul %234, %231, %cst_238 {dimension_numbers = #tpu.dot_dimension_numbers<[1], [0], [0], [1], [0, 0, 1, 1], [], []>} : vector<1x2xf32>, vector<2x2xf32>, vector<1x2xf32> -> vector<1x2xf32>
    %c0_239 = arith.constant 0 : index
    %c0_240 = arith.constant 0 : index
    %c0_241 = arith.constant 0 : index
    %236 = vector.load %arg12[%c0_239, %c0_240, %c0_241] : memref<2x2x384xf32, #tpu.memory_space<vmem>>, vector<1x2x384xf32>
    %237 = vector.shape_cast %236 : vector<1x2x384xf32> to vector<2x384xf32>
    %cst_242 = arith.constant dense<0.000000e+00> : vector<1x384xf32>
    %238 = tpu.matmul %235, %237, %cst_242 {dimension_numbers = #tpu.dot_dimension_numbers<[1], [0], [0], [1], [0, 0, 1, 1], [], []>} : vector<1x2xf32>, vector<2x384xf32>, vector<1x384xf32> -> vector<1x384xf32>
    %239 = arith.addf %232, %238 : vector<1x384xf32>
    %c1_243 = arith.constant 1 : index
    %c0_244 = arith.constant 0 : index
    %c0_245 = arith.constant 0 : index
    %240 = vector.load %arg11[%c1_243, %c0_244, %c0_245] : memref<2x1x2xf32, #tpu.memory_space<vmem>>, vector<1x1x2xf32>
    %241 = vector.shape_cast %240 : vector<1x1x2xf32> to vector<1x2xf32>
    %cst_246 = arith.constant dense<0.000000e+00> : vector<1x2xf32>
    %242 = tpu.matmul %241, %231, %cst_246 {dimension_numbers = #tpu.dot_dimension_numbers<[1], [0], [0], [1], [0, 0, 1, 1], [], []>} : vector<1x2xf32>, vector<2x2xf32>, vector<1x2xf32> -> vector<1x2xf32>
    %c1_247 = arith.constant 1 : index
    %c0_248 = arith.constant 0 : index
    %c0_249 = arith.constant 0 : index
    %243 = vector.load %arg12[%c1_247, %c0_248, %c0_249] : memref<2x2x384xf32, #tpu.memory_space<vmem>>, vector<1x2x384xf32>
    %244 = vector.shape_cast %243 : vector<1x2x384xf32> to vector<2x384xf32>
    %cst_250 = arith.constant dense<0.000000e+00> : vector<1x384xf32>
    %245 = tpu.matmul %242, %244, %cst_250 {dimension_numbers = #tpu.dot_dimension_numbers<[1], [0], [0], [1], [0, 0, 1, 1], [], []>} : vector<1x2xf32>, vector<2x384xf32>, vector<1x384xf32> -> vector<1x384xf32>
    %246 = arith.addf %239, %245 : vector<1x384xf32>
    %247 = vector.extract_strided_slice %246 {offsets = [0, 0], sizes = [1, 128], strides = [1, 1]} : vector<1x384xf32> to vector<1x128xf32>
    %248 = arith.negf %247 : vector<1x128xf32>
    %249 = math.exp %248 : vector<1x128xf32>
    %cst_251 = arith.constant 1.000000e+00 : f32
    %250 = vector.broadcast %cst_251 : f32 to vector<1x128xf32>
    %251 = arith.addf %250, %249 : vector<1x128xf32>
    %252 = arith.divf %250, %251 : vector<1x128xf32>
    %253 = vector.extract_strided_slice %246 {offsets = [0, 128], sizes = [1, 128], strides = [1, 1]} : vector<1x384xf32> to vector<1x128xf32>
    %254 = math.tanh %253 : vector<1x128xf32>
    %255 = vector.extract_strided_slice %246 {offsets = [0, 256], sizes = [1, 128], strides = [1, 1]} : vector<1x384xf32> to vector<1x128xf32>
    %256 = arith.negf %255 : vector<1x128xf32>
    %257 = math.exp %256 : vector<1x128xf32>
    %cst_252 = arith.constant 1.000000e+00 : f32
    %258 = vector.broadcast %cst_252 : f32 to vector<1x128xf32>
    %259 = arith.addf %258, %257 : vector<1x128xf32>
    %260 = arith.divf %258, %259 : vector<1x128xf32>
    %261 = arith.mulf %252, %254 : vector<1x128xf32>
    %262 = math.tanh %261 : vector<1x128xf32>
    %263 = arith.mulf %260, %262 : vector<1x128xf32>
    %c0_253 = arith.constant 0 : index
    %c0_254 = arith.constant 0 : index
    %264 = vector.load %arg14[%c0_253, %c0_254] : memref<128x384xf32, #tpu.memory_space<vmem>>, vector<128x384xf32>
    %cst_255 = arith.constant dense<0.000000e+00> : vector<1x384xf32>
    %265 = tpu.matmul %263, %264, %cst_255 {dimension_numbers = #tpu.dot_dimension_numbers<[1], [0], [0], [1], [0, 0, 1, 1], [], []>} : vector<1x128xf32>, vector<128x384xf32>, vector<1x384xf32> -> vector<1x384xf32>
    %c0_256 = arith.constant 0 : index
    %c0_257 = arith.constant 0 : index
    %266 = vector.load %arg15[%c0_256, %c0_257] : memref<1x384xf32, #tpu.memory_space<vmem>>, vector<1x384xf32>
    %267 = arith.addf %265, %266 : vector<1x384xf32>
    %268 = vector.extract_strided_slice %267 {offsets = [0, 0], sizes = [1, 128], strides = [1, 1]} : vector<1x384xf32> to vector<1x128xf32>
    %269 = arith.negf %268 : vector<1x128xf32>
    %270 = math.exp %269 : vector<1x128xf32>
    %cst_258 = arith.constant 1.000000e+00 : f32
    %271 = vector.broadcast %cst_258 : f32 to vector<1x128xf32>
    %272 = arith.addf %271, %270 : vector<1x128xf32>
    %273 = arith.divf %271, %272 : vector<1x128xf32>
    %274 = vector.extract_strided_slice %267 {offsets = [0, 128], sizes = [1, 128], strides = [1, 1]} : vector<1x384xf32> to vector<1x128xf32>
    %275 = math.tanh %274 : vector<1x128xf32>
    %276 = vector.extract_strided_slice %267 {offsets = [0, 256], sizes = [1, 128], strides = [1, 1]} : vector<1x384xf32> to vector<1x128xf32>
    %277 = arith.negf %276 : vector<1x128xf32>
    %278 = math.exp %277 : vector<1x128xf32>
    %cst_259 = arith.constant 1.000000e+00 : f32
    %279 = vector.broadcast %cst_259 : f32 to vector<1x128xf32>
    %280 = arith.addf %279, %278 : vector<1x128xf32>
    %281 = arith.divf %279, %280 : vector<1x128xf32>
    %282 = arith.mulf %273, %275 : vector<1x128xf32>
    %283 = math.tanh %282 : vector<1x128xf32>
    %284 = arith.mulf %281, %283 : vector<1x128xf32>
    %c0_260 = arith.constant 0 : index
    %c0_261 = arith.constant 0 : index
    %285 = vector.load %arg16[%c0_260, %c0_261] : memref<128x256xf32, #tpu.memory_space<vmem>>, vector<128x256xf32>
    %cst_262 = arith.constant dense<0.000000e+00> : vector<1x256xf32>
    %286 = tpu.matmul %284, %285, %cst_262 {dimension_numbers = #tpu.dot_dimension_numbers<[1], [0], [0], [1], [0, 0, 1, 1], [], []>} : vector<1x128xf32>, vector<128x256xf32>, vector<1x256xf32> -> vector<1x256xf32>
    %c0_263 = arith.constant 0 : index
    %c0_264 = arith.constant 0 : index
    %287 = vector.load %arg17[%c0_263, %c0_264] : memref<1x256xf32, #tpu.memory_space<vmem>>, vector<1x256xf32>
    %288 = arith.addf %286, %287 : vector<1x256xf32>
    %c0_265 = arith.constant 0 : index
    %c0_266 = arith.constant 0 : index
    %c0_267 = arith.constant 0 : index
    %289 = vector.load %arg18[%c0_265, %c0_266, %c0_267] : memref<1x1x256xf32, #tpu.memory_space<vmem>>, vector<1x1x256xf32>
    %290 = vector.shape_cast %289 : vector<1x1x256xf32> to vector<1x256xf32>
    %291 = vector.shape_cast %288 : vector<1x256xf32> to vector<1x1x256xf32>
    tpu.vector_store %arg18[%c0_265, %c0_266, %c0_267], %291 {strides = array<i32>} : memref<1x1x256xf32, #tpu.memory_space<vmem>>, vector<1x1x256xf32>,
    return
  }
  func.func @transform_0(%arg0: i32) -> (i32, i32, i32) {
    %c0_i32 = arith.constant 0 : i32
    %c0_i32_0 = arith.constant 0 : i32
    %c0_i32_1 = arith.constant 0 : i32
    return %arg0, %c0_i32, %c0_i32_0 : i32, i32, i32
  }
  func.func @transform_1(%arg0: i32) -> (i32, i32, i32) {
    %c0_i32 = arith.constant 0 : i32
    %c0_i32_0 = arith.constant 0 : i32
    %c0_i32_1 = arith.constant 0 : i32
    %c0_i32_2 = arith.constant 0 : i32
    return %c0_i32, %c0_i32_0, %c0_i32_1 : i32, i32, i32
  }
  func.func @transform_2(%arg0: i32) -> (i32, i32, i32) {
    %c0_i32 = arith.constant 0 : i32
    %c0_i32_0 = arith.constant 0 : i32
    %c0_i32_1 = arith.constant 0 : i32
    %c0_i32_2 = arith.constant 0 : i32
    return %c0_i32, %c0_i32_0, %c0_i32_1 : i32, i32, i32
  }
  func.func @transform_3(%arg0: i32) -> (i32, i32) {
    %c0_i32 = arith.constant 0 : i32
    %c0_i32_0 = arith.constant 0 : i32
    %c0_i32_1 = arith.constant 0 : i32
    return %c0_i32, %c0_i32_0 : i32, i32
  }
  func.func @transform_4(%arg0: i32) -> (i32, i32, i32) {
    %c0_i32 = arith.constant 0 : i32
    %c0_i32_0 = arith.constant 0 : i32
    %c0_i32_1 = arith.constant 0 : i32
    %c0_i32_2 = arith.constant 0 : i32
    return %c0_i32, %c0_i32_0, %c0_i32_1 : i32, i32, i32
  }
  func.func @transform_5(%arg0: i32) -> (i32, i32, i32) {
    %c0_i32 = arith.constant 0 : i32
    %c0_i32_0 = arith.constant 0 : i32
    %c0_i32_1 = arith.constant 0 : i32
    %c0_i32_2 = arith.constant 0 : i32
    return %c0_i32, %c0_i32_0, %c0_i32_1 : i32, i32, i32
  }
  func.func @transform_6(%arg0: i32) -> (i32, i32) {
    %c0_i32 = arith.constant 0 : i32
    %c0_i32_0 = arith.constant 0 : i32
    %c0_i32_1 = arith.constant 0 : i32
    return %c0_i32, %c0_i32_0 : i32, i32
  }
  func.func @transform_7(%arg0: i32) -> (i32, i32, i32) {
    %c0_i32 = arith.constant 0 : i32
    %c0_i32_0 = arith.constant 0 : i32
    %c0_i32_1 = arith.constant 0 : i32
    %c0_i32_2 = arith.constant 0 : i32
    return %c0_i32, %c0_i32_0, %c0_i32_1 : i32, i32, i32
  }
  func.func @transform_8(%arg0: i32) -> (i32, i32, i32) {
    %c0_i32 = arith.constant 0 : i32
    %c0_i32_0 = arith.constant 0 : i32
    %c0_i32_1 = arith.constant 0 : i32
    %c0_i32_2 = arith.constant 0 : i32
    return %c0_i32, %c0_i32_0, %c0_i32_1 : i32, i32, i32
  }
  func.func @transform_9(%arg0: i32) -> (i32, i32) {
    %c0_i32 = arith.constant 0 : i32
    %c0_i32_0 = arith.constant 0 : i32
    %c0_i32_1 = arith.constant 0 : i32
    return %c0_i32, %c0_i32_0 : i32, i32
  }
  func.func @transform_10(%arg0: i32) -> (i32, i32, i32) {
    %c0_i32 = arith.constant 0 : i32
    %c0_i32_0 = arith.constant 0 : i32
    %c0_i32_1 = arith.constant 0 : i32
    %c0_i32_2 = arith.constant 0 : i32
    return %c0_i32, %c0_i32_0, %c0_i32_1 : i32, i32, i32
  }
  func.func @transform_11(%arg0: i32) -> (i32, i32, i32) {
    %c0_i32 = arith.constant 0 : i32
    %c0_i32_0 = arith.constant 0 : i32
    %c0_i32_1 = arith.constant 0 : i32
    %c0_i32_2 = arith.constant 0 : i32
    return %c0_i32, %c0_i32_0, %c0_i32_1 : i32, i32, i32
  }
  func.func @transform_12(%arg0: i32) -> (i32, i32) {
    %c0_i32 = arith.constant 0 : i32
    %c0_i32_0 = arith.constant 0 : i32
    %c0_i32_1 = arith.constant 0 : i32
    return %c0_i32, %c0_i32_0 : i32, i32
  }
  func.func @transform_13(%arg0: i32) -> (i32, i32) {
    %c0_i32 = arith.constant 0 : i32
    %c0_i32_0 = arith.constant 0 : i32
    %c0_i32_1 = arith.constant 0 : i32
    return %c0_i32, %c0_i32_0 : i32, i32
  }
  func.func @transform_14(%arg0: i32) -> (i32, i32) {
    %c0_i32 = arith.constant 0 : i32
    %c0_i32_0 = arith.constant 0 : i32
    %c0_i32_1 = arith.constant 0 : i32
    return %c0_i32, %c0_i32_0 : i32, i32
  }
  func.func @transform_15(%arg0: i32) -> (i32, i32) {
    %c0_i32 = arith.constant 0 : i32
    %c0_i32_0 = arith.constant 0 : i32
    %c0_i32_1 = arith.constant 0 : i32
    return %c0_i32, %c0_i32_0 : i32, i32
  }
  func.func @transform_16(%arg0: i32) -> (i32, i32) {
    %c0_i32 = arith.constant 0 : i32
    %c0_i32_0 = arith.constant 0 : i32
    %c0_i32_1 = arith.constant 0 : i32
    return %c0_i32, %c0_i32_0 : i32, i32
  }
  func.func @transform_17(%arg0: i32) -> (i32, i32, i32) {
    %c0_i32 = arith.constant 0 : i32
    %c0_i32_0 = arith.constant 0 : i32
    %c0_i32_1 = arith.constant 0 : i32
    return %arg0, %c0_i32, %c0_i32_0 : i32, i32, i32
  }
}

</mosaic_0001>

<bundles_post_ra>
// kernel: forward.1
= control target key start
LH: loop header
LB: loop body
LE: loop exit
PB: predicated region body
PF: predicated region fallthrough
CT: control target
= control target key end

     0   :  { %s10456_s0 = inlined_call_operand.vmem [shape: f32[2,16,64], index: 0, kind: input, shape index: {}]   ;;  %s10457_s1 = inlined_call_operand.hbm [shape: f32[6,8,16], index: 1, kind: input, shape index: {}]   ;;  %s10458_s2 = inlined_call_operand.vmem [shape: f32[10,64,64], index: 2, kind: input, shape index: {}]   ;;  %s10459_s3 = inlined_call_operand.hbm [shape: f32[1,64], index: 3, kind: input, shape index: {}]   ;;  %s10460_s4 = inlined_call_operand.hbm [shape: f32[4,4,8], index: 4, kind: input, shape index: {}]   ;;  %s10461_s5 = inlined_call_operand.vmem [shape: f32[6,64,32], index: 5, kind: input, shape index: {}]   ;;  %s10462_s6 = inlined_call_operand.hbm [shape: f32[1,32], index: 6, kind: input, shape index: {}]   ;;  %s10463_s7 = inlined_call_operand.hbm [shape: f32[4,2,4], index: 7, kind: input, shape index: {}]   ;;  %s10464_s8 = inlined_call_operand.vmem [shape: f32[6,32,2], index: 8, kind: input, shape index: {}]   ;;  %s10465_s9 = inlined_call_operand.hbm [shape: f32[1,2], index: 9, kind: input, shape index: {}]   ;;  %s10466_s10 = inlined_call_operand.vmem [shape: f32[2,1,2], index: 10, kind: input, shape index: {}]   ;;  %s10467_s11 = inlined_call_operand.vmem [shape: f32[2,2,384], index: 11, kind: input, shape index: {}]   ;;  %s10468_s12 = inlined_call_operand.vmem [shape: f32[1,384], index: 12, kind: input, shape index: {}]   ;;  %s10469_s13 = inlined_call_operand.vmem [shape: f32[128,384], index: 13, kind: input, shape index: {}]   ;;  %s10470_s14 = inlined_call_operand.vmem [shape: f32[1,384], index: 14, kind: input, shape index: {}]   ;;  %s10471_s15 = inlined_call_operand.hbm [shape: f32[128,256], index: 15, kind: input, shape index: {}]   ;;  %s10472_s16 = inlined_call_operand.vmem [shape: f32[1,256], index: 16, kind: input, shape index: {}]   ;;  %s10473_s17 = inlined_call_operand.hbm [shape: f32[2,1,256], index: 17, kind: output, shape index: {}]  }
   0x1   :  { %10487 = sst [smem:[#allocation27_spill]] %s10456_s0 }
   0x2   :  { %10488 = sst [smem:[#allocation28_spill]] %s10457_s1 }
   0x3   :  { %10489 = sst [smem:[#allocation29_spill]] %s10459_s3 }
   0x4   :  { %10490 = sst [smem:[#allocation30_spill]] %s10462_s6 }
   0x5   :  { %10491 = sst [smem:[#allocation31_spill]] %s10465_s9 }
   0x6   :  { %10492 = sst [smem:[#allocation32_spill]] %s10472_s16 }
   0x7   :  { %10493 = sst [smem:[#allocation33_spill]] %s10473_s17 }
   0x8   :  { %22 = vsyncpa [#allocation3], 0 }
   0x9   :  { %23 = vsyncpa [#allocation6], 0 }
   0xa   :  { %24 = vsyncpa [#allocation9], 0 }
   0xb   :  { %25 = vsyncpa [#allocation12], 0 }
   0xc   :  { %26 = vsyncpa [#allocation4], 0 }
   0xd   :  { %28 = vsyncpa [#allocation4 + $0x1], 0  ;;  %s8812_s24 = smov 0   ;;  %s8814_s25 = smov 0  }
   0xe   :  { %s8816_s26 = smov 0   ;;  %s8818_s27 = smov 0  }
   0xf LB: > { %10494 = sst [smem:[#allocation20_spill]] %s8687_s24  ;;  %s8833_s28 = sadd.s32 4294967295, %s8699_s27   ;;  %s8699_s27 = sphi %s8818_s27, %s10528_s27   ;;  %s8695_s26 = sphi %s8816_s26, %s10530_s26   ;;  %s8691_s25 = sphi %s8814_s25, %s10532_s25   ;;  %s8687_s24 = sphi %s8812_s24, %s10531_s24  }
  0x10   : > { %10495 = sst [smem:[#allocation21_spill]] %s8695_s26  ;;  %s6122_s29 = sadd.s32 4294967294, %s8699_s27  }
  0x11   : > { %10496 = sst [smem:[#allocation22_spill]] %s8699_s27  ;;  %s8837_s0 = sadd.s32 1, %s8699_s27  }
  0x12   : > { %10497 = sst [smem:[#allocation23_spill]] %s8837_s0  ;;  %s403_s30 = sadd.s32 1, %s8695_s26 }
  0x13   : > { %s400_s18 = ssub.s32 %s8699_s27, %s8837_s0  ;;  %p413_p0 = scmp.ne.s32.totalorder %s8695_s26, %s8691_s25 }
  0x14   : > { %p401_p1 = scmp.eq.s32.totalorder %s400_s18, 0  ;;  %p414_p2 = scmp.eq.s32.totalorder %s8833_s28, 1 }
  0x15   : > { %p419_p3 = scmp.ne.s32.totalorder %s8691_s25, %s8687_s24  ;;  %p420_p4 = scmp.eq.s32.totalorder %s6122_s29, 1 }
  0x16   : > { %s8848_s19 = scalar_select %p401_p1, %s8695_s26, %s403_s30  }
  0x17   : > { %p8850_p5 = por %p414_p2, %p413_p0  ;;  %p8854_p6 = por %p420_p4, %p419_p3 }
  0x18   : > { %10498 = sst [smem:[#allocation24_spill]] %s8848_s19  ;;  %p6123_p7 = scmp.ge.s32.totalorder %s8699_s27, 1 }
  0x19   : > { %s10499_s1 = scalar_select %p8850_p5, 1, 0 }
  0x1a   : > { %s10501_s20 = scalar_select %p8854_p6, 1, 0 }
  0x1b   : > { %10500 = sst [smem:[#allocation25_spill]] %s10499_s1  ;;  %p427_p8 = scmp.lt.s32.totalorder %s8699_s27, 3 }
  0x1c   : > { %10502 = sst [smem:[#allocation26_spill]] %s10501_s20  ;;  %p10482_p9 = scmp.eq.s32.totalorder %s8833_s28, 0 }
  0x1d   : > { %p8861_p10 = pnand %p6123_p7, %p427_p8  ;;  %s8701_s22 = smov [#allocation5]  }
  0x1e   : > { %s456_s23 = sshll.u32 %s8701_s22, 4  ;;  %s8702_s29 = smov [#allocation8]   ;;  %s457_s23 = int_to_ptr.vmem [resolvable:$true] %s456_s23 }
  0x1f   : > { %s10503_s21 = scalar_select %p8861_p10, 1, 0 }
  0x20   : > { %p8306_p11 = pneg %p8861_p10  ;;  %s483_s30 = sshll.u32 %s8702_s29, 4  ;;  %s8873_s30 = int_to_ptr.vmem [resolvable:$true] %s483_s30 }
  0x21   : > { %s8703_s19 = smov [#allocation11]   ;;  %s10505_s3 = sld [smem:[#allocation29_spill]] }
  0x22   : > { %p8869_p12 = pnand %p10482_p9, %p8306_p11  ;;  %s510_s26 = sshll.u32 %s8703_s19, 4  ;;  %s8875_s26 = int_to_ptr.vmem [resolvable:$true] %s510_s26 }
  0x24   : > { %p8885_p0 = pneg %p8869_p12 }
  0x27   : > { %s8425_s22 = scalar_lea.hbm %s10505_s3, 16 }
  0x28   : > { %p8426_p13 = scmp.ne.s32.totalorder %s10505_s3, %s8425_s22  ;;  %p8432_p3 = scmp.lt.u32.totalorder %s8425_s22, %s10505_s3 }
  0x2a   : > { %p8428_p1 = pnand %p8885_p0, %p8426_p13 }
  0x2c   : > { %p8429_p2 = pneg %p8428_p1 }
  0x2e   : > { %p8434_p4 = pnand %p8432_p3, %p8429_p2 }
  0x30   : > { %8437 = shalt.err (!%p8434_p4)
}
  0x31   : > { %s8438_s0 = scalar_lea.vmem %s457_s23, 16  ;;  %s8445_s24 = scalar_lea.vmem %s457_s23, 32 }
  0x32   : > { %p8439_p7 = scmp.ne.s32.totalorder %s457_s23, %s8438_s0  ;;  %p8446_p9 = scmp.lt.s32.totalorder %s457_s23, %s457_s23 }
  0x33   : > { %p8447_p6 = scmp.lt.s32.totalorder %s8445_s24, %s8438_s0 }
  0x34   : > { %p8441_p8 = pnand %p8439_p7, %p8885_p0 }
  0x35   : > { %p8448_p5 = por %p8447_p6, %p8446_p9 }
  0x36   : > { %p8442_p11 = pneg %p8441_p8 }
  0x38   : > { %p8449_p10 = pnand %p8448_p5, %p8442_p11 }
  0x3a   : > { %8452 = shalt.err (!%p8449_p10)
}
  0x3b   : > { %8312 = dma.hbm_to_vmem [thread:$0]  (!%p8869_p12), %s10505_s3, 16, %s457_s23, [#allocation6]  }
  0x3c   : > { %s10507_s6 = sld [smem:[#allocation30_spill]] }
  0x42   : > { %s8453_s19 = scalar_lea.hbm %s10507_s6, 16 }
  0x43   : > { %p8454_p13 = scmp.ne.s32.totalorder %s10507_s6, %s8453_s19  ;;  %p8460_p5 = scmp.lt.u32.totalorder %s8453_s19, %s10507_s6 }
  0x45   : > { %p8456_p1 = pnand %p8454_p13, %p8885_p0 }
  0x47   : > { %p8457_p6 = pneg %p8456_p1 }
  0x49   : > { %p8462_p9 = pnand %p8460_p5, %p8457_p6 }
  0x4b   : > { %8465 = shalt.err (!%p8462_p9)
}
  0x4c   : > { %s8466_s23 = scalar_lea.vmem %s8873_s30, 16  ;;  %s8473_s16 = scalar_lea.vmem %s8873_s30, 32 }
  0x4d   : > { %p8467_p10 = scmp.ne.s32.totalorder %s8873_s30, %s8466_s23  ;;  %p8474_p4 = scmp.lt.s32.totalorder %s8873_s30, %s8873_s30 }
  0x4e   : > { %p8475_p7 = scmp.lt.s32.totalorder %s8473_s16, %s8466_s23 }
  0x4f   : > { %p8469_p2 = pnand %p8467_p10, %p8885_p0 }
  0x50   : > { %p8476_p8 = por %p8475_p7, %p8474_p4 }
  0x51   : > { %p8470_p3 = pneg %p8469_p2 }
  0x53   : > { %p8477_p11 = pnand %p8476_p8, %p8470_p3 }
  0x55   : > { %8480 = shalt.err (!%p8477_p11)
}
  0x56   : > { %8318 = dma.hbm_to_vmem [thread:$0]  (!%p8869_p12), %s10507_s6, 16, %s8873_s30, [#allocation9]  }
  0x57   : > { %s10508_s9 = sld [smem:[#allocation31_spill]] }
  0x5d   : > { %s8481_s22 = scalar_lea.hbm %s10508_s9, 16 }
  0x5e   : > { %p8482_p13 = scmp.ne.s32.totalorder %s10508_s9, %s8481_s22  ;;  %p8488_p5 = scmp.lt.u32.totalorder %s8481_s22, %s10508_s9 }
  0x60   : > { %p8484_p1 = pnand %p8482_p13, %p8885_p0 }
  0x62   : > { %p8485_p6 = pneg %p8484_p1 }
  0x64   : > { %p8490_p9 = pnand %p8488_p5, %p8485_p6 }
  0x66   : > { %8493 = shalt.err (!%p8490_p9)
}
  0x67   : > { %s8494_s30 = scalar_lea.vmem %s8875_s26, 16  ;;  %s8501_s16 = scalar_lea.vmem %s8875_s26, 32 }
  0x68   : > { %p8495_p10 = scmp.ne.s32.totalorder %s8875_s26, %s8494_s30  ;;  %p8502_p4 = scmp.lt.s32.totalorder %s8875_s26, %s8875_s26 }
  0x69   : > { %p8503_p7 = scmp.lt.s32.totalorder %s8501_s16, %s8494_s30 }
  0x6a   : > { %p8497_p2 = pnand %p8495_p10, %p8885_p0 }
  0x6b   : > { %p8504_p8 = por %p8503_p7, %p8502_p4 }
  0x6c   : > { %p8498_p3 = pneg %p8497_p2 }
  0x6e   : > { %p8505_p11 = pnand %p8504_p8, %p8498_p3 }
  0x70   : > { %8508 = shalt.err (!%p8505_p11)
}
  0x71   : > { %8324 = dma.hbm_to_vmem [thread:$0]  (!%p8869_p12), %s10508_s9, 16, %s8875_s26, [#allocation12]  }
  0x72   : > { %s8704_s20 = smov [#allocation2]   ;;  %s10509_s0 = sld [smem:[#allocation28_spill]] }
  0x73   : > { %s439_s17 = sshll.u32 %s8704_s20, 4  ;;  %s440_s17 = int_to_ptr.vmem [resolvable:$true] %s439_s17 }
  0x78   : > { %s8509_s24 = scalar_lea.hbm %s10509_s0, 768 }
  0x79   : > { %p8510_p13 = scmp.ne.s32.totalorder %s10509_s0, %s8509_s24  ;;  %p8516_p5 = scmp.lt.u32.totalorder %s8509_s24, %s10509_s0 }
  0x7b   : > { %p8512_p1 = pnand %p8510_p13, %p8885_p0 }
  0x7d   : > { %p8513_p6 = pneg %p8512_p1 }
  0x7f   : > { %p8518_p9 = pnand %p8516_p5, %p8513_p6 }
  0x81   : > { %8521 = shalt.err (!%p8518_p9)
}
  0x82   : > { %s8522_s26 = scalar_lea.vmem %s440_s17, 768  ;;  %p8530_p4 = scmp.lt.s32.totalorder %s440_s17, %s440_s17 }
  0x83   : > { %p8523_p10 = scmp.ne.s32.totalorder %s440_s17, %s8522_s26  ;;  %p8531_p7 = scmp.lt.s32.totalorder %s8522_s26, %s8522_s26 }
  0x85   : > { %p8525_p2 = pnand %p8523_p10, %p8885_p0  ;;  %p8532_p8 = por %p8531_p7, %p8530_p4 }
  0x87   : > { %p8526_p3 = pneg %p8525_p2 }
  0x89   : > { %p8533_p11 = pnand %p8532_p8, %p8526_p3 }
  0x8b   : > { %8536 = shalt.err (!%p8533_p11)
}
  0x8c   : > { %s8705_s1 = smov 128   ;;  %s8706_s27 = smov 8  }
  0x8d   : > { %8309 = dma.hbm_to_vmem [thread:$0]  (!%p8869_p12), %s10509_s0, 768, %s440_s17, [#allocation3], %s8705_s1, %s8705_s1, %s8706_s27  }
  0x8e   : > { %s8707_s22 = smov [#allocation7]   ;;  %s8537_s30 = scalar_lea.hbm %s10460_s4, 256 }
  0x8f   : > { %s466_s19 = sshll.u32 %s8707_s22, 4  ;;  %p8538_p13 = scmp.ne.s32.totalorder %s10460_s4, %s8537_s30  ;;  %s467_s19 = int_to_ptr.vmem [resolvable:$true] %s466_s19 }
  0x90   : > { %p8544_p5 = scmp.lt.u32.totalorder %s8537_s30, %s10460_s4 }
  0x91   : > { %p8540_p1 = pnand %p8538_p13, %p8885_p0 }
  0x93   : > { %p8541_p6 = pneg %p8540_p1 }
  0x95   : > { %p8546_p9 = pnand %p8544_p5, %p8541_p6 }
  0x97   : > { %8549 = shalt.err (!%p8546_p9)
}
  0x98   : > { %s8550_s17 = scalar_lea.vmem %s467_s19, 256  ;;  %p8558_p4 = scmp.lt.s32.totalorder %s467_s19, %s467_s19 }
  0x99   : > { %p8551_p10 = scmp.ne.s32.totalorder %s467_s19, %s8550_s17  ;;  %p8559_p7 = scmp.lt.s32.totalorder %s8550_s17, %s8550_s17 }
  0x9b   : > { %p8553_p2 = pnand %p8551_p10, %p8885_p0  ;;  %p8560_p8 = por %p8559_p7, %p8558_p4 }
  0x9d   : > { %p8554_p3 = pneg %p8553_p2 }
  0x9f   : > { %p8561_p11 = pnand %p8560_p8, %p8554_p3 }
  0xa1   : > { %8564 = shalt.err (!%p8561_p11)
}
  0xa2   : > { %s8708_s1 = smov 64   ;;  %s8709_s27 = smov 4  }
  0xa3   : > { %8315 = dma.hbm_to_vmem [thread:$0]  (!%p8869_p12), %s10460_s4, 256, %s467_s19, [#allocation6], %s8708_s1, %s8708_s1, %s8709_s27  }
  0xa4   : > { %s8710_s3 = smov [#allocation10]   ;;  %s8565_s23 = scalar_lea.hbm %s10463_s7, 128 }
  0xa5   : > { %s493_s20 = sshll.u32 %s8710_s3, 4  ;;  %p8566_p13 = scmp.ne.s32.totalorder %s10463_s7, %s8565_s23  ;;  %s494_s20 = int_to_ptr.vmem [resolvable:$true] %s493_s20 }
  0xa6   : > { %p8572_p5 = scmp.lt.u32.totalorder %s8565_s23, %s10463_s7 }
  0xa7   : > { %p8568_p1 = pnand %p8566_p13, %p8885_p0 }
  0xa9   : > { %p8569_p6 = pneg %p8568_p1 }
  0xab   : > { %p8574_p9 = pnand %p8572_p5, %p8569_p6 }
  0xad   : > { %8577 = shalt.err (!%p8574_p9)
}
  0xae   : > { %s8578_s19 = scalar_lea.vmem %s494_s20, 128  ;;  %p8586_p4 = scmp.lt.s32.totalorder %s494_s20, %s494_s20 }
  0xaf   : > { %p8579_p10 = scmp.ne.s32.totalorder %s494_s20, %s8578_s19  ;;  %p8587_p7 = scmp.lt.s32.totalorder %s8578_s19, %s8578_s19 }
  0xb1   : > { %p8581_p2 = pnand %p8579_p10, %p8885_p0  ;;  %p8588_p8 = por %p8587_p7, %p8586_p4 }
  0xb3   : > { %p8582_p3 = pneg %p8581_p2 }
  0xb5   : > { %p8589_p11 = pnand %p8588_p8, %p8582_p3 }
  0xb7   : > { %8592 = shalt.err (!%p8589_p11)
}
  0xb8   : > { %s8711_s1 = smov 32   ;;  %s8712_s27 = smov 2  }
  0xb9   : > { %8321 = dma.hbm_to_vmem [thread:$0]  (!%p8869_p12), %s10463_s7, 128, %s494_s20, [#allocation9], %s8711_s1, %s8711_s1, %s8712_s27  }
  0xba   : > { %s8713_s3 = smov [#allocation13]   ;;  %s8593_s30 = scalar_lea.hbm %s10471_s15, 4096 }
  0xbb   : > { %s535_s22 = sshll.u32 %s8713_s3, 4  ;;  %p8594_p13 = scmp.ne.s32.totalorder %s10471_s15, %s8593_s30  ;;  %s536_s22 = int_to_ptr.vmem [resolvable:$true] %s535_s22 }
  0xbc   : > { %p8600_p5 = scmp.lt.u32.totalorder %s8593_s30, %s10471_s15 }
  0xbd   : > { %p8596_p1 = pnand %p8594_p13, %p8885_p0 }
  0xbf   : > { %p8597_p6 = pneg %p8596_p1 }
  0xc1   : > { %p8602_p9 = pnand %p8600_p5, %p8597_p6 }
  0xc3   : > { %8605 = shalt.err (!%p8602_p9)
}
  0xc4   : > { %s8606_s20 = scalar_lea.vmem %s536_s22, 4096  ;;  %p8614_p4 = scmp.lt.s32.totalorder %s536_s22, %s536_s22 }
  0xc5   : > { %p8607_p10 = scmp.ne.s32.totalorder %s536_s22, %s8606_s20  ;;  %p8615_p7 = scmp.lt.s32.totalorder %s8606_s20, %s8606_s20 }
  0xc7   : > { %p8609_p2 = pnand %p8607_p10, %p8885_p0  ;;  %p8616_p8 = por %p8615_p7, %p8614_p4 }
  0xc9   : > { %p8610_p3 = pneg %p8609_p2 }
  0xcb   : > { %p8617_p11 = pnand %p8616_p8, %p8610_p3 }
  0xcd   : > { %8620 = shalt.err (!%p8617_p11)
}
  0xce   : > { %s8714_s1 = smov 256   ;;  %s8715_s27 = smov 16  }
  0xcf   : > { %8327 = dma.hbm_to_vmem [thread:$0]  (!%p8869_p12), %s10471_s15, 4096, %s536_s22, [#allocation12], %s8714_s1, %s8714_s1, %s8715_s27  }
  0xd0   : > { %p10510_p13 = scmp.ne.s32.totalorder %s10503_s21, 0 }
  0xd1   : > { %p10511_p1 = scmp.eq.s32.totalorder (!%p10510_p13), %s8833_s28, 0 }
  0xd2   : > { %562 = sbr.rel (%p10510_p13) target bundleno = 3001 (0xbb9), region = 88 }
  0xd9   : > { %8666 = dma.done.wait (%p10511_p1), [#allocation3], 768   ;;  %p10512_p0 = pmov %p10511_p1 }
  0xdb   : > { %8668 = vsyncadd (%p10512_p0), [#allocation3], 4294966528  ;;  %p10513_p6 = pmov %p10512_p0 }
  0xdc   : > { %p10514_p5 = pmov %p10512_p0 }
  0xdd   : > { %8670 = dma.done.wait (%p10513_p6), [#allocation6], 272  }
  0xde   : > { %8672 = vsyncadd (%p10514_p5), [#allocation6], 4294967024  ;;  %p10515_p9 = pmov %p10512_p0 }
  0xdf   : > { %p10516_p12 = pmov %p10512_p0 }
  0xe0   : > { %8674 = dma.done.wait (%p10515_p9), [#allocation9], 144  }
  0xe1   : > { %8676 = vsyncadd (%p10516_p12), [#allocation9], 4294967152  ;;  %p10517_p10 = pmov %p10512_p0 }
  0xe2   : > { %p10518_p2 = pmov %p10512_p0 }
  0xe3   : > { %8678 = dma.done.wait (%p10517_p10), [#allocation12], 4112  }
  0xe4   : > { %8680 = vsyncadd (%p10518_p2), [#allocation12], 4294963184  ;;  %p638_p3 = scmp.lt.s32.totalorder %s8833_s28, 1  ;;  %v8716_v0 = vmov 0.0|0.0   ;;  %vm8717_vm0 = vmmov 0   ;;  %v8718_v1 = vmov 0.0  }
  0xe5   : > { %7651 = vmatprep.subr.bf16.mxu0 %v8716_v0  ;;  %7654 = vmatprep.subr.bf16.mxu1 %v8716_v0  ;;  %s10519_s22 = sld [smem:[#allocation27_spill]]  ;;  %v645_v5 = vld [vmem:[#allocation2] sm:$0xff]  ;;  %vm646_vm1 = vcmask 130048   ;;  %v721_v6 = vld [vmem:[#allocation2 + $0x8] sm:$0xff]  ;;  %v796_v7 = vld [vmem:[#allocation2 + $0x10] sm:$0xff]  ;;  %vm1112_vm2 = vcmask 523264  }
  0xe6   : > { %s639_s21 = scalar_select %p638_p3, %s8833_s28, 1  ;;  %6778 = vmatprep.mubr.msk.f32.mxu0 %vm8717_vm0, %v8718_v1  ;;  %6785 = vmatprep.mubr.msk.f32.mxu1 %vm8717_vm0, %v8718_v1  ;;  %v871_v8 = vld [vmem:[#allocation2 + $0x18] sm:$0xff]  ;;  %v1095_v9 = vld [vmem:[%s10458_s2] sm:$0xff]  ;;  %v1096_v10 = vld [vmem:[%s10458_s2 + $0x8] sm:$0xff]  ;;  %vm2628_vm3 = vcmask 64512   ;;  %vm3853_vm4 = vcmask 1043456  }
  0xe7   : > { %v6149_v11 = vld [vmem:[%s10458_s2 + $0x40] sm:$0xff]  ;;  %v6150_v12 = vld [vmem:[%s10458_s2 + $0x48] sm:$0xff]  ;;  %v9074_v14 = vpack.c.bf16 %v1096_v10, %v1095_v9  ;;  %v1097_v17 = vld [vmem:[%s10458_s2 + $0x10] sm:$0xff]  ;;  %vm3849_vm5 = vcmask 31744   ;;  %vm4161_vm6 = vcmask 261120   ;;  %vm5056_vm7 = vcmask 1041408  }
  0xe8   : > { %s6365_s18 = sshll.u32 %s639_s21, 4  ;;  %v946_v13 = vld [vmem:[#allocation2 + $0x20] sm:$0xff]  ;;  %v1021_v15 = vld [vmem:[#allocation2 + $0x28] sm:$0xff]  ;;  %v9078_v16 = vpack.c.bf16 %v6150_v12, %v6149_v11  ;;  %v1098_v18 = vld [vmem:[%s10458_s2 + $0x18] sm:$0xff]  ;;  %vm5052_vm8 = vcmask 15360   ;;  %s10520_s20 = sld [smem:[#allocation32_spill]] }
  0xe9   : > { %v6151_v19 = vld [vmem:[%s10458_s2 + $0x50] sm:$0xff]  ;;  %v6152_v20 = vld [vmem:[%s10458_s2 + $0x58] sm:$0xff]  ;;  %v9099_v21 = vpack.c.bf16 %v1098_v18, %v1097_v17  ;;  %v1099_v23 = vld [vmem:[%s10458_s2 + $0x20] sm:$0xff]  ;;  %s635_s1 = sand.u32 1, %s8691_s25   ;;  %s10521_s6 = sld [smem:[#allocation25_spill]] }
  0xea   : > { %v9103_v22 = vpack.c.bf16 %v6152_v20, %v6151_v19  ;;  %v1100_v24 = vld [vmem:[%s10458_s2 + $0x28] sm:$0xff]  ;;  %v6153_v25 = vld [vmem:[%s10458_s2 + $0x60] sm:$0xff]  ;;  %v1101_v29 = vld [vmem:[%s10458_s2 + $0x30] sm:$0xff]  ;;  %s6140_s27 = sshll.u32 %s635_s1, 1  ;;  %s6366_s9 = sshll.u32 %s8833_s28, 5 }
  0xeb   : > { %s642_s24 = scalar_lea.vmem %s10519_s22, %s6365_s18  ;;  %v6154_v26 = vld [vmem:[%s10458_s2 + $0x68] sm:$0xff]  ;;  %v9123_v27 = vpack.c.bf16 %v1100_v24, %v1099_v23  ;;  %v1102_v30 = vld [vmem:[%s10458_s2 + $0x38] sm:$0xff]  ;;  %v6155_v31 = vld [vmem:[%s10458_s2 + $0x70] sm:$0xff]  ;;  %s637_s21 = scalar_lea.vmem [#allocation14], %s6140_s27 }
  0xec   : > { %v643_v2 = vld [vmem:[%s642_s24] sm:$0xff]  ;;  %v644_v3 = vld [vmem:[%s642_s24 + $0x8] sm:$0xff]  ;;  %v9127_v28 = vpack.c.bf16 %v6154_v26, %v6153_v25  ;;  %v6156_v32 = vld [vmem:[%s10458_s2 + $0x78] sm:$0xff]  ;;  %v9143_v33 = vpack.c.bf16 %v1102_v30, %v1101_v29  ;;  %s5994_s18 = sshll.u32 %s637_s21, 4  ;;  %s10522_s22 = sld [smem:[#allocation33_spill]]  ;;  %s10416_s18 = int_to_ptr.vmem [resolvable:$true] %s5994_s18 }
  0xed   : > { %v7652_v4 = vpack.c.bf16 %v644_v3, %v643_v2  ;;  %v9147_v34 = vpack.c.bf16 %v6156_v32, %v6155_v31  ;;  %v6159_v35 = vld [vmem:[%s10458_s2 + $0x80] sm:$0xff]  ;;  %v6160_v36 = vld [vmem:[%s10458_s2 + $0x88] sm:$0xff]  ;;  %v6161_v41 = vld [vmem:[%s10458_s2 + $0x90] sm:$0xff]  ;;  %s5980_s28 = scalar_lea.sflag [#allocation4], %s635_s1  ;;  %s8621_s23 = scalar_lea.vmem %s10416_s18, 32 }
  0xee   : > { %v6194_v37 = vld [vmem:[%s10458_s2 + $0x180] sm:$0xff]  ;;  %v6195_v38 = vld [vmem:[%s10458_s2 + $0x188] sm:$0xff]  ;;  %v9166_v39 = vpack.c.bf16 %v6160_v36, %v6159_v35  ;;  %v6162_v42 = vld [vmem:[%s10458_s2 + $0x98] sm:$0xff]  ;;  %p8622_p4 = scmp.ne.s32.totalorder %s10416_s18, %s8621_s23  ;;  %s8721_s30 = smov [#allocation14]  }
  0xef   : > { %7653 = vmatpush3.bf16.msra.mxu0 %v7652_v4  ;;  %7656 = vmatpush3.bf16.msra.mxu1 %v7652_v4  ;;  %v9168_v40 = vpack.c.bf16 %v6195_v38, %v6194_v37  ;;  %v6196_v43 = vld [vmem:[%s10458_s2 + $0x190] sm:$0xff]  ;;  %v6197_v44 = vld [vmem:[%s10458_s2 + $0x198] sm:$0xff]  ;;  %v9192_v49 = vpack.c.bf16 %v6162_v42, %v6161_v41  ;;  %v6163_v51 = vld [vmem:[%s10458_s2 + $0xa0] sm:$0xff]  ;;  %p10523_p7 = scmp.ne.s32.totalorder %s10521_s6, 0  ;;  %s8625_s16 = sshll.u32 %s8721_s30, 4  ;;  %s8626_s16 = int_to_ptr.vmem [resolvable:$false] %s8625_s16 }
  0xf0   : > { %7657 = vmatprep.subr.bf16.mxu0 %v8716_v0  ;;  %7660 = vmatprep.subr.bf16.mxu1 %v8716_v0  ;;  %v9194_v50 = vpack.c.bf16 %v6197_v44, %v6196_v43  ;;  %v6164_v52 = vld [vmem:[%s10458_s2 + $0xa8] sm:$0xff]  ;;  %v6198_v53 = vld [vmem:[%s10458_s2 + $0x1a0] sm:$0xff]  ;;  %v6165_v60 = vld [vmem:[%s10458_s2 + $0xb0] sm:$0xff]  ;;  %s8627_s26 = scalar_lea.vmem %s8626_s16, 64  ;;  %p8628_p13 = scmp.lt.s32.totalorder %s10416_s18, %s8626_s16 }
  0xf1   : > { %v6199_v54 = vld [vmem:[%s10458_s2 + $0x1a8] sm:$0xff]  ;;  %v9220_v58 = vpack.c.bf16 %v6164_v52, %v6163_v51  ;;  %v6166_v62 = vld [vmem:[%s10458_s2 + $0xb8] sm:$0xff]  ;;  %v6200_v63 = vld [vmem:[%s10458_s2 + $0x1b0] sm:$0xff]  ;;  %p8623_p8 = pnand %p8622_p4, %p10523_p7  ;;  %p8629_p1 = scmp.lt.s32.totalorder %s8627_s26, %s8621_s23 }
  0xf2   : > { %6779 = vmatmul.mubr.msk.f32.vlgmr.msra.gmra.mrb[0].mxu0 %vm646_vm1, %v645_v5  ;;  %6786 = vmatmul.mubr.msk.f32.vlgmr.msra.gmra.mrb[0].mxu1 %vm646_vm1, %v721_v6  ;;  %v9222_v59 = vpack.c.bf16 %v6199_v54, %v6198_v53  ;;  %v6201_v2 = vld [vmem:[%s10458_s2 + $0x1b8] sm:$0xff]  ;;  %v9244_v6 = vpack.c.bf16 %v6166_v62, %v6165_v60  ;;  %v6169_v10 = vld [vmem:[%s10458_s2 + $0xc8] sm:$0xff]  ;;  %v6186_v11 = vld [vmem:[%s10458_s2 + $0x140] sm:$0xff]  ;;  %s10414_s24 = scalar_lea.hbm %s10522_s22, %s6366_s9 }
  0xf3   : > { %7659 = vmatpush3.bf16.msra.mxu0 %v7652_v4  ;;  %6792 = vmatprep.mubr.msk.f32.mxu0 %vm8717_vm0, %v8718_v1  ;;  %v6187_v12 = vld [vmem:[%s10458_s2 + $0x148] sm:$0xff]  ;;  %v6170_v17 = vld [vmem:[%s10458_s2 + $0xd0] sm:$0xff]  ;;  %v6171_v18 = vld [vmem:[%s10458_s2 + $0xd8] sm:$0xff]  ;;  %p8624_p11 = pneg %p8623_p8  ;;  %p8630_p0 = por %p8629_p1, %p8628_p13 }
  0xf4   : > { %7662 = vmatpush3.bf16.msra.mxu1 %v7652_v4  ;;  %6799 = vmatprep.mubr.msk.f32.mxu1 %vm8717_vm0, %v8718_v1  ;;  %v6188_v19 = vld [vmem:[%s10458_s2 + $0x150] sm:$0xff]  ;;  %v6189_v20 = vld [vmem:[%s10458_s2 + $0x158] sm:$0xff]  ;;  %v9288_v23 = vpack.c.bf16 %v6171_v18, %v6170_v17  ;;  %v6172_v25 = vld [vmem:[%s10458_s2 + $0xe0] sm:$0xff] }
  0xf5   : > { %7663 = vmatprep.subr.bf16.mxu0 %v8716_v0  ;;  %7666 = vmatprep.subr.bf16.mxu1 %v8716_v0  ;;  %v9290_v24 = vpack.c.bf16 %v6189_v20, %v6188_v19  ;;  %v6173_v26 = vld [vmem:[%s10458_s2 + $0xe8] sm:$0xff]  ;;  %v6190_v29 = vld [vmem:[%s10458_s2 + $0x160] sm:$0xff]  ;;  %v6174_v35 = vld [vmem:[%s10458_s2 + $0xf0] sm:$0xff]  ;;  %p8631_p6 = pnand %p8630_p0, %p8624_p11 }
  0xf6   : > { %6793 = vmatmul.mubr.msk.f32.vlgmr.msra.gmra.mrb[2].mxu0 %vm646_vm1, %v796_v7  ;;  %v9246_v7 = vpack.c.bf16 %v6201_v2, %v6200_v63  ;;  %v6191_v30 = vld [vmem:[%s10458_s2 + $0x168] sm:$0xff]  ;;  %v9312_v31 = vpack.c.bf16 %v6173_v26, %v6172_v25  ;;  %v6175_v36 = vld [vmem:[%s10458_s2 + $0xf8] sm:$0xff]  ;;  %v6192_v37 = vld [vmem:[%s10458_s2 + $0x170] sm:$0xff] }
  0xf7   : > { %6800 = vmatmul.mubr.msk.f32.vlgmr.msra.gmra.mrb[2].mxu1 %vm646_vm1, %v871_v8  ;;  %7665 = vmatpush3.bf16.msra.mxu0 %v7652_v4  ;;  %v6168_v8 = vld [vmem:[%s10458_s2 + $0xc0] sm:$0xff]  ;;  %v9314_v32 = vpack.c.bf16 %v6191_v30, %v6190_v29  ;;  %v6193_v38 = vld [vmem:[%s10458_s2 + $0x178] sm:$0xff]  ;;  %v9332_v41 = vpack.c.bf16 %v6175_v36, %v6174_v35  ;;  %v6178_v44 = vld [vmem:[%s10458_s2 + $0x108] sm:$0xff] }
  0xf8   : > { %6806 = vmatprep.mubr.msk.f32.mxu0 %vm8717_vm0, %v8718_v1  ;;  %7668 = vmatpush3.bf16.msra.mxu1 %v7652_v4  ;;  %v9334_v42 = vpack.c.bf16 %v6193_v38, %v6192_v37  ;;  %v6177_v43 = vld [vmem:[%s10458_s2 + $0x100] sm:$0xff]  ;;  %v6179_v53 = vld [vmem:[%s10458_s2 + $0x110] sm:$0xff]  ;;  %v6180_v54 = vld [vmem:[%s10458_s2 + $0x118] sm:$0xff] }
  0xf9   : > { %6813 = vmatprep.mubr.msk.f32.mxu1 %vm8717_vm0, %v8718_v1  ;;  %7669 = vmatprep.subr.bf16.mxu1 %v8716_v0  ;;  %v9352_v51 = vpack.c.bf16 %v6178_v44, %v6177_v43  ;;  %v6207_v60 = vld [vmem:[%s10458_s2 + $0x1d8] sm:$0xff]  ;;  %v6181_v63 = vld [vmem:[%s10458_s2 + $0x120] sm:$0xff]  ;;  %v6214_v25 = vld [vmem:[%s10458_s2 + $0x208] sm:$0xff] }
  0xfa   : > { %6807 = vmatmul.mubr.msk.f32.vlgmr.msra.gmra.mrb[4].mxu0 %vm646_vm1, %v946_v13  ;;  %7681 = vmatprep.subr.bf16.mxu0 %v8716_v0  ;;  %v9264_v13 = vpack.c.bf16 %v6169_v10, %v6168_v8  ;;  %v6208_v2 = vld [vmem:[%s10458_s2 + $0x1e0] sm:$0xff]  ;;  %v6183_v10 = vld [vmem:[%s10458_s2 + $0x130] sm:$0xff]  ;;  %v6211_v17 = vld [vmem:[%s10458_s2 + $0x1f8] sm:$0xff] }
  0xfb   : > { %6814 = vmatmul.mubr.msk.f32.vlgmr.msra.gmra.mrb[4].mxu1 %vm646_vm1, %v1021_v15  ;;  %7683 = vmatpush3.bf16.msra.mxu0 %v9074_v14  ;;  %v9266_v15 = vpack.c.bf16 %v6187_v12, %v6186_v11  ;;  %v6184_v11 = vld [vmem:[%s10458_s2 + $0x138] sm:$0xff]  ;;  %v6210_v12 = vld [vmem:[%s10458_s2 + $0x1f0] sm:$0xff]  ;;  %v6213_v20 = vld [vmem:[%s10458_s2 + $0x200] sm:$0xff] }
  0xfc   : > { %7671 = vmatpush3.bf16.msra.mxu1 %v9078_v16  ;;  %7684 = vmatprep.subr.bf16.mxu0 %v8716_v0  ;;  %v9420_v18 = vpack.c.bf16 %v6184_v11, %v6183_v10  ;;  %v9422_v19 = vpack.c.bf16 %v6211_v17, %v6210_v12  ;;  %v9434_v26 = vpack.c.bf16 %v6214_v25, %v6213_v20  ;;  %v6215_v29 = vld [vmem:[%s10458_s2 + $0x210] sm:$0xff]  ;;  %v6216_v30 = vld [vmem:[%s10458_s2 + $0x218] sm:$0xff]  ;;  %v6217_v36 = vld [vmem:[%s10458_s2 + $0x220] sm:$0xff] }
  0xfd   : > { %7672 = vmatprep.subr.bf16.mxu1 %v8716_v0  ;;  %6832 = vmatprep.mubr.msk.f32.mxu1 %vm8717_vm0, %v8718_v1  ;;  %v9450_v35 = vpack.c.bf16 %v6216_v30, %v6215_v29  ;;  %v6218_v37 = vld [vmem:[%s10458_s2 + $0x228] sm:$0xff]  ;;  %v6219_v38 = vld [vmem:[%s10458_s2 + $0x230] sm:$0xff]  ;;  %v6220_v43 = vld [vmem:[%s10458_s2 + $0x238] sm:$0xff] }
  0xfe   : > { %6851 = vmatprep.mubr.msk.f32.mxu0 %vm8717_vm0, %v8718_v1  ;;  %v9478_v44 = vpack.c.bf16 %v6220_v43, %v6219_v38  ;;  %v6250_v11 = vld [vmem:[%s10461_s5 + $0x60] sm:$0xff]  ;;  %v6251_v12 = vld [vmem:[%s10461_s5 + $0x68] sm:$0xff]  ;;  %v6252_v25 = vld [vmem:[%s10461_s5 + $0x70] sm:$0xff] }
  0xff   : > { %7686 = vmatpush3.bf16.msra.mxu0 %v9099_v21  ;;  %v6277_v17 = vld [vmem:[%s10461_s5 + $0x120] sm:$0xff]  ;;  %v6279_v29 = vld [vmem:[%s10461_s5 + $0x130] sm:$0xff]  ;;  %v6280_v30 = vld [vmem:[%s10461_s5 + $0x138] sm:$0xff] }
 0x100   : > { %7674 = vmatpush3.bf16.msra.mxu1 %v9103_v22  ;;  %7687 = vmatprep.subr.bf16.mxu0 %v8716_v0  ;;  %v6265_v38 = vld [vmem:[%s10461_s5 + $0xc0] sm:$0xff]  ;;  %v6266_v43 = vld [vmem:[%s10461_s5 + $0xc8] sm:$0xff] }
 0x101   : > { %7675 = vmatprep.subr.bf16.mxu1 %v8716_v0 }
 0x103   : > { %7689 = vmatpush3.bf16.msra.mxu0 %v9123_v27 }
 0x104   : > { %7677 = vmatpush3.bf16.msra.mxu1 %v9127_v28  ;;  %7690 = vmatprep.subr.bf16.mxu0 %v8716_v0 }
 0x105   : > { %7678 = vmatprep.subr.bf16.mxu1 %v8716_v0 }
 0x107   : > { %7692 = vmatpush3.bf16.msra.mxu0 %v9143_v33 }
 0x108   : > { %7680 = vmatpush3.bf16.msra.mxu1 %v9147_v34  ;;  %7693 = vmatprep.subr.bf16.mxu0 %v8716_v0 }
 0x109   : > { %7729 = vmatprep.subr.bf16.mxu1 %v8716_v0 }
 0x1c5   : > { %v9182_v45 = vpop.f32.mrb[0].mxu0  ;;  %v9184_v46 = vpop.f32.mrb[0].mxu1 }
 0x1c6   : > { %v6787_v47 = vpop.f32.mrb[1].mxu1  ;;  %6833 = vmatmul.mubr.msk.f32.vlgmr.msra.gmra.mrb[6].mxu1 %vm1112_vm2, %v9184_v46  ;;  %6852 = vmatmul.mubr.msk.f32.vlgmr.msra.gmra.mrb[6].mxu0 %vm1112_vm2, %v9182_v45  ;;  %v6780_v48 = vpop.f32.mrb[1].mxu0 }
 0x1c7   : > { %7695 = vmatpush3.bf16.msra.mxu0 %v9166_v39  ;;  %7731 = vmatpush3.bf16.msra.mxu1 %v9168_v40  ;;  %v6204_v47 = vld [vmem:[%s10458_s2 + $0x1c0] sm:$0xff]  ;;  %v6205_v48 = vld [vmem:[%s10458_s2 + $0x1c8] sm:$0xff] }
 0x1c8   : > { %7696 = vmatprep.subr.bf16.mxu0 %v8716_v0  ;;  %7732 = vmatprep.subr.bf16.mxu1 %v8716_v0  ;;  %v9354_v52 = vpack.c.bf16 %v6205_v48, %v6204_v47  ;;  %v6223_v47 = vld [vmem:[%s10458_s2 + $0x248] sm:$0xff] }
 0x1c9   : > { %6927 = vmatprep.mubr.msk.f32.mxu1 %vm8717_vm0, %v8718_v1  ;;  %v9212_v55 = vpop.f32.mrb[2].mxu0  ;;  %6870 = vmatprep.mubr.msk.f32.mxu0 %vm8717_vm0, %v8718_v1 }
 0x1ca   : > { %v9216_v56 = vpop.f32.mrb[2].mxu1  ;;  %v6794_v57 = vpop.f32.mrb[3].mxu0 }
 0x1cb   : > { %7698 = vmatpush3.bf16.msra.mxu0 %v9192_v49  ;;  %7734 = vmatpush3.bf16.msra.mxu1 %v9194_v50  ;;  %v6801_v61 = vpop.f32.mrb[3].mxu1  ;;  %v6206_v57 = vld [vmem:[%s10458_s2 + $0x1d0] sm:$0xff] }
 0x1cc   : > { %7699 = vmatprep.subr.bf16.mxu0 %v8716_v0  ;;  %7735 = vmatprep.subr.bf16.mxu1 %v8716_v0  ;;  %v9376_v61 = vpack.c.bf16 %v6180_v54, %v6179_v53  ;;  %v9378_v62 = vpack.c.bf16 %v6207_v60, %v6206_v57  ;;  %v6225_v53 = vld [vmem:[%s10458_s2 + $0x258] sm:$0xff]  ;;  %v6226_v54 = vld [vmem:[%s10458_s2 + $0x260] sm:$0xff]  ;;  %v6227_v57 = vld [vmem:[%s10458_s2 + $0x268] sm:$0xff] }
 0x1cd   : > { %v9238_v3 = vpop.f32.mrb[4].mxu0  ;;  %v6228_v60 = vld [vmem:[%s10458_s2 + $0x270] sm:$0xff] }
 0x1ce   : > { %v6808_v4 = vpop.f32.mrb[5].mxu0  ;;  %v9240_v5 = vpop.f32.mrb[4].mxu1 }
 0x1cf   : > { %7701 = vmatpush3.bf16.msra.mxu0 %v9220_v58  ;;  %7737 = vmatpush3.bf16.msra.mxu1 %v9222_v59  ;;  %v6815_v9 = vpop.f32.mrb[5].mxu1  ;;  %v6209_v4 = vld [vmem:[%s10458_s2 + $0x1e8] sm:$0xff] }
 0x1d0   : > { %7702 = vmatprep.subr.bf16.mxu0 %v8716_v0  ;;  %7738 = vmatprep.subr.bf16.mxu1 %v8716_v0  ;;  %v9402_v9 = vpack.c.bf16 %v6209_v4, %v6208_v2  ;;  %v6249_v2 = vld [vmem:[%s10461_s5 + $0x58] sm:$0xff]  ;;  %v6275_v4 = vld [vmem:[%s10461_s5 + $0x110] sm:$0xff] }
 0x1d3   : > { %7704 = vmatpush3.bf16.msra.mxu0 %v9244_v6  ;;  %7740 = vmatpush3.bf16.msra.mxu1 %v9246_v7 }
 0x1d4   : > { %7705 = vmatprep.subr.bf16.mxu0 %v8716_v0  ;;  %7741 = vmatprep.subr.bf16.mxu1 %v8716_v0 }
 0x1d6   : > { %6928 = vmatmul.mubr.msk.f32.vlgmr.msra.gmra.mrb[8].mxu1 %vm1112_vm2, %v9184_v46  ;;  %6871 = vmatmul.mubr.msk.f32.vlgmr.msra.gmra.mrb[6].mxu0 %vm1112_vm2, %v9212_v55 }
 0x1d7   : > { %7707 = vmatpush3.bf16.msra.mxu0 %v9264_v13  ;;  %7743 = vmatpush3.bf16.msra.mxu1 %v9266_v15 }
 0x1d8   : > { %7708 = vmatprep.subr.bf16.mxu0 %v8716_v0  ;;  %7744 = vmatprep.subr.bf16.mxu1 %v8716_v0 }
 0x1d9   : > { %6946 = vmatprep.mubr.msk.f32.mxu1 %vm8717_vm0, %v8718_v1  ;;  %6889 = vmatprep.mubr.msk.f32.mxu0 %vm8717_vm0, %v8718_v1 }
 0x1db   : > { %7710 = vmatpush3.bf16.msra.mxu0 %v9288_v23  ;;  %7746 = vmatpush3.bf16.msra.mxu1 %v9290_v24 }
 0x1dc   : > { %7711 = vmatprep.subr.bf16.mxu0 %v8716_v0  ;;  %7747 = vmatprep.subr.bf16.mxu1 %v8716_v0 }
 0x1df   : > { %7713 = vmatpush3.bf16.msra.mxu0 %v9312_v31  ;;  %7749 = vmatpush3.bf16.msra.mxu1 %v9314_v32 }
 0x1e0   : > { %7714 = vmatprep.subr.bf16.mxu0 %v8716_v0  ;;  %7750 = vmatprep.subr.bf16.mxu1 %v8716_v0 }
 0x1e3   : > { %7716 = vmatpush3.bf16.msra.mxu0 %v9332_v41  ;;  %7752 = vmatpush3.bf16.msra.mxu1 %v9334_v42 }
 0x1e4   : > { %7717 = vmatprep.subr.bf16.mxu0 %v8716_v0  ;;  %7753 = vmatprep.subr.bf16.mxu1 %v8716_v0 }
 0x1e6   : > { %6947 = vmatmul.mubr.msk.f32.vlgmr.msra.gmra.mrb[8].mxu1 %vm1112_vm2, %v9182_v45  ;;  %6890 = vmatmul.mubr.msk.f32.vlgmr.msra.gmra.mrb[6].mxu0 %vm1112_vm2, %v9216_v56  ;;  %v6182_v45 = vld [vmem:[%s10458_s2 + $0x128] sm:$0xff] }
 0x1e7   : > { %7719 = vmatpush3.bf16.msra.mxu0 %v9352_v51  ;;  %7755 = vmatpush3.bf16.msra.mxu1 %v9354_v52  ;;  %v9400_v8 = vpack.c.bf16 %v6182_v45, %v6181_v63  ;;  %v6229_v63 = vld [vmem:[%s10458_s2 + $0x278] sm:$0xff] }
 0x1e8   : > { %7720 = vmatprep.subr.bf16.mxu0 %v8716_v0  ;;  %7756 = vmatprep.subr.bf16.mxu1 %v8716_v0  ;;  %v9534_v45 = vpack.c.bf16 %v6229_v63, %v6228_v60  ;;  %v2931_v63 = vld [vmem:[%s10461_s5 + $0x20] sm:$0xff] }
 0x1e9   : > { %6908 = vmatprep.mubr.msk.f32.mxu0 %vm8717_vm0, %v8718_v1  ;;  %6965 = vmatprep.mubr.msk.f32.mxu1 %vm8717_vm0, %v8718_v1 }
 0x1eb   : > { %7722 = vmatpush3.bf16.msra.mxu0 %v9376_v61  ;;  %7758 = vmatpush3.bf16.msra.mxu1 %v9378_v62 }
 0x1ec   : > { %7723 = vmatprep.subr.bf16.mxu0 %v8716_v0  ;;  %7759 = vmatprep.subr.bf16.mxu1 %v8716_v0 }
 0x1ef   : > { %7725 = vmatpush3.bf16.msra.mxu0 %v9400_v8  ;;  %7761 = vmatpush3.bf16.msra.mxu1 %v9402_v9 }
 0x1f0   : > { %7726 = vmatprep.subr.bf16.mxu0 %v8716_v0  ;;  %7762 = vmatprep.subr.bf16.mxu1 %v8716_v0 }
 0x1f3   : > { %7728 = vmatpush3.bf16.msra.mxu0 %v9420_v18  ;;  %7764 = vmatpush3.bf16.msra.mxu1 %v9422_v19 }
 0x1f4   : > { %7765 = vmatprep.subr.bf16.mxu1 %v8716_v0  ;;  %7789 = vmatprep.subr.bf16.mxu0 %v8716_v0 }
 0x1f6   : > { %6909 = vmatmul.mubr.msk.f32.vlgmr.msra.gmra.mrb[6].mxu0 %vm1112_vm2, %v9238_v3  ;;  %6966 = vmatmul.mubr.msk.f32.vlgmr.msra.gmra.mrb[8].mxu1 %vm1112_vm2, %v9212_v55 }
 0x1f7   : > { %7767 = vmatpush3.bf16.msra.mxu1 %v9434_v26  ;;  %7791 = vmatpush3.bf16.msra.mxu0 %v9078_v16  ;;  %v9466_v16 = vpack.c.bf16 %v6218_v37, %v6217_v36  ;;  %v9734_v36 = vpack.c.bf16 %v6280_v30, %v6279_v29  ;;  %v2927_v37 = vld [vmem:[%s10461_s5] sm:$0xff]  ;;  %v6289_v29 = vld [vmem:[%s10461_s5 + $0x170] sm:$0xff]  ;;  %v6290_v30 = vld [vmem:[%s10461_s5 + $0x178] sm:$0xff] }
 0x1f8   : > { %7768 = vmatprep.subr.bf16.mxu1 %v8716_v0  ;;  %7792 = vmatprep.subr.bf16.mxu0 %v8716_v0 }
 0x1f9   : > { %6984 = vmatprep.mubr.msk.f32.mxu1 %vm8717_vm0, %v8718_v1  ;;  %7022 = vmatprep.mubr.msk.f32.mxu0 %vm8717_vm0, %v8718_v1 }
 0x1fb   : > { %7770 = vmatpush3.bf16.msra.mxu1 %v9450_v35  ;;  %7794 = vmatpush3.bf16.msra.mxu0 %v9103_v22  ;;  %v6222_v22 = vld [vmem:[%s10458_s2 + $0x240] sm:$0xff] }
 0x1fc   : > { %7771 = vmatprep.subr.bf16.mxu1 %v8716_v0  ;;  %7795 = vmatprep.subr.bf16.mxu0 %v8716_v0  ;;  %v9490_v48 = vpack.c.bf16 %v6223_v47, %v6222_v22  ;;  %v9756_v22 = vpack.c.bf16 %v6266_v43, %v6265_v38  ;;  %v2929_v47 = vld [vmem:[%s10461_s5 + $0x10] sm:$0xff] }
 0x1ff   : > { %7773 = vmatpush3.bf16.msra.mxu1 %v9466_v16  ;;  %7797 = vmatpush3.bf16.msra.mxu0 %v9127_v28  ;;  %v6224_v28 = vld [vmem:[%s10458_s2 + $0x250] sm:$0xff] }
 0x200   : > { %7774 = vmatprep.subr.bf16.mxu1 %v8716_v0  ;;  %7798 = vmatprep.subr.bf16.mxu0 %v8716_v0 }
 0x203   : > { %7776 = vmatpush3.bf16.msra.mxu1 %v9478_v44  ;;  %7800 = vmatpush3.bf16.msra.mxu0 %v9147_v34  ;;  %v9506_v34 = vpack.c.bf16 %v6225_v53, %v6224_v28  ;;  %v6267_v28 = vld [vmem:[%s10461_s5 + $0xd0] sm:$0xff]  ;;  %v6268_v53 = vld [vmem:[%s10461_s5 + $0xd8] sm:$0xff] }
 0x204   : > { %7777 = vmatprep.subr.bf16.mxu1 %v8716_v0  ;;  %7801 = vmatprep.subr.bf16.mxu0 %v8716_v0  ;;  %v9780_v60 = vpack.c.bf16 %v6268_v53, %v6267_v28  ;;  %v3928_v28 = vld [vmem:[#allocation10 + $0x2] sm:$0x3]  ;;  %v3848_v53 = vld [vmem:[#allocation10] sm:$0x3] }
 0x206   : > { %6985 = vmatmul.mubr.msk.f32.vlgmr.msra.gmra.mrb[8].mxu1 %vm1112_vm2, %v9216_v56  ;;  %7023 = vmatmul.mubr.msk.f32.vlgmr.msra.gmra.mrb[8].mxu0 %vm1112_vm2, %v9212_v55 }
 0x207   : > { %7779 = vmatpush3.bf16.msra.mxu1 %v9490_v48  ;;  %7803 = vmatpush3.bf16.msra.mxu0 %v9074_v14  ;;  %v9522_v14 = vpack.c.bf16 %v6227_v57, %v6226_v54 }
 0x208   : > { %7780 = vmatprep.subr.bf16.mxu1 %v8716_v0  ;;  %7804 = vmatprep.subr.bf16.mxu0 %v8716_v0 }
 0x209   : > { %7003 = vmatprep.mubr.msk.f32.mxu1 %vm8717_vm0, %v8718_v1  ;;  %7041 = vmatprep.mubr.msk.f32.mxu0 %vm8717_vm0, %v8718_v1 }
 0x20b   : > { %7782 = vmatpush3.bf16.msra.mxu1 %v9506_v34  ;;  %7806 = vmatpush3.bf16.msra.mxu0 %v9099_v21 }
 0x20c   : > { %7783 = vmatprep.subr.bf16.mxu1 %v8716_v0  ;;  %7807 = vmatprep.subr.bf16.mxu0 %v8716_v0 }
 0x20f   : > { %7785 = vmatpush3.bf16.msra.mxu1 %v9522_v14  ;;  %7809 = vmatpush3.bf16.msra.mxu0 %v9123_v27 }
 0x210   : > { %7786 = vmatprep.subr.bf16.mxu1 %v8716_v0  ;;  %7810 = vmatprep.subr.bf16.mxu0 %v8716_v0 }
 0x213   : > { %7788 = vmatpush3.bf16.msra.mxu1 %v9534_v45  ;;  %7812 = vmatpush3.bf16.msra.mxu0 %v9143_v33 }
 0x214   : > { %7813 = vmatprep.subr.bf16.mxu0 %v8716_v0  ;;  %7849 = vmatprep.subr.bf16.mxu1 %v8716_v0 }
 0x216   : > { %7004 = vmatmul.mubr.msk.f32.vlgmr.msra.gmra.mrb[8].mxu1 %vm1112_vm2, %v9238_v3  ;;  %7042 = vmatmul.mubr.msk.f32.vlgmr.msra.gmra.mrb[8].mxu0 %vm1112_vm2, %v9184_v46 }
 0x217   : > { %7815 = vmatpush3.bf16.msra.mxu0 %v9166_v39  ;;  %7851 = vmatpush3.bf16.msra.mxu1 %v9168_v40 }
 0x218   : > { %7816 = vmatprep.subr.bf16.mxu0 %v8716_v0  ;;  %7852 = vmatprep.subr.bf16.mxu1 %v8716_v0 }
 0x219   : > { %7060 = vmatprep.mubr.msk.f32.mxu0 %vm8717_vm0, %v8718_v1  ;;  %7117 = vmatprep.mubr.msk.f32.mxu1 %vm8717_vm0, %v8718_v1 }
 0x21b   : > { %7818 = vmatpush3.bf16.msra.mxu0 %v9192_v49  ;;  %7854 = vmatpush3.bf16.msra.mxu1 %v9194_v50 }
 0x21c   : > { %7819 = vmatprep.subr.bf16.mxu0 %v8716_v0  ;;  %7855 = vmatprep.subr.bf16.mxu1 %v8716_v0 }
 0x21f   : > { %7821 = vmatpush3.bf16.msra.mxu0 %v9220_v58  ;;  %7857 = vmatpush3.bf16.msra.mxu1 %v9222_v59 }
 0x220   : > { %7822 = vmatprep.subr.bf16.mxu0 %v8716_v0  ;;  %7858 = vmatprep.subr.bf16.mxu1 %v8716_v0 }
 0x223   : > { %7824 = vmatpush3.bf16.msra.mxu0 %v9244_v6  ;;  %7860 = vmatpush3.bf16.msra.mxu1 %v9246_v7 }
 0x224   : > { %7825 = vmatprep.subr.bf16.mxu0 %v8716_v0  ;;  %7861 = vmatprep.subr.bf16.mxu1 %v8716_v0 }
 0x226   : > { %7061 = vmatmul.mubr.msk.f32.vlgmr.msra.gmra.mrb[8].mxu0 %vm1112_vm2, %v9216_v56  ;;  %7118 = vmatmul.mubr.msk.f32.vlgmr.msra.gmra.mrb[10].mxu1 %vm1112_vm2, %v9212_v55 }
 0x227   : > { %7827 = vmatpush3.bf16.msra.mxu0 %v9264_v13  ;;  %7863 = vmatpush3.bf16.msra.mxu1 %v9266_v15  ;;  %v2703_v15 = vld [vmem:[#allocation7 + $0x4] sm:$0xf] }
 0x228   : > { %7828 = vmatprep.subr.bf16.mxu0 %v8716_v0  ;;  %7864 = vmatprep.subr.bf16.mxu1 %v8716_v0 }
 0x229   : > { %7079 = vmatprep.mubr.msk.f32.mxu0 %vm8717_vm0, %v8718_v1  ;;  %7136 = vmatprep.mubr.msk.f32.mxu1 %vm8717_vm0, %v8718_v1 }
 0x22b   : > { %7830 = vmatpush3.bf16.msra.mxu0 %v9288_v23  ;;  %7866 = vmatpush3.bf16.msra.mxu1 %v9290_v24  ;;  %v2627_v23 = vld [vmem:[#allocation7] sm:$0xf]  ;;  %v6246_v24 = vld [vmem:[%s10461_s5 + $0x40] sm:$0xff] }
 0x22c   : > { %7831 = vmatprep.subr.bf16.mxu0 %v8716_v0  ;;  %7867 = vmatprep.subr.bf16.mxu1 %v8716_v0 }
 0x22f   : > { %7833 = vmatpush3.bf16.msra.mxu0 %v9312_v31  ;;  %7869 = vmatpush3.bf16.msra.mxu1 %v9314_v32  ;;  %v6247_v31 = vld [vmem:[%s10461_s5 + $0x48] sm:$0xff]  ;;  %v6273_v32 = vld [vmem:[%s10461_s5 + $0x100] sm:$0xff] }
 0x230   : > { %7834 = vmatprep.subr.bf16.mxu0 %v8716_v0  ;;  %7870 = vmatprep.subr.bf16.mxu1 %v8716_v0 }
 0x233   : > { %7836 = vmatpush3.bf16.msra.mxu0 %v9332_v41  ;;  %7872 = vmatpush3.bf16.msra.mxu1 %v9334_v42  ;;  %v6274_v41 = vld [vmem:[%s10461_s5 + $0x108] sm:$0xff]  ;;  %v2853_v42 = vld [vmem:[#allocation7 + $0xc] sm:$0xf] }
 0x234   : > { %7837 = vmatprep.subr.bf16.mxu0 %v8716_v0  ;;  %7873 = vmatprep.subr.bf16.mxu1 %v8716_v0 }
 0x236   : > { %7080 = vmatmul.mubr.msk.f32.vlgmr.msra.gmra.mrb[8].mxu0 %vm1112_vm2, %v9238_v3  ;;  %7137 = vmatmul.mubr.msk.f32.vlgmr.msra.gmra.mrb[10].mxu1 %vm1112_vm2, %v9184_v46 }
 0x237   : > { %7839 = vmatpush3.bf16.msra.mxu0 %v9352_v51  ;;  %7875 = vmatpush3.bf16.msra.mxu1 %v9354_v52  ;;  %v2778_v51 = vld [vmem:[#allocation7 + $0x8] sm:$0xf]  ;;  %v9662_v52 = vpack.c.bf16 %v6247_v31, %v6246_v24 }
 0x238   : > { %7840 = vmatprep.subr.bf16.mxu0 %v8716_v0  ;;  %7876 = vmatprep.subr.bf16.mxu1 %v8716_v0 }
 0x239   : > { %7098 = vmatprep.mubr.msk.f32.mxu0 %vm8717_vm0, %v8718_v1  ;;  %7155 = vmatprep.mubr.msk.f32.mxu1 %vm8717_vm0, %v8718_v1 }
 0x23b   : > { %7842 = vmatpush3.bf16.msra.mxu0 %v9376_v61  ;;  %7878 = vmatpush3.bf16.msra.mxu1 %v9378_v62  ;;  %v9664_v61 = vpack.c.bf16 %v6274_v41, %v6273_v32  ;;  %v6248_v62 = vld [vmem:[%s10461_s5 + $0x50] sm:$0xff]  ;;  %v6259_v41 = vld [vmem:[%s10461_s5 + $0x98] sm:$0xff] }
 0x23c   : > { %7843 = vmatprep.subr.bf16.mxu0 %v8716_v0  ;;  %7879 = vmatprep.subr.bf16.mxu1 %v8716_v0  ;;  %v6258_v32 = vld [vmem:[%s10461_s5 + $0x90] sm:$0xff] }
 0x23f   : > { %7845 = vmatpush3.bf16.msra.mxu0 %v9400_v8  ;;  %7881 = vmatpush3.bf16.msra.mxu1 %v9402_v9  ;;  %v6276_v8 = vld [vmem:[%s10461_s5 + $0x118] sm:$0xff]  ;;  %v9688_v9 = vpack.c.bf16 %v6249_v2, %v6248_v62  ;;  %v9868_v62 = vpack.c.bf16 %v6259_v41, %v6258_v32 }
 0x240   : > { %7846 = vmatprep.subr.bf16.mxu0 %v8716_v0  ;;  %7882 = vmatprep.subr.bf16.mxu1 %v8716_v0  ;;  %v9690_v10 = vpack.c.bf16 %v6276_v8, %v6275_v4  ;;  %v6260_v4 = vld [vmem:[%s10461_s5 + $0xa0] sm:$0xff]  ;;  %v6261_v8 = vld [vmem:[%s10461_s5 + $0xa8] sm:$0xff] }
 0x243   : > { %7848 = vmatpush3.bf16.msra.mxu0 %v9420_v18  ;;  %7884 = vmatpush3.bf16.msra.mxu1 %v9422_v19  ;;  %v6278_v18 = vld [vmem:[%s10461_s5 + $0x128] sm:$0xff]  ;;  %v9712_v19 = vpack.c.bf16 %v6251_v12, %v6250_v11  ;;  %v6287_v11 = vld [vmem:[%s10461_s5 + $0x160] sm:$0xff] }
 0x244   : > { %7885 = vmatprep.subr.bf16.mxu1 %v8716_v0  ;;  %7196 = vmatprep.subr.mxu0 %v8718_v1  ;;  %v9714_v20 = vpack.c.bf16 %v6278_v18, %v6277_v17  ;;  %v6288_v12 = vld [vmem:[%s10461_s5 + $0x168] sm:$0xff]  ;;  %v9892_v17 = vpack.c.bf16 %v6261_v8, %v6260_v4 }
 0x245   : > { %v9894_v18 = vpack.c.bf16 %v6288_v12, %v6287_v11 }
 0x246   : > { %7099 = vmatmul.mubr.msk.f32.vlgmr.msra.gmra.mrb[8].mxu0 %vm1112_vm2, %v9240_v5  ;;  %7156 = vmatmul.mubr.msk.f32.vlgmr.msra.gmra.mrb[10].mxu1 %vm1112_vm2, %v9216_v56 }
 0x247   : > { %7887 = vmatpush3.bf16.msra.mxu1 %v9434_v26  ;;  %7174 = vmatprep.mubr.msk.f32.mxu1 %vm8717_vm0, %v8718_v1  ;;  %v6253_v26 = vld [vmem:[%s10461_s5 + $0x78] sm:$0xff] }
 0x248   : > { %7888 = vmatprep.subr.bf16.mxu1 %v8716_v0  ;;  %7198 = vmatprep.mubr.msk.f32.mxu0 %vm8717_vm0, %v8718_v1 }
 0x24b   : > { %7890 = vmatpush3.bf16.msra.mxu1 %v9450_v35  ;;  %v9732_v35 = vpack.c.bf16 %v6253_v26, %v6252_v25  ;;  %v6262_v25 = vld [vmem:[%s10461_s5 + $0xb0] sm:$0xff]  ;;  %v6263_v26 = vld [vmem:[%s10461_s5 + $0xb8] sm:$0xff] }
 0x24c   : > { %7891 = vmatprep.subr.bf16.mxu1 %v8716_v0 }
 0x24f   : > { %7893 = vmatpush3.bf16.msra.mxu1 %v9466_v16  ;;  %v2928_v16 = vld [vmem:[%s10461_s5 + $0x8] sm:$0xff] }
 0x250   : > { %7894 = vmatprep.subr.bf16.mxu1 %v8716_v0 }
 0x253   : > { %7896 = vmatpush3.bf16.msra.mxu1 %v9478_v44  ;;  %v9754_v44 = vpack.c.bf16 %v2928_v16, %v2927_v37  ;;  %v9912_v37 = vpack.c.bf16 %v6263_v26, %v6262_v25  ;;  %v9914_v16 = vpack.c.bf16 %v6290_v30, %v6289_v29  ;;  %v6316_v26 = vld [vmem:[%s10464_s8 + $0x58] sm:$0xff]  ;;  %v6330_v29 = vld [vmem:[%s10464_s8 + $0xb0] sm:$0xff] }
 0x254   : > { %7897 = vmatprep.subr.bf16.mxu1 %v8716_v0  ;;  %v6331_v30 = vld [vmem:[%s10464_s8 + $0xb8] sm:$0xff] }
 0x256   : > { %7175 = vmatmul.mubr.msk.f32.vlgmr.msra.gmra.mrb[10].mxu1 %vm1112_vm2, %v9238_v3  ;;  %v6241_v3 = vld [vmem:[#allocation5] ss:$0 sm:$0xff] }
 0x257   : > { %7899 = vmatpush3.bf16.msra.mxu1 %v9490_v48  ;;  %7193 = vmatprep.mubr.msk.f32.mxu1 %vm8717_vm0, %v8718_v1  ;;  %v2930_v48 = vld [vmem:[%s10461_s5 + $0x18] sm:$0xff] }
 0x258   : > { %7900 = vmatprep.subr.bf16.mxu1 %v8716_v0 }
 0x25b   : > { %7902 = vmatpush3.bf16.msra.mxu1 %v9506_v34 }
 0x25c   : > { %7903 = vmatprep.subr.bf16.mxu1 %v8716_v0 }
 0x25f   : > { %7905 = vmatpush3.bf16.msra.mxu1 %v9522_v14  ;;  %v9778_v14 = vpack.c.bf16 %v2930_v48, %v2929_v47 }
 0x260   : > { %7906 = vmatprep.subr.bf16.mxu1 %v8716_v0 }
 0x263   : > { %7908 = vmatpush3.bf16.msra.mxu1 %v9534_v45 }
 0x264   : > { %7201 = vmatprep.subr.mxu1 %v8718_v1 }
 0x266   : > { %7194 = vmatmul.mubr.msk.f32.vlgmr.msra.gmra.mrb[10].mxu1 %vm1112_vm2, %v9240_v5 }
 0x267   : > { %7203 = vmatprep.mubr.msk.f32.mxu1 %vm8717_vm0, %v8718_v1 }
 0x299   : > { %v1182_v21 = vpop.f32.mrb[6].mxu1 }
 0x29a   : > { %v6834_v27 = vpop.f32.mrb[7].mxu1 }
 0x29b   : > { %v6269_v27 = vld [vmem:[%s10461_s5 + $0xe0] sm:$0xff] }
 0x2c9   : > { %v1503_v33 = vpop.f32.mrb[6].mxu0 }
 0x2ca   : > { %v8213_v39 = vadd.f32 %v1503_v33, %v1182_v21  ;;  %v6910_v40 = vpop.f32.mrb[7].mxu0  ;;  %v2932_v21 = vld [vmem:[%s10461_s5 + $0x28] sm:$0xff] }
 0x2cb   : > { %v6270_v33 = vld [vmem:[%s10461_s5 + $0xe8] sm:$0xff] }
 0x2e9   : > { %v1901_v46 = vpop.f32.mrb[8].mxu1 }
 0x2ea   : > { %v1906_v49 = vmax.f32 %v8213_v39, %v1901_v46  ;;  %v7005_v50 = vpop.f32.mrb[9].mxu1 }
 0x2eb   : > { %v9808_v50 = vpack.c.bf16 %v6270_v33, %v6269_v27  ;;  %v6309_v27 = vld [vmem:[%s10464_s8 + $0x30] sm:$0xff]  ;;  %v6310_v33 = vld [vmem:[%s10464_s8 + $0x38] sm:$0xff] }
 0x319   : > { %v2258_v55 = vpop.f32.mrb[8].mxu0 }
 0x31a   : > { %v2263_v56 = vmax.f32 %v1906_v49, %v2258_v55  ;;  %v7100_v58 = vpop.f32.mrb[9].mxu0  ;;  %v9806_v49 = vpack.c.bf16 %v2932_v21, %v2931_v63  ;;  %v2933_v55 = vld [vmem:[%s10461_s5 + $0x30] sm:$0xff]  ;;  %v4003_v63 = vld [vmem:[#allocation10 + $0x4] sm:$0x3] }
 0x31b   : > { %v2934_v58 = vld [vmem:[%s10461_s5 + $0x38] sm:$0xff] }
 0x339   : > { %v2612_v59 = vpop.f32.mrb[10].mxu1 }
 0x33a   : > { %v2617_v6 = vmax.f32 %v2263_v56, %v2612_v59  ;;  %v7195_v7 = vpop.f32.mrb[11].mxu1  ;;  %v6271_v59 = vld [vmem:[%s10461_s5 + $0xf0] sm:$0xff] }
 0x33c   : > { %v2625_v13 = vadd.f32 %v6241_v3, %v2617_v6  ;;  %v6272_v3 = vld [vmem:[%s10461_s5 + $0xf8] sm:$0xff]  ;;  %v9826_v6 = vpack.c.bf16 %v2934_v58, %v2933_v55  ;;  %v4153_v55 = vld [vmem:[%s10464_s8 + $0x8] sm:$0xff] }
 0x33d   : > { %v9828_v7 = vpack.c.bf16 %v6272_v3, %v6271_v59  ;;  %v6319_v58 = vld [vmem:[%s10464_s8 + $0x68] sm:$0xff] }
 0x33e   : > { %v2626_v5 = vmax.f32 %v2625_v13, 0.0  ;;  %v6256_v13 = vld [vmem:[%s10461_s5 + $0x80] sm:$0xff] }
 0x340   : > { %7197 = vmatpush3.msra.mxu0 %v2626_v5  ;;  %7202 = vmatpush3.msra.mxu1 %v2626_v5 }
 0x341   : > { %7204 = vmatmul.mubr.msk.f32.vlgmr.msra.gmra.mrb[12].mxu1 %vm2628_vm3, %v2703_v15  ;;  %7206 = vmatprep.subr.mxu0 %v8718_v1  ;;  %v6283_v15 = vld [vmem:[%s10461_s5 + $0x140] sm:$0xff] }
 0x342   : > { %7211 = vmatprep.subr.mxu1 %v8718_v1  ;;  %7199 = vmatmul.mubr.msk.f32.vlgmr.msra.gmra.mrb[10].mxu0 %vm2628_vm3, %v2627_v23  ;;  %v6284_v23 = vld [vmem:[%s10461_s5 + $0x148] sm:$0xff] }
 0x343   : > { %7207 = vmatpush3.msra.mxu0 %v2626_v5  ;;  %7212 = vmatpush3.msra.mxu1 %v2626_v5  ;;  %v6257_v5 = vld [vmem:[%s10461_s5 + $0x88] sm:$0xff]  ;;  %v9848_v31 = vpack.c.bf16 %v6284_v23, %v6283_v15 }
 0x344   : > { %7208 = vmatprep.mubr.msk.f32.mxu0 %vm8717_vm0, %v8718_v1  ;;  %7213 = vmatprep.mubr.msk.f32.mxu1 %vm8717_vm0, %v8718_v1  ;;  %v9846_v24 = vpack.c.bf16 %v6257_v5, %v6256_v13  ;;  %v6320_v13 = vld [vmem:[%s10464_s8 + $0x70] sm:$0xff]  ;;  %v6321_v5 = vld [vmem:[%s10464_s8 + $0x78] sm:$0xff] }
 0x345   : > { %7214 = vmatmul.mubr.msk.f32.vlgmr.msra.gmra.mrb[14].mxu1 %vm2628_vm3, %v2853_v42  ;;  %7909 = vmatprep.subr.bf16.mxu0 %v8716_v0  ;;  %v6285_v42 = vld [vmem:[%s10461_s5 + $0x150] sm:$0xff]  ;;  %v8081_v32 = vpack.c.bf16 %v6321_v5, %v6320_v13 }
 0x346   : > { %7209 = vmatmul.mubr.msk.f32.vlgmr.msra.gmra.mrb[12].mxu0 %vm2628_vm3, %v2778_v51  ;;  %7945 = vmatprep.subr.bf16.mxu1 %v8716_v0  ;;  %v6286_v51 = vld [vmem:[%s10461_s5 + $0x158] sm:$0xff] }
 0x347   : > { %7911 = vmatpush3.bf16.msra.mxu0 %v9662_v52  ;;  %7947 = vmatpush3.bf16.msra.mxu1 %v9664_v61  ;;  %v9870_v2 = vpack.c.bf16 %v6286_v51, %v6285_v42  ;;  %v6313_v42 = vld [vmem:[%s10464_s8 + $0x40] sm:$0xff]  ;;  %v6314_v51 = vld [vmem:[%s10464_s8 + $0x48] sm:$0xff] }
 0x348   : > { %7912 = vmatprep.subr.bf16.mxu0 %v8716_v0  ;;  %7948 = vmatprep.subr.bf16.mxu1 %v8716_v0  ;;  %v8066_v12 = vpack.c.bf16 %v6314_v51, %v6313_v42 }
 0x349   : > { %7232 = vmatprep.mubr.msk.f32.mxu0 %vm8717_vm0, %v8718_v1  ;;  %7289 = vmatprep.mubr.msk.f32.mxu1 %vm8717_vm0, %v8718_v1 }
 0x34b   : > { %7914 = vmatpush3.bf16.msra.mxu0 %v9688_v9  ;;  %7950 = vmatpush3.bf16.msra.mxu1 %v9690_v10 }
 0x34c   : > { %7915 = vmatprep.subr.bf16.mxu0 %v8716_v0  ;;  %7951 = vmatprep.subr.bf16.mxu1 %v8716_v0 }
 0x34f   : > { %7917 = vmatpush3.bf16.msra.mxu0 %v9712_v19  ;;  %7953 = vmatpush3.bf16.msra.mxu1 %v9714_v20 }
 0x350   : > { %7918 = vmatprep.subr.bf16.mxu0 %v8716_v0  ;;  %7954 = vmatprep.subr.bf16.mxu1 %v8716_v0 }
 0x353   : > { %7920 = vmatpush3.bf16.msra.mxu0 %v9732_v35  ;;  %7956 = vmatpush3.bf16.msra.mxu1 %v9734_v36 }
 0x354   : > { %7921 = vmatprep.subr.bf16.mxu0 %v8716_v0  ;;  %7957 = vmatprep.subr.bf16.mxu1 %v8716_v0 }
 0x414   : > { %v9770_v34 = vpop.f32.mrb[12].mxu1 }
 0x415   : > { %v7205_v54 = vpop.f32.mrb[13].mxu1  ;;  %7233 = vmatmul.mubr.msk.f32.vlgmr.msra.gmra.mrb[14].mxu0 %vm1112_vm2, %v9770_v34  ;;  %7290 = vmatmul.mubr.msk.f32.vlgmr.msra.gmra.mrb[16].mxu1 %vm1112_vm2, %v9770_v34  ;;  %v2698_v57 = vpop.f32.mrb[10].mxu0 }
 0x416   : > { %7923 = vmatpush3.bf16.msra.mxu0 %v9754_v44  ;;  %7959 = vmatpush3.bf16.msra.mxu1 %v9756_v22  ;;  %v7200_v45 = vpop.f32.mrb[11].mxu0  ;;  %v6308_v54 = vld [vmem:[%s10464_s8 + $0x28] sm:$0xff] }
 0x417   : > { %7924 = vmatprep.subr.bf16.mxu0 %v8716_v0  ;;  %7960 = vmatprep.subr.bf16.mxu1 %v8716_v0 }
 0x418   : > { %7251 = vmatprep.mubr.msk.f32.mxu0 %vm8717_vm0, %v8718_v1  ;;  %7308 = vmatprep.mubr.msk.f32.mxu1 %vm8717_vm0, %v8718_v1  ;;  %v9800_v39 = vpop.f32.mrb[14].mxu1 }
 0x419   : > { %v9802_v40 = vpop.f32.mrb[12].mxu0  ;;  %v7215_v46 = vpop.f32.mrb[15].mxu1 }
 0x41a   : > { %7926 = vmatpush3.bf16.msra.mxu0 %v9778_v14  ;;  %7962 = vmatpush3.bf16.msra.mxu1 %v9780_v60  ;;  %v7210_v56 = vpop.f32.mrb[13].mxu0  ;;  %v10048_v46 = vpack.c.bf16 %v6310_v33, %v6309_v27 }
 0x41b   : > { %7927 = vmatprep.subr.bf16.mxu0 %v8716_v0  ;;  %7963 = vmatprep.subr.bf16.mxu1 %v8716_v0  ;;  %v6318_v56 = vld [vmem:[%s10464_s8 + $0x60] sm:$0xff] }
 0x41c   : > { %v10076_v3 = vpack.c.bf16 %v6319_v58, %v6318_v56 }
 0x41e   : > { %7929 = vmatpush3.bf16.msra.mxu0 %v9806_v49  ;;  %7965 = vmatpush3.bf16.msra.mxu1 %v9808_v50 }
 0x41f   : > { %7930 = vmatprep.subr.bf16.mxu0 %v8716_v0  ;;  %7966 = vmatprep.subr.bf16.mxu1 %v8716_v0 }
 0x422   : > { %7932 = vmatpush3.bf16.msra.mxu0 %v9826_v6  ;;  %7968 = vmatpush3.bf16.msra.mxu1 %v9828_v7 }
 0x423   : > { %7933 = vmatprep.subr.bf16.mxu0 %v8716_v0  ;;  %7969 = vmatprep.subr.bf16.mxu1 %v8716_v0 }
 0x425   : > { %7252 = vmatmul.mubr.msk.f32.vlgmr.msra.gmra.mrb[14].mxu0 %vm1112_vm2, %v2698_v57  ;;  %7309 = vmatmul.mubr.msk.f32.vlgmr.msra.gmra.mrb[16].mxu1 %vm1112_vm2, %v2698_v57  ;;  %v6322_v57 = vld [vmem:[%s10464_s8 + $0x80] sm:$0xff] }
 0x426   : > { %7935 = vmatpush3.bf16.msra.mxu0 %v9846_v24  ;;  %7971 = vmatpush3.bf16.msra.mxu1 %v9848_v31 }
 0x427   : > { %7936 = vmatprep.subr.bf16.mxu0 %v8716_v0  ;;  %7972 = vmatprep.subr.bf16.mxu1 %v8716_v0 }
 0x428   : > { %7270 = vmatprep.mubr.msk.f32.mxu0 %vm8717_vm0, %v8718_v1  ;;  %7327 = vmatprep.mubr.msk.f32.mxu1 %vm8717_vm0, %v8718_v1 }
 0x42a   : > { %7938 = vmatpush3.bf16.msra.mxu0 %v9868_v62  ;;  %7974 = vmatpush3.bf16.msra.mxu1 %v9870_v2 }
 0x42b   : > { %7939 = vmatprep.subr.bf16.mxu0 %v8716_v0  ;;  %7975 = vmatprep.subr.bf16.mxu1 %v8716_v0 }
 0x42e   : > { %7941 = vmatpush3.bf16.msra.mxu0 %v9892_v17  ;;  %7977 = vmatpush3.bf16.msra.mxu1 %v9894_v18 }
 0x42f   : > { %7942 = vmatprep.subr.bf16.mxu0 %v8716_v0  ;;  %7978 = vmatprep.subr.bf16.mxu1 %v8716_v0 }
 0x432   : > { %7944 = vmatpush3.bf16.msra.mxu0 %v9912_v37  ;;  %7980 = vmatpush3.bf16.msra.mxu1 %v9914_v16 }
 0x433   : > { %7981 = vmatprep.subr.bf16.mxu0 %v8716_v0  ;;  %8017 = vmatprep.subr.bf16.mxu1 %v8716_v0 }
 0x435   : > { %7271 = vmatmul.mubr.msk.f32.vlgmr.msra.gmra.mrb[14].mxu0 %vm1112_vm2, %v9802_v40  ;;  %7328 = vmatmul.mubr.msk.f32.vlgmr.msra.gmra.mrb[16].mxu1 %vm1112_vm2, %v9802_v40 }
 0x436   : > { %7983 = vmatpush3.bf16.msra.mxu0 %v9662_v52  ;;  %8019 = vmatpush3.bf16.msra.mxu1 %v9664_v61 }
 0x437   : > { %7984 = vmatprep.subr.bf16.mxu0 %v8716_v0  ;;  %8020 = vmatprep.subr.bf16.mxu1 %v8716_v0 }
 0x438   : > { %7346 = vmatprep.mubr.msk.f32.mxu0 %vm8717_vm0, %v8718_v1  ;;  %7403 = vmatprep.mubr.msk.f32.mxu1 %vm8717_vm0, %v8718_v1 }
 0x43a   : > { %7986 = vmatpush3.bf16.msra.mxu0 %v9688_v9  ;;  %8022 = vmatpush3.bf16.msra.mxu1 %v9690_v10 }
 0x43b   : > { %7987 = vmatprep.subr.bf16.mxu0 %v8716_v0  ;;  %8023 = vmatprep.subr.bf16.mxu1 %v8716_v0 }
 0x43e   : > { %7989 = vmatpush3.bf16.msra.mxu0 %v9712_v19  ;;  %8025 = vmatpush3.bf16.msra.mxu1 %v9714_v20 }
 0x43f   : > { %7990 = vmatprep.subr.bf16.mxu0 %v8716_v0  ;;  %8026 = vmatprep.subr.bf16.mxu1 %v8716_v0 }
 0x442   : > { %7992 = vmatpush3.bf16.msra.mxu0 %v9732_v35  ;;  %8028 = vmatpush3.bf16.msra.mxu1 %v9734_v36 }
 0x443   : > { %7993 = vmatprep.subr.bf16.mxu0 %v8716_v0  ;;  %8029 = vmatprep.subr.bf16.mxu1 %v8716_v0 }
 0x445   : > { %7347 = vmatmul.mubr.msk.f32.vlgmr.msra.gmra.mrb[16].mxu0 %vm1112_vm2, %v9802_v40  ;;  %7404 = vmatmul.mubr.msk.f32.vlgmr.msra.gmra.mrb[18].mxu1 %vm1112_vm2, %v9802_v40  ;;  %v6325_v40 = vld [vmem:[%s10464_s8 + $0x98] sm:$0xff] }
 0x446   : > { %7995 = vmatpush3.bf16.msra.mxu0 %v9754_v44  ;;  %8031 = vmatpush3.bf16.msra.mxu1 %v9756_v22  ;;  %v6298_v44 = vld [vmem:[#allocation8] ss:$0 sm:$0xff] }
 0x447   : > { %7996 = vmatprep.subr.bf16.mxu0 %v8716_v0  ;;  %8032 = vmatprep.subr.bf16.mxu1 %v8716_v0 }
 0x448   : > { %7365 = vmatprep.mubr.msk.f32.mxu0 %vm8717_vm0, %v8718_v1  ;;  %7422 = vmatprep.mubr.msk.f32.mxu1 %vm8717_vm0, %v8718_v1 }
 0x44a   : > { %7998 = vmatpush3.bf16.msra.mxu0 %v9778_v14  ;;  %8034 = vmatpush3.bf16.msra.mxu1 %v9780_v60  ;;  %v6323_v14 = vld [vmem:[%s10464_s8 + $0x88] sm:$0xff] }
 0x44b   : > { %7999 = vmatprep.subr.bf16.mxu0 %v8716_v0  ;;  %8035 = vmatprep.subr.bf16.mxu1 %v8716_v0  ;;  %v4078_v60 = vld [vmem:[#allocation10 + $0x6] sm:$0x3]  ;;  %v10024_v21 = vpack.c.bf16 %v6323_v14, %v6322_v57  ;;  %v6339_v14 = vld [vmem:[#allocation11] ss:$0 sm:$0xff] }
 0x44e   : > { %8001 = vmatpush3.bf16.msra.mxu0 %v9806_v49  ;;  %8037 = vmatpush3.bf16.msra.mxu1 %v9808_v50  ;;  %v4152_v50 = vld [vmem:[%s10464_s8] sm:$0xff] }
 0x44f   : > { %8002 = vmatprep.subr.bf16.mxu0 %v8716_v0  ;;  %8038 = vmatprep.subr.bf16.mxu1 %v8716_v0  ;;  %v10074_v59 = vpack.c.bf16 %v4153_v55, %v4152_v50 }
 0x452   : > { %8004 = vmatpush3.bf16.msra.mxu0 %v9826_v6  ;;  %8040 = vmatpush3.bf16.msra.mxu1 %v9828_v7  ;;  %v4154_v6 = vld [vmem:[%s10464_s8 + $0x10] sm:$0xff]  ;;  %v4155_v7 = vld [vmem:[%s10464_s8 + $0x18] sm:$0xff] }
 0x453   : > { %8005 = vmatprep.subr.bf16.mxu0 %v8716_v0  ;;  %8041 = vmatprep.subr.bf16.mxu1 %v8716_v0 }
 0x455   : > { %7366 = vmatmul.mubr.msk.f32.vlgmr.msra.gmra.mrb[16].mxu0 %vm1112_vm2, %v9770_v34  ;;  %7423 = vmatmul.mubr.msk.f32.vlgmr.msra.gmra.mrb[18].mxu1 %vm1112_vm2, %v9770_v34  ;;  %v6307_v34 = vld [vmem:[%s10464_s8 + $0x20] sm:$0xff] }
 0x456   : > { %8007 = vmatpush3.bf16.msra.mxu0 %v9846_v24  ;;  %8043 = vmatpush3.bf16.msra.mxu1 %v9848_v31  ;;  %v10022_v45 = vpack.c.bf16 %v6308_v54, %v6307_v34  ;;  %v8063_v31 = vpack.c.bf16 %v4155_v7, %v4154_v6 }
 0x457   : > { %8008 = vmatprep.subr.bf16.mxu0 %v8716_v0  ;;  %8044 = vmatprep.subr.bf16.mxu1 %v8716_v0 }
 0x458   : > { %7384 = vmatprep.mubr.msk.f32.mxu0 %vm8717_vm0, %v8718_v1  ;;  %7441 = vmatprep.mubr.msk.f32.mxu1 %vm8717_vm0, %v8718_v1 }
 0x45a   : > { %8010 = vmatpush3.bf16.msra.mxu0 %v9868_v62  ;;  %8046 = vmatpush3.bf16.msra.mxu1 %v9870_v2  ;;  %v6328_v62 = vld [vmem:[%s10464_s8 + $0xa0] sm:$0xff]  ;;  %v6329_v2 = vld [vmem:[%s10464_s8 + $0xa8] sm:$0xff] }
 0x45b   : > { %8011 = vmatprep.subr.bf16.mxu0 %v8716_v0  ;;  %8047 = vmatprep.subr.bf16.mxu1 %v8716_v0 }
 0x45e   : > { %8013 = vmatpush3.bf16.msra.mxu0 %v9892_v17  ;;  %8049 = vmatpush3.bf16.msra.mxu1 %v9894_v18  ;;  %v8084_v17 = vpack.c.bf16 %v6329_v2, %v6328_v62  ;;  %v6315_v18 = vld [vmem:[%s10464_s8 + $0x50] sm:$0xff]  ;;  %v5620_v62 = vld [vmem:[%s10469_s13 + $0x8] sm:$0xff]  ;;  %v5623_v2 = vld [vmem:[%s10469_s13 + $0x20] sm:$0xff] }
 0x45f   : > { %8014 = vmatprep.subr.bf16.mxu0 %v8716_v0  ;;  %8050 = vmatprep.subr.bf16.mxu1 %v8716_v0 }
 0x462   : > { %8016 = vmatpush3.bf16.msra.mxu0 %v9912_v37  ;;  %8052 = vmatpush3.bf16.msra.mxu1 %v9914_v16  ;;  %v8069_v37 = vpack.c.bf16 %v6316_v26, %v6315_v18  ;;  %v8087_v16 = vpack.c.bf16 %v6331_v30, %v6330_v29  ;;  %v5624_v18 = vld [vmem:[%s10469_s13 + $0x28] sm:$0xff]  ;;  %v5626_v26 = vld [vmem:[%s10469_s13 + $0x38] sm:$0xff]  ;;  %v5629_v29 = vld [vmem:[%s10469_s13 + $0x50] sm:$0xff] }
 0x463   : > { %7444 = vmatprep.subr.mxu0 %v8718_v1  ;;  %7449 = vmatprep.subr.mxu1 %v8718_v1  ;;  %v8129_v30 = vpack.c.bf16 %v5629_v29, %v5626_v26  ;;  %v5664_v26 = vld [vmem:[%s10469_s13 + $0x168] sm:$0xff]  ;;  %v5663_v29 = vld [vmem:[%s10469_s13 + $0x160] sm:$0xff] }
 0x465   : > { %7385 = vmatmul.mubr.msk.f32.vlgmr.msra.gmra.mrb[16].mxu0 %vm1112_vm2, %v9800_v39  ;;  %7442 = vmatmul.mubr.msk.f32.vlgmr.msra.gmra.mrb[18].mxu1 %vm1112_vm2, %v9800_v39  ;;  %v6324_v39 = vld [vmem:[%s10464_s8 + $0x90] sm:$0xff] }
 0x466   : > { %7451 = vmatprep.mubr.msk.f32.mxu1 %vm8717_vm0, %v8718_v1  ;;  %7446 = vmatprep.mubr.msk.f32.mxu0 %vm8717_vm0, %v8718_v1  ;;  %v10050_v49 = vpack.c.bf16 %v6325_v40, %v6324_v39 }
 0x508   : > { %v3168_v52 = vpop.f32.mrb[14].mxu0  ;;  %v3406_v61 = vpop.f32.mrb[16].mxu1 }
 0x509   : > { %v3411_v9 = vmax.f32 %v3168_v52, %v3406_v61  ;;  %v7272_v10 = vpop.f32.mrb[15].mxu0  ;;  %v7329_v19 = vpop.f32.mrb[17].mxu1  ;;  %v5136_v52 = vlaneseq  ;;  %v8719_v61 = vmov 1983009808  }
 0x50b   : > { %v10187_v10 = vshrl.u32 %v5136_v52, 7  ;;  %vm5976_vm9 = vcmp.lt.s32.totalorder %v5136_v52, 256 }
 0x538   : > { %v3621_v20 = vpop.f32.mrb[16].mxu0  ;;  %v3833_v35 = vpop.f32.mrb[18].mxu1 }
 0x539   : > { %v3626_v36 = vmax.f32 %v3411_v9, %v3621_v20  ;;  %v7386_v38 = vpop.f32.mrb[17].mxu0  ;;  %v7443_v43 = vpop.f32.mrb[19].mxu1  ;;  %v5134_v9 = vunpack.c.l.s4 %v8719_v61  ;;  %v5130_v20 = vld [vmem:[%s10467_s11] sm:$0x3f] }
 0x53a   : > { %v5132_v27 = vcombine.high %v5130_v20, %v5130_v20  ;;  %v5627_v61 = vld [vmem:[%s10469_s13 + $0x40] sm:$0xff] }
 0x53b   : > { %v3838_v22 = vmax.f32 %v3626_v36, %v3833_v35  ;;  %v5135_v19 = vunpack.c.0.s8 %v5134_v9 }
 0x53d   : > { %v3846_v47 = vadd.f32 %v6298_v44, %v3838_v22  ;;  %v5138_v35 = vsub.s32 %v5135_v19, %v10187_v10  ;;  %v5630_v19 = vld [vmem:[%s10469_s13 + $0x58] sm:$0xff] }
 0x53f   : > { %v3847_v48 = vmax.f32 %v3846_v47, 0.0  ;;  %v5139_v36 = vrot.slane %v5130_v20, %v5138_v35  ;;  %v5146_v33 = vrot.slane %v5132_v27, %v5138_v35  ;;  %v8161_v20 = vpack.c.bf16 %v5630_v19, %v5627_v61  ;;  %v5647_v27 = vld [vmem:[%s10469_s13 + $0xe0] sm:$0xff] }
 0x541   : > { %7445 = vmatpush3.msk.msra.mxu0 %vm3853_vm4, %v3847_v48  ;;  %7450 = vmatpush3.msk.msra.mxu1 %vm3853_vm4, %v3847_v48  ;;  %v5147_v38 = vcombine.high %v5139_v36, %v5139_v36 }
 0x542   : > { %7452 = vmatmul.mubr.msk.f32.vlgmr.msra.gmra.mrb[20].mxu1 %vm3849_vm5, %v3928_v28  ;;  %7454 = vmatprep.subr.mxu0 %v8718_v1 }
 0x543   : > { %7459 = vmatprep.subr.mxu1 %v8718_v1  ;;  %7447 = vmatmul.mubr.msk.f32.vlgmr.msra.gmra.mrb[18].mxu0 %vm3849_vm5, %v3848_v53 }
 0x544   : > { %7455 = vmatpush3.msk.msra.mxu0 %vm3853_vm4, %v3847_v48  ;;  %7460 = vmatpush3.msk.msra.mxu1 %vm3853_vm4, %v3847_v48 }
 0x545   : > { %7456 = vmatprep.mubr.msk.f32.mxu0 %vm8717_vm0, %v8718_v1  ;;  %7461 = vmatprep.mubr.msk.f32.mxu1 %vm8717_vm0, %v8718_v1 }
 0x546   : > { %7462 = vmatmul.mubr.msk.f32.vlgmr.msra.gmra.mrb[22].mxu1 %vm3849_vm5, %v4078_v60  ;;  %8053 = vmatprep.subr.bf16.mxu0 %v8716_v0 }
 0x547   : > { %7457 = vmatmul.mubr.msk.f32.vlgmr.msra.gmra.mrb[20].mxu0 %vm3849_vm5, %v4003_v63  ;;  %8071 = vmatprep.subr.bf16.mxu1 %v8716_v0 }
 0x548   : > { %8055 = vmatpush3.bf16.msra.mxu0 %v10022_v45  ;;  %8073 = vmatpush3.bf16.msra.mxu1 %v10024_v21 }
 0x549   : > { %8056 = vmatprep.subr.bf16.mxu0 %v8716_v0  ;;  %8074 = vmatprep.subr.bf16.mxu1 %v8716_v0 }
 0x54a   : > { %7472 = vmatprep.mubr.msk.f32.mxu0 %vm8717_vm0, %v8718_v1  ;;  %7505 = vmatprep.mubr.msk.f32.mxu1 %vm8717_vm0, %v8718_v1 }
 0x54c   : > { %8058 = vmatpush3.bf16.msra.mxu0 %v10048_v46  ;;  %8076 = vmatpush3.bf16.msra.mxu1 %v10050_v49 }
 0x54d   : > { %8059 = vmatprep.subr.bf16.mxu0 %v8716_v0  ;;  %8077 = vmatprep.subr.bf16.mxu1 %v8716_v0 }
 0x615   : > { %v10090_v15 = vpop.f32.mrb[20].mxu1 }
 0x616   : > { %v7453_v23 = vpop.f32.mrb[21].mxu1  ;;  %7473 = vmatmul.mubr.msk.f32.vlgmr.msra.gmra.mrb[22].mxu0 %vm4161_vm6, %v10090_v15  ;;  %7506 = vmatmul.mubr.msk.f32.vlgmr.msra.gmra.mrb[24].mxu1 %vm4161_vm6, %v10090_v15  ;;  %v3923_v24 = vpop.f32.mrb[18].mxu0 }
 0x617   : > { %8061 = vmatpush3.bf16.msra.mxu0 %v10074_v59  ;;  %8079 = vmatpush3.bf16.msra.mxu1 %v10076_v3  ;;  %v7448_v41 = vpop.f32.mrb[19].mxu0 }
 0x618   : > { %8062 = vmatprep.subr.bf16.mxu0 %v8716_v0  ;;  %8080 = vmatprep.subr.bf16.mxu1 %v8716_v0 }
 0x619   : > { %7483 = vmatprep.mubr.msk.f32.mxu0 %vm8717_vm0, %v8718_v1  ;;  %7516 = vmatprep.mubr.msk.f32.mxu1 %vm8717_vm0, %v8718_v1  ;;  %v10116_v4 = vpop.f32.mrb[22].mxu1 }
 0x61a   : > { %v4073_v8 = vpop.f32.mrb[20].mxu0  ;;  %v7463_v11 = vpop.f32.mrb[23].mxu1 }
 0x61b   : > { %8064 = vmatpush3.bf16.msra.mxu0 %v8063_v31  ;;  %8082 = vmatpush3.bf16.msra.mxu1 %v8081_v32  ;;  %v7458_v25 = vpop.f32.mrb[21].mxu0  ;;  %v5622_v11 = vld [vmem:[%s10469_s13 + $0x18] sm:$0xff] }
 0x61c   : > { %8065 = vmatprep.subr.bf16.mxu0 %v8716_v0  ;;  %8083 = vmatprep.subr.bf16.mxu1 %v8716_v0 }
 0x61e   : > { %7484 = vmatmul.mubr.msk.f32.vlgmr.msra.gmra.mrb[22].mxu0 %vm4161_vm6, %v3923_v24  ;;  %7517 = vmatmul.mubr.msk.f32.vlgmr.msra.gmra.mrb[24].mxu1 %vm4161_vm6, %v3923_v24 }
 0x61f   : > { %8067 = vmatpush3.bf16.msra.mxu0 %v8066_v12  ;;  %8085 = vmatpush3.bf16.msra.mxu1 %v8084_v17 }
 0x620   : > { %8068 = vmatprep.subr.bf16.mxu0 %v8716_v0  ;;  %8086 = vmatprep.subr.bf16.mxu1 %v8716_v0 }
 0x621   : > { %7494 = vmatprep.mubr.msk.f32.mxu0 %vm8717_vm0, %v8718_v1  ;;  %7527 = vmatprep.mubr.msk.f32.mxu1 %vm8717_vm0, %v8718_v1 }
 0x623   : > { %8070 = vmatpush3.bf16.msra.mxu0 %v8069_v37  ;;  %8088 = vmatpush3.bf16.msra.mxu1 %v8087_v16 }
 0x624   : > { %8089 = vmatprep.subr.bf16.mxu0 %v8716_v0  ;;  %8107 = vmatprep.subr.bf16.mxu1 %v8716_v0 }
 0x626   : > { %7495 = vmatmul.mubr.msk.f32.vlgmr.msra.gmra.mrb[22].mxu0 %vm4161_vm6, %v4073_v8  ;;  %7528 = vmatmul.mubr.msk.f32.vlgmr.msra.gmra.mrb[24].mxu1 %vm4161_vm6, %v4073_v8 }
 0x627   : > { %8091 = vmatpush3.bf16.msra.mxu0 %v10022_v45  ;;  %8109 = vmatpush3.bf16.msra.mxu1 %v10024_v21  ;;  %v5051_v21 = vld [vmem:[%s10466_s10] sm:$0x1] }
 0x628   : > { %8092 = vmatprep.subr.bf16.mxu0 %v8716_v0  ;;  %8110 = vmatprep.subr.bf16.mxu1 %v8716_v0 }
 0x629   : > { %7538 = vmatprep.mubr.msk.f32.mxu0 %vm8717_vm0, %v8718_v1  ;;  %7571 = vmatprep.mubr.msk.f32.mxu1 %vm8717_vm0, %v8718_v1 }
 0x62b   : > { %8094 = vmatpush3.bf16.msra.mxu0 %v10048_v46  ;;  %8112 = vmatpush3.bf16.msra.mxu1 %v10050_v49  ;;  %v6347_v46 = vld [vmem:[%s10466_s10 + $0x1] sm:$0x1]  ;;  %v6350_v49 = vld [vmem:[%s10467_s11 + $0x6] sm:$0x3f] }
 0x62c   : > { %8095 = vmatprep.subr.bf16.mxu0 %v8716_v0  ;;  %8113 = vmatprep.subr.bf16.mxu1 %v8716_v0  ;;  %v5411_v50 = vrot.slane %v6350_v49, %v5138_v35  ;;  %v5404_v55 = vcombine.high %v6350_v49, %v6350_v49  ;;  %v5645_v49 = vld [vmem:[%s10469_s13 + $0xd0] sm:$0xff] }
 0x62e   : > { %7539 = vmatmul.mubr.msk.f32.vlgmr.msra.gmra.mrb[24].mxu0 %vm4161_vm6, %v4073_v8  ;;  %7572 = vmatmul.mubr.msk.f32.vlgmr.msra.gmra.mrb[26].mxu1 %vm4161_vm6, %v4073_v8  ;;  %v5419_v56 = vcombine.high %v5411_v50, %v5411_v50  ;;  %v5418_v58 = vrot.slane %v5404_v55, %v5138_v35  ;;  %v5619_v8 = vld [vmem:[%s10469_s13] sm:$0xff]  ;;  %v5632_v35 = vld [vmem:[%s10469_s13 + $0x68] sm:$0xff]  ;;  %v5650_v55 = vld [vmem:[%s10469_s13 + $0xf8] sm:$0xff] }
 0x62f   : > { %8097 = vmatpush3.bf16.msra.mxu0 %v10074_v59  ;;  %8115 = vmatpush3.bf16.msra.mxu1 %v10076_v3  ;;  %v8720_v59 = vmov 1966171168  }
 0x630   : > { %8098 = vmatprep.subr.bf16.mxu0 %v8716_v0  ;;  %8116 = vmatprep.subr.bf16.mxu1 %v8716_v0  ;;  %v5303_v3 = vunpack.c.l.s4 %v8720_v59 }
 0x631   : > { %7549 = vmatprep.mubr.msk.f32.mxu0 %vm8717_vm0, %v8718_v1  ;;  %7582 = vmatprep.mubr.msk.f32.mxu1 %vm8717_vm0, %v8718_v1 }
 0x632   : > { %v5304_v6 = vunpack.c.0.s8 %v5303_v3 }
 0x633   : > { %8100 = vmatpush3.bf16.msra.mxu0 %v8063_v31  ;;  %8118 = vmatpush3.bf16.msra.mxu1 %v8081_v32 }
 0x634   : > { %8101 = vmatprep.subr.bf16.mxu0 %v8716_v0  ;;  %8119 = vmatprep.subr.bf16.mxu1 %v8716_v0  ;;  %v10226_v13 = vsub.s32 %v5304_v6, %v10187_v10  ;;  %v5649_v6 = vld [vmem:[%s10469_s13 + $0xf0] sm:$0xff] }
 0x636   : > { %7550 = vmatmul.mubr.msk.f32.vlgmr.msra.gmra.mrb[24].mxu0 %vm4161_vm6, %v10090_v15  ;;  %7583 = vmatmul.mubr.msk.f32.vlgmr.msra.gmra.mrb[26].mxu1 %vm4161_vm6, %v10090_v15 }
 0x637   : > { %8103 = vmatpush3.bf16.msra.mxu0 %v8066_v12  ;;  %8121 = vmatpush3.bf16.msra.mxu1 %v8084_v17  ;;  %v5621_v12 = vld [vmem:[%s10469_s13 + $0x10] sm:$0xff]  ;;  %v8127_v17 = vpack.c.bf16 %v5622_v11, %v5619_v8  ;;  %v5662_v8 = vld [vmem:[%s10469_s13 + $0x158] sm:$0xff] }
 0x638   : > { %8104 = vmatprep.subr.bf16.mxu0 %v8716_v0  ;;  %8122 = vmatprep.subr.bf16.mxu1 %v8716_v0  ;;  %v8158_v25 = vpack.c.bf16 %v5624_v18, %v5621_v12  ;;  %v5665_v11 = vld [vmem:[%s10469_s13 + $0x170] sm:$0xff] }
 0x639   : > { %7560 = vmatprep.mubr.msk.f32.mxu0 %vm8717_vm0, %v8718_v1  ;;  %7593 = vmatprep.mubr.msk.f32.mxu1 %vm8717_vm0, %v8718_v1  ;;  %v8153_v18 = vpack.c.bf16 %v5665_v11, %v5662_v8  ;;  %v5858_v11 = vld [vmem:[#allocation13 + $0x88] sm:$0xff] }
 0x63b   : > { %8106 = vmatpush3.bf16.msra.mxu0 %v8069_v37  ;;  %8124 = vmatpush3.bf16.msra.mxu1 %v8087_v16  ;;  %v5625_v37 = vld [vmem:[%s10469_s13 + $0x30] sm:$0xff]  ;;  %v5628_v16 = vld [vmem:[%s10469_s13 + $0x48] sm:$0xff] }
 0x63c   : > { %7596 = vmatprep.subr.mxu0 %v8718_v1  ;;  %6342 = vmatprep.subr.msk.mxu1 %vm5056_vm7, %v5147_v38  ;;  %v8131_v9 = vpack.c.bf16 %v5628_v16, %v5625_v37 }
 0x63e   : > { %7561 = vmatmul.mubr.msk.f32.vlgmr.msra.gmra.mrb[24].mxu0 %vm4161_vm6, %v10116_v4  ;;  %7594 = vmatmul.mubr.msk.f32.vlgmr.msra.gmra.mrb[26].mxu1 %vm4161_vm6, %v10116_v4  ;;  %v8125_v4 = vpack.c.bf16 %v5623_v2, %v5620_v62  ;;  %v5658_v62 = vld [vmem:[%s10469_s13 + $0x138] sm:$0xff]  ;;  %v5657_v2 = vld [vmem:[%s10469_s13 + $0x130] sm:$0xff] }
 0x63f   : > { %7598 = vmatprep.mubr.msk.f32.mxu0 %vm8717_vm0, %v8718_v1  ;;  %5221 = vmatprep.mubr.f32.mxu1 %v8718_v1 }
 0x640   : > { %6343 = vmatpush1.msk.msra.mxu1 %vm5056_vm7, %v5139_v36  ;;  %v5635_v36 = vld [vmem:[%s10469_s13 + $0x80] sm:$0xff] }
 0x641   : > { %7606 = vmatprep.subr.mxu1 %v8718_v1  ;;  %v8133_v38 = vpack.c.bf16 %v5635_v36, %v5632_v35 }
 0x6f9   : > { %v4382_v43 = vpop.f32.mrb[22].mxu0  ;;  %v4608_v44 = vpop.f32.mrb[24].mxu1 }
 0x6fa   : > { %v4613_v22 = vmax.f32 %v4382_v43, %v4608_v44  ;;  %v7496_v47 = vpop.f32.mrb[23].mxu0  ;;  %v7529_v48 = vpop.f32.mrb[25].mxu1  ;;  %v5631_v43 = vld [vmem:[%s10469_s13 + $0x60] sm:$0xff]  ;;  %v5634_v44 = vld [vmem:[%s10469_s13 + $0x78] sm:$0xff] }
 0x6fb   : > { %v8135_v47 = vpack.c.bf16 %v5634_v44, %v5631_v43  ;;  %v5636_v48 = vld [vmem:[%s10469_s13 + $0x88] sm:$0xff]  ;;  %v5050_v44 = vld [vmem:[%s10468_s12] sm:$0x7] }
 0x711   : > { %v4823_v28 = vpop.f32.mrb[24].mxu0  ;;  %v5035_v53 = vpop.f32.mrb[26].mxu1 }
 0x712   : > { %v4828_v34 = vmax.f32 %v4613_v22, %v4823_v28  ;;  %v7562_v54 = vpop.f32.mrb[25].mxu0  ;;  %v7595_v57 = vpop.f32.mrb[27].mxu1  ;;  %v5633_v22 = vld [vmem:[%s10469_s13 + $0x70] sm:$0xff]  ;;  %v5638_v28 = vld [vmem:[%s10469_s13 + $0x98] sm:$0xff] }
 0x713   : > { %v5637_v57 = vld [vmem:[%s10469_s13 + $0x90] sm:$0xff] }
 0x714   : > { %v5040_v60 = vmax.f32 %v4828_v34, %v5035_v53  ;;  %v5641_v53 = vld [vmem:[%s10469_s13 + $0xb0] sm:$0xff]  ;;  %v8164_v34 = vpack.c.bf16 %v5636_v48, %v5633_v22 }
 0x715   : > { %v8137_v54 = vpack.c.bf16 %v5641_v53, %v5638_v28 }
 0x716   : > { %v5048_v63 = vadd.f32 %v6339_v14, %v5040_v60  ;;  %v5640_v14 = vld [vmem:[%s10469_s13 + $0xa8] sm:$0xff]  ;;  %v5639_v60 = vld [vmem:[%s10469_s13 + $0xa0] sm:$0xff] }
 0x718   : > { %v5049_v45 = vmax.f32 %v5048_v63, 0.0  ;;  %v8139_v63 = vpack.c.bf16 %v5640_v14, %v5637_v57 }
 0x71a   : > { %7597 = vmatpush3.msk.msra.mxu0 %vm5056_vm7, %v5049_v45 }
 0x71b   : > { %7599 = vmatmul.mubr.msk.f32.vlgmr.msra.gmra.mrb[26].mxu0 %vm5052_vm8, %v5051_v21  ;;  %7601 = vmatprep.subr.mxu0 %v8718_v1  ;;  %v5644_v21 = vld [vmem:[%s10469_s13 + $0xc8] sm:$0xff] }
 0x71c   : > { %7603 = vmatprep.mubr.msk.f32.mxu0 %vm8717_vm0, %v8718_v1  ;;  %7602 = vmatpush3.msk.msra.mxu0 %vm5056_vm7, %v5146_v33 }
 0x71d   : > { %6351 = vmatprep.subr.msk.mxu0 %vm5056_vm7, %v5419_v56  ;;  %v5653_v56 = vld [vmem:[%s10469_s13 + $0x110] sm:$0xff] }
 0x71e   : > { %v8145_v3 = vpack.c.bf16 %v5653_v56, %v5650_v55  ;;  %v5843_v55 = vld [vmem:[#allocation13 + $0x10] sm:$0xff] }
 0x7ee   : > { %v5126_v39 = vpop.f32.mrb[26].mxu0 }
 0x7ef   : > { %6344 = vmatmul.mubr.msk.f32.vlgmr.msra.gmra.mrb[28].mxu1 %vm5052_vm8, %v5126_v39  ;;  %v7600_v40 = vpop.f32.mrb[27].mxu0  ;;  %7604 = vmatmul.mubr.msk.f32.vlgmr.msra.gmra.mrb[28].mxu0 %vm5052_vm8, %v5126_v39  ;;  %v8141_v39 = vpack.c.bf16 %v5647_v27, %v5644_v21 }
 0x7f0   : > { %7607 = vmatpush3.msk.msra.mxu1 %vm5056_vm7, %v5049_v45  ;;  %7608 = vmatprep.mubr.msk.f32.mxu1 %vm8717_vm0, %v8718_v1  ;;  %v5642_v45 = vld [vmem:[%s10469_s13 + $0xb8] sm:$0xff]  ;;  %v5643_v40 = vld [vmem:[%s10469_s13 + $0xc0] sm:$0xff] }
 0x7f1   : > { %5493 = vmatprep.mubr.f32.mxu0 %v8718_v1  ;;  %7611 = vmatprep.subr.mxu1 %v8718_v1  ;;  %v8167_v33 = vpack.c.bf16 %v5642_v45, %v5639_v60 }
 0x7f2   : > { %6352 = vmatpush1.msk.msra.mxu0 %vm5056_vm7, %v5411_v50  ;;  %v5648_v50 = vld [vmem:[%s10469_s13 + $0xe8] sm:$0xff] }
 0x7f3   : > { %7609 = vmatmul.mubr.msk.f32.vlgmr.msra.gmra.mrb[30].mxu1 %vm5052_vm8, %v6347_v46  ;;  %8126 = vmatprep.subr.bf16.mxu0 %v8125_v4  ;;  %v5646_v46 = vld [vmem:[%s10469_s13 + $0xd8] sm:$0xff]  ;;  %v8170_v59 = vpack.c.bf16 %v5648_v50, %v5645_v49  ;;  %v5660_v4 = vld [vmem:[%s10469_s13 + $0x148] sm:$0xff] }
 0x7f4   : > { %7613 = vmatprep.mubr.msk.f32.mxu1 %vm8717_vm0, %v8718_v1  ;;  %7612 = vmatpush3.msk.msra.mxu1 %vm5056_vm7, %v5418_v58  ;;  %v8143_v58 = vpack.c.bf16 %v5646_v46, %v5643_v40  ;;  %v5842_v40 = vld [vmem:[#allocation13 + $0x8] sm:$0xff]  ;;  %v5844_v46 = vld [vmem:[#allocation13 + $0x18] sm:$0xff]  ;;  %v5841_v50 = vld [vmem:[#allocation13] sm:$0xff] }
 0x7f5   : > { %8157 = vmatprep.subr.bf16.mxu1 %v8716_v0  ;;  %v8181_v49 = vpack.c.bf16 %v5844_v46, %v5842_v40  ;;  %v8183_v56 = vpack.c.bf16 %v5843_v55, %v5841_v50 }
 0x8c2   : > { %v5223_v7 = vpop.f32.mrb[28].mxu1  ;;  %v5294_v5 = vpop.f32.mrb[28].mxu0 }
 0x8c3   : > { %v5225_v15 = vpop.f32.mrb[29].mxu1  ;;  %v7605_v23 = vpop.f32.mrb[29].mxu0  ;;  %v5315_v32 = vrot.slane %v5294_v5, %v10226_v13  ;;  %v5651_v5 = vld [vmem:[%s10469_s13 + $0x100] sm:$0xff] }
 0x8c4   : > { %v5301_v24 = vcombine.low %v5223_v7, %v5225_v15  ;;  %v5652_v7 = vld [vmem:[%s10469_s13 + $0x108] sm:$0xff]  ;;  %v5654_v15 = vld [vmem:[%s10469_s13 + $0x118] sm:$0xff] }
 0x8c5   : > { %v5656_v23 = vld [vmem:[%s10469_s13 + $0x128] sm:$0xff] }
 0x8c6   : > { %v5308_v31 = vrot.slane %v5301_v24, %v10226_v13  ;;  %v5397_v41 = vpop.f32.mrb[30].mxu1  ;;  %v5659_v24 = vld [vmem:[%s10469_s13 + $0x140] sm:$0xff] }
 0x8c7   : > { %6353 = vmatmul.mubr.msk.f32.vlgmr.msra.gmra.mrb[30].mxu0 %vm5052_vm8, %v5397_v41  ;;  %v7610_v42 = vpop.f32.mrb[31].mxu1  ;;  %7614 = vmatmul.mubr.msk.f32.vlgmr.msra.gmra.mrb[32].mxu1 %vm5052_vm8, %v5397_v41  ;;  %v8149_v41 = vpack.c.bf16 %v5659_v24, %v5656_v23  ;;  %v5852_v23 = vld [vmem:[#allocation13 + $0x58] sm:$0xff] }
 0x8c8   : > { %v10232_v51 = vcombine.low %v5308_v31, %v5315_v32  ;;  %5748 = vmatprep.mubr.f32.mxu0 %v8718_v1  ;;  %7648 = vmatprep.mubr.msk.f32.mxu1 %vm8717_vm0, %v8718_v1  ;;  %v8147_v31 = vpack.c.bf16 %v5652_v7, %v5649_v6  ;;  %v8173_v32 = vpack.c.bf16 %v5654_v15, %v5651_v5  ;;  %v5655_v42 = vld [vmem:[%s10469_s13 + $0x120] sm:$0xff]  ;;  %v5845_v6 = vld [vmem:[#allocation13 + $0x20] sm:$0xff]  ;;  %v5850_v15 = vld [vmem:[#allocation13 + $0x48] sm:$0xff] }
 0x8c9   : > { %8128 = vmatpush1.bf16.msra.mxu0 %v8127_v17  ;;  %8159 = vmatpush3.bf16.msra.mxu1 %v8158_v25  ;;  %v8151_v12 = vpack.c.bf16 %v5658_v62, %v5655_v42  ;;  %v8176_v17 = vpack.c.bf16 %v5660_v4, %v5657_v2  ;;  %v5661_v25 = vld [vmem:[%s10469_s13 + $0x150] sm:$0xff]  ;;  %v5847_v7 = vld [vmem:[#allocation13 + $0x30] sm:$0xff]  ;;  %v8189_v24 = vpack.c.bf16 %v5852_v23, %v5850_v15  ;;  %v5856_v42 = vld [vmem:[#allocation13 + $0x78] sm:$0xff] }
 0x8ca   : > { %8160 = vmatprep.subr.bf16.mxu1 %v8716_v0  ;;  %8130 = vmatprep.subr.bf16.mxu0 %v8129_v30  ;;  %v5666_v30 = vld [vmem:[%s10469_s13 + $0x178] sm:$0xff]  ;;  %v8155_v37 = vpack.c.bf16 %v5664_v26, %v5661_v25  ;;  %v5323_v36 = vrot.slane %v10232_v51, %v10226_v13  ;;  %v8187_v5 = vpack.c.bf16 %v5847_v7, %v5845_v6  ;;  %v5853_v2 = vld [vmem:[#allocation13 + $0x60] sm:$0xff]  ;;  %v5873_v15 = vld [vmem:[%s10520_s20] sm:$0x3] }
 0x8cb   : > { %v8179_v16 = vpack.c.bf16 %v5666_v30, %v5663_v29  ;;  %v5855_v4 = vld [vmem:[#allocation13 + $0x70] sm:$0xff]  ;;  %v5862_v29 = vld [vmem:[#allocation13 + $0xa8] sm:$0xff]  ;;  %v5864_v30 = vld [vmem:[#allocation13 + $0xb8] sm:$0xff] }
 0x8cc   : > { %v8195_v8 = vpack.c.bf16 %v5855_v4, %v5853_v2  ;;  %v5859_v25 = vld [vmem:[#allocation13 + $0x90] sm:$0xff] }
 0x8cd   : > { %8132 = vmatpush1.bf16.msra.mxu0 %v8131_v9  ;;  %8162 = vmatpush3.bf16.msra.mxu1 %v8161_v20 }
 0x8ce   : > { %8163 = vmatprep.subr.bf16.mxu1 %v8716_v0  ;;  %8134 = vmatprep.subr.bf16.mxu0 %v8133_v38 }
 0x8d1   : > { %8136 = vmatpush1.bf16.msra.mxu0 %v8135_v47  ;;  %8165 = vmatpush3.bf16.msra.mxu1 %v8164_v34 }
 0x8d2   : > { %8138 = vmatprep.subr.bf16.mxu0 %v8137_v54  ;;  %8166 = vmatprep.subr.bf16.mxu1 %v8716_v0 }
 0x8d5   : > { %8140 = vmatpush1.bf16.msra.mxu0 %v8139_v63  ;;  %8168 = vmatpush3.bf16.msra.mxu1 %v8167_v33 }
 0x8d6   : > { %8142 = vmatprep.subr.bf16.mxu0 %v8141_v39  ;;  %8169 = vmatprep.subr.bf16.mxu1 %v8716_v0 }
 0x8d9   : > { %8144 = vmatpush1.bf16.msra.mxu0 %v8143_v58  ;;  %8171 = vmatpush3.bf16.msra.mxu1 %v8170_v59  ;;  %v5846_v58 = vld [vmem:[#allocation13 + $0x28] sm:$0xff]  ;;  %v5848_v59 = vld [vmem:[#allocation13 + $0x38] sm:$0xff] }
 0x8da   : > { %8146 = vmatprep.subr.bf16.mxu0 %v8145_v3  ;;  %8172 = vmatprep.subr.bf16.mxu1 %v8716_v0  ;;  %v8185_v3 = vpack.c.bf16 %v5848_v59, %v5846_v58 }
 0x8dd   : > { %8148 = vmatpush1.bf16.msra.mxu0 %v8147_v31  ;;  %8174 = vmatpush3.bf16.msra.mxu1 %v8173_v32  ;;  %v5851_v31 = vld [vmem:[#allocation13 + $0x50] sm:$0xff] }
 0x8de   : > { %8150 = vmatprep.subr.bf16.mxu0 %v8149_v41  ;;  %8175 = vmatprep.subr.bf16.mxu1 %v8716_v0  ;;  %v5854_v41 = vld [vmem:[#allocation13 + $0x68] sm:$0xff] }
 0x8df   : > { %v8193_v62 = vpack.c.bf16 %v5856_v42, %v5854_v41 }
 0x8e1   : > { %8152 = vmatpush1.bf16.msra.mxu0 %v8151_v12  ;;  %8177 = vmatpush3.bf16.msra.mxu1 %v8176_v17  ;;  %v5860_v12 = vld [vmem:[#allocation13 + $0x98] sm:$0xff] }
 0x8e2   : > { %8154 = vmatprep.subr.bf16.mxu0 %v8153_v18  ;;  %8178 = vmatprep.subr.bf16.mxu1 %v8716_v0  ;;  %v5325_v0 = vadd.f32 %v5323_v36, %v5050_v44  ;;  %v8197_v17 = vpack.c.bf16 %v5860_v12, %v5858_v11  ;;  %v5857_v18 = vld [vmem:[#allocation13 + $0x80] sm:$0xff]  ;;  %v5867_v36 = vld [vmem:[#allocation13 + $0xd0] sm:$0xff]  ;;  %v5872_v44 = vld [vmem:[#allocation13 + $0xf8] sm:$0xff] }
 0x8e3   : > { %v8199_v26 = vpack.c.bf16 %v5859_v25, %v5857_v18 }
 0x8e5   : > { %8156 = vmatpush1.bf16.msra.mxu0 %v8155_v37  ;;  %8180 = vmatpush3.bf16.msra.mxu1 %v8179_v16  ;;  %v8201_v37 = vpack.c.bf16 %v5864_v30, %v5862_v29  ;;  %v5861_v16 = vld [vmem:[#allocation13 + $0xa0] sm:$0xff] }
 0x8e6   : > { %8182 = vmatprep.subr.bf16.mxu0 %v8181_v49 }
 0x99a   : > { %v5495_v61 = vpop.f32.mrb[30].mxu0  ;;  %v5566_v9 = vpop.f32.mrb[32].mxu1 }
 0x99b   : > { %v5497_v19 = vpop.f32.mrb[31].mxu0  ;;  %v7615_v20 = vpop.f32.mrb[33].mxu1  ;;  %v5587_v43 = vrot.slane %v5566_v9, %v10226_v13  ;;  %v5866_v9 = vld [vmem:[#allocation13 + $0xc8] sm:$0xff] }
 0x99c   : > { %v5573_v35 = vcombine.low %v5495_v61, %v5497_v19  ;;  %v5863_v61 = vld [vmem:[#allocation13 + $0xb0] sm:$0xff]  ;;  %v5868_v20 = vld [vmem:[#allocation13 + $0xd8] sm:$0xff] }
 0x99d   : > { %v8203_v19 = vpack.c.bf16 %v5863_v61, %v5861_v16 }
 0x99e   : > { %v5580_v38 = vrot.slane %v5573_v35, %v10226_v13  ;;  %v5865_v35 = vld [vmem:[#allocation13 + $0xc0] sm:$0xff] }
 0x9a0   : > { %v5588_v22 = vcombine.low %v5580_v38, %v5587_v43  ;;  %v8205_v38 = vpack.c.bf16 %v5868_v20, %v5866_v9  ;;  %v5870_v43 = vld [vmem:[#allocation13 + $0xe8] sm:$0xff] }
 0x9a2   : > { %v5595_v47 = vrot.slane %v5588_v22, %v10226_v13  ;;  %v8207_v22 = vpack.c.bf16 %v5867_v36, %v5865_v35 }
 0x9a4   : > { %v5597_v48 = vadd.f32 %v5595_v47, %v5325_v0  ;;  %v8209_v0 = vpack.c.bf16 %v5872_v44, %v5870_v43  ;;  %v5869_v47 = vld [vmem:[#allocation13 + $0xe0] sm:$0xff] }
 0x9a6   : > { %v6356_v28 = vmul.f32 -1.442695, %v5597_v48  ;;  %v5608_v53 = vrot.slane %v5597_v48, 2  ;;  %v5605_v54 = vrot.slane %v5597_v48, 1  ;;  %v5871_v48 = vld [vmem:[#allocation13 + $0xf0] sm:$0xff] }
 0x9a8   : > { %8401 = vpow2.f32 %v6356_v28  ;;  %v6357_v34 = vmul.f32 -1.442695, %v5608_v53  ;;  %v8211_v28 = vpack.c.bf16 %v5871_v48, %v5869_v47  ;;  %v5671_v53 = vsub.s32 0, %v10187_v10 }
 0x9aa   : > { %8403 = vpow2.f32 %v6357_v34  ;;  %v5667_v34 = vld [vmem:[%s10470_s14] sm:$0x7]  ;;  %v5878_v23 = vrot.slane %v5873_v15, %v5671_v53 }
 0x9ab   : > { %8405 = vtanh.f32 %v5605_v54  ;;  %v5672_v54 = vrot.slane %v5667_v34, %v5671_v53 }
 0x9b2   : > { %v8402_v51 = vpop.eup %8401 }
 0x9b3   : > { %v5601_v57 = vadd.f32 1.0, %v8402_v51  ;;  %v5679_v51 = vsub.s32 2, %v10187_v10 }
 0x9b4   : > { %v8404_v14 = vpop.eup %8403 }
 0x9b5   : > { %8407 = vrcp.f32 %v5601_v57  ;;  %v5613_v60 = vadd.f32 1.0, %v8404_v14  ;;  %v8406_v63 = vpop.eup %8405 }
 0x9b7   : > { %8409 = vrcp.f32 %v5613_v60 }
 0x9bf   : > { %v8408_v45 = vpop.eup %8407 }
 0x9c0   : > { %v5616_v21 = vmul.f32 %v8408_v45, %v8406_v63  ;;  %v5680_v63 = vrot.slane %v5667_v34, %v5679_v51 }
 0x9c1   : > { %v8410_v27 = vpop.eup %8409 }
 0x9c2   : > { %8411 = vtanh.f32 %v5616_v21 }
 0x9cc   : > { %v8412_v33 = vpop.eup %8411 }
 0x9cd   : > { %v5618_v39 = vmul.f32 %v8412_v33, %v8410_v27 }
 0x9cf   : > { %5749 = vmatmul.mubr.f32.vlgmr.msra.gmra.mrb[32].mxu0 %v5618_v39  ;;  %7649 = vmatmul.mubr.f32.vlgmr.msra.gmra.mrb[34].mxu1 %v5618_v39  ;;  %v5675_v39 = vsub.s32 1, %v10187_v10 }
 0x9d0   : > { %5949 = vmatprep.mubr.f32.mxu0 %v8718_v1  ;;  %8184 = vmatpush1.bf16.msra.mxu0 %v8183_v56  ;;  %v5849_v1 = vld [vmem:[#allocation13 + $0x40] sm:$0xff] }
 0x9d1   : > { %8186 = vmatprep.subr.bf16.mxu0 %v8185_v3  ;;  %v8191_v32 = vpack.c.bf16 %v5851_v31, %v5849_v1  ;;  %v5676_v46 = vrot.slane %v5667_v34, %v5675_v39 }
 0x9d4   : > { %8188 = vmatpush1.bf16.msra.mxu0 %v8187_v5 }
 0x9d5   : > { %8190 = vmatprep.subr.bf16.mxu0 %v8189_v24  ;;  %v5882_v24 = vrot.slane %v5873_v15, %v5675_v39 }
 0x9d8   : > { %8192 = vmatpush1.bf16.msra.mxu0 %v8191_v32 }
 0x9d9   : > { %8194 = vmatprep.subr.bf16.mxu0 %v8193_v62 }
 0x9dc   : > { %8196 = vmatpush1.bf16.msra.mxu0 %v8195_v8 }
 0x9dd   : > { %8198 = vmatprep.subr.bf16.mxu0 %v8197_v17 }
 0x9e0   : > { %8200 = vmatpush1.bf16.msra.mxu0 %v8199_v26 }
 0x9e1   : > { %8202 = vmatprep.subr.bf16.mxu0 %v8201_v37 }
 0x9e4   : > { %8204 = vmatpush1.bf16.msra.mxu0 %v8203_v19 }
 0x9e5   : > { %8206 = vmatprep.subr.bf16.mxu0 %v8205_v38 }
 0x9e8   : > { %8208 = vmatpush1.bf16.msra.mxu0 %v8207_v22 }
 0x9e9   : > { %8210 = vmatprep.subr.bf16.mxu0 %v8209_v0 }
 0x9ec   : > { %8212 = vmatpush1.bf16.msra.mxu0 %v8211_v28 }
 0xaa2   : > { %v5750_v57 = vpop.f32.mrb[32].mxu0  ;;  %v5821_v14 = vpop.f32.mrb[34].mxu1 }
 0xaa3   : > { %v5751_v60 = vadd.f32 %v5750_v57, %v5672_v54  ;;  %v5752_v45 = vpop.f32.mrb[33].mxu0  ;;  %v7650_v21 = vpop.f32.mrb[35].mxu1  ;;  %v5822_v33 = vadd.f32 %v5821_v14, %v5680_v63 }
 0xaa4   : > { %v5753_v49 = vadd.f32 %v5752_v45, %v5676_v46 }
 0xaa5   : > { %v6358_v27 = vmul.f32 -1.442695, %v5751_v60  ;;  %v6359_v40 = vmul.f32 -1.442695, %v5822_v33 }
 0xaa7   : > { %8413 = vpow2.f32 %v6358_v27 }
 0xaa8   : > { %8415 = vpow2.f32 %v6359_v40 }
 0xaa9   : > { %8417 = vtanh.f32 %v5753_v49 }
 0xab1   : > { %v8414_v50 = vpop.eup %8413 }
 0xab2   : > { %v5828_v55 = vadd.f32 1.0, %v8414_v50  ;;  %v8416_v56 = vpop.eup %8415 }
 0xab3   : > { %v5835_v58 = vadd.f32 1.0, %v8416_v56  ;;  %v8418_v59 = vpop.eup %8417 }
 0xab4   : > { %8419 = vrcp.f32 %v5828_v55 }
 0xab5   : > { %8421 = vrcp.f32 %v5835_v58 }
 0xabe   : > { %v8420_v3 = vpop.eup %8419 }
 0xabf   : > { %v5838_v6 = vmul.f32 %v8420_v3, %v8418_v59  ;;  %v8422_v7 = vpop.eup %8421 }
 0xac1   : > { %8423 = vtanh.f32 %v5838_v6 }
 0xacb   : > { %v8424_v5 = vpop.eup %8423 }
 0xacc   : > { %v5840_v10 = vmul.f32 %v8424_v5, %v8422_v7 }
 0xace   : > { %5950 = vmatmul.mubr.f32.vlgmr.msra.gmra.mrb[34].mxu0 %v5840_v10 }
 0xba1   : > { %v5951_v1 = vpop.f32.mrb[34].mxu0 }
 0xba2   : > { %v5952_v31 = vadd.f32 %v5951_v1, %v5878_v23  ;;  %v5953_v32 = vpop.f32.mrb[35].mxu0 }
 0xba3   : > { %v5954_v41 = vadd.f32 %v5953_v32, %v5882_v24 }
 0xba5   : > { %v5958_v42 = vcombine.low %v5952_v31, %v5954_v41 }
 0xba7   : > { %v5965_v62 = vrot.slane %v5958_v42, %v10226_v13 }
 0xba9   : > { %v5972_v2 = vrot.slane %v5965_v62, %v10226_v13 }
 0xbab   : > { %5978 = vst.msk [vmem:[%s637_s21] sm:$0x3] %vm5976_vm9, %v5972_v2 }
 0xbac   : > { %8634 = shalt.err (!%p8631_p6)
}
 0xbad   : > { %s8635_s17 = scalar_lea.hbm %s10414_s24, 32  ;;  %s8639_s1 = scalar_lea.hbm %s10522_s22, 64 }
 0xbae   : > { %p8636_p5 = scmp.ne.s32.totalorder %s10414_s24, %s8635_s17  ;;  %p8640_p10 = scmp.lt.u32.totalorder %s10414_s24, %s10522_s22 }
 0xbaf   : > { %p8641_p2 = scmp.lt.u32.totalorder %s8639_s1, %s8635_s17  ;;  %p8643_p4 = scmp.lt.u32.totalorder %s8635_s17, %s10414_s24 }
 0xbb0   : > { %p8637_p9 = pnand %p8636_p5, %p10523_p7 }
 0xbb1   : > { %p8642_p3 = por %p8641_p2, %p8640_p10 }
 0xbb2   : > { %p8638_p12 = pneg %p8637_p9 }
 0xbb3   : > { %p8644_p8 = por %p8643_p4, %p8642_p3 }
 0xbb5   : > { %p8645_p11 = pnand %p8644_p8, %p8638_p12 }
 0xbb7   : > { %8648 = shalt.err (!%p8645_p11)
}
 0xbb8   : > { %8304 = dma.vmem_to_hbm [thread:$0]  (%p10523_p7), %s10416_s18, 32, %s10414_s24, %s5980_s28  }
 0xbb9 PF: > { %s10524_s21 = sld [smem:[#allocation22_spill]]  ;;  %s10525_s29 = sld [smem:[#allocation20_spill]] }
 0xbba   : > { %s10526_s3 = sld [smem:[#allocation26_spill]] }
 0xbbf   : > { %p8346_p13 = scmp.ge.s32.totalorder %s10524_s21, 2  ;;  %s6006_s23 = sand.u32 1, %s10525_s29  }
 0xbc0   : > { %p10527_p1 = scmp.ne.s32.totalorder %s10526_s3, 0  ;;  %s6007_s30 = scalar_lea.sflag [#allocation4], %s6006_s23 }
 0xbc2   : > { %p8329_p0 = pnand %p8346_p13, %p10527_p1 }
 0xbc4   : > { %8682 = dma.done.wait (!%p8329_p0), %s6007_s30, 32  }
 0xbc5   : > { %8684 = vsyncadd (!%p8329_p0), %s6007_s30, 4294967264  ;;  %s10528_s27 = sld [smem:[#allocation23_spill]]  ;;  %s10529_s16 = sld [smem:[#allocation21_spill]] }
 0xbc6   : > { %s10530_s26 = sld [smem:[#allocation24_spill]]  ;;  %s10531_s24 = smov %s8691_s25 }
 0xbcb   : > { %p31_p6 = scmp.ge.s32.totalorder %s10528_s27, 4   ;;  %s10532_s25 = smov %s10529_s16 }
 0xbcd   :  { %33 = sbr.rel (!%p31_p6) target bundleno = 15 (0xf), region = 184 }
 0xbd4   :  { %6012 = vsyncpa [#allocation3], 1 }
 0xbd5   :  { %6014 = vsyncpa [#allocation3 + $0x1], 1 }
 0xbd6   :  { %6015 = vsyncpa [#allocation6], 1 }
 0xbd7   :  { %6016 = vsyncpa [#allocation9], 1 }
 0xbd8   :  { %6017 = vsyncpa [#allocation12], 1 }
 0xbd9   :  { %6018 = vsyncpa [#allocation4], 1 }
 0xbda   :  { %6020 = vsyncpa [#allocation4 + $0x1], 1 }

</bundles_post_ra>
